<compile_context>
chip_gen: v6e
topology: v6e:2x2x1
jax: 0.10.0
libtpu: 0.0.40
codegen_flags: <defaults>
</compile_context>

<pallas_src>
import functools

import jax
import jax.numpy as jnp
import numpy as np
from jax import lax
from jax.experimental import pallas as pl
from jax.experimental.pallas import tpu as pltpu

_ACT_DTYPE = jnp.bfloat16            # inter-layer activations + MXU operands
_VMEM_LIMIT_BYTES = 48 * 1024 * 1024  # > scoped defaults, < v7x physical
_ROW_TILE_ROWS = 8                   # output rows per band; small so the unit
                                     # test exercises multi-band halos; raise
                                     # (32/64) for production resolutions.


def _round_up(v, m):
    return (v + m - 1) // m * m


def _pick_band(H, hb):
    """Largest TH <= _ROW_TILE_ROWS with H % TH == 0 and TH % hb == 0.
    Falls back to TH = H (single band), which is always safe."""
    for th in range(min(_ROW_TILE_ROWS, H), 0, -1):
        if H % th == 0 and th % hb == 0:
            return th
    return H


# ---------------------------------------------------------------------------
# In-kernel helpers
# ---------------------------------------------------------------------------
def _fill_im2col(xq_ref, xsrc, d, W):
    """Write xsrc (R, W, C) into xq_ref (R, Wq8, 3*C) so that channel group kw
    holds the input shifted by kw*d - d columns (zero padded by d).  Only the
    thin column-halo strips are zeroed; garbage columns >= W are never used
    for kept outputs."""
    C = xsrc.shape[-1]
    R = xq_ref.shape[0]
    x = xsrc.astype(xq_ref.dtype)
    zc = jnp.zeros((R, d, C), xq_ref.dtype)
    # kw = 0 : shifted right by d
    xq_ref[:, 0:d, 0:C] = zc
    xq_ref[:, d:d + W, 0:C] = x
    # kw = 1 : aligned
    xq_ref[:, 0:W, C:2 * C] = x
    # kw = 2 : shifted left by d
    xq_ref[:, 0:W - d, 2 * C:3 * C] = x[:, d:, :]
    xq_ref[:, W - d:W, 2 * C:3 * C] = zc


def _conv_kh(xq_ref, wm_ref, rout, d):
    """3 matmuls with K=3*C (kw merged into channels): xq_ref (R, Wq8, 3C),
    wm_ref (3, 3C, Cout).  Returns f32 (rout, Wq8, Cout); cols >= W garbage."""
    Wq8 = xq_ref.shape[1]
    K = xq_ref.shape[2]
    Cout = wm_ref.shape[-1]
    acc = jnp.zeros((rout * Wq8, Cout), jnp.float32)
    for kh in range(3):
        band = xq_ref[kh * d:kh * d + rout, :, :].reshape(rout * Wq8, K)
        acc = acc + jnp.dot(band, wm_ref[kh], preferred_element_type=jnp.float32)
    return acc.reshape(rout, Wq8, Cout)


# ---------------------------------------------------------------------------
# Kernels
# ---------------------------------------------------------------------------
def _block_kernel(*refs, TH, W, d, H, identity):
    """Fused BasicBlock over one row band: conv3x3+BN+ReLU -> conv3x3+BN ->
    + residual (NO final ReLU, as in the PyTorch module).  The conv1
    intermediate lives only in VMEM (halo-grown by d rows each side)."""
    if identity:
        (xm_ref, xt_ref, xb_ref, w1_ref, s1_ref, b1_ref,
         w2_ref, s2_ref, b2_ref, out_ref, xq1_ref, xq2_ref) = refs
        res_ref = None
    else:
        (xm_ref, xt_ref, xb_ref, res_ref, w1_ref, s1_ref, b1_ref,
         w2_ref, s2_ref, b2_ref, out_ref, xq1_ref, xq2_ref) = refs

    j = pl.program_id(1)
    nb = pl.num_programs(1)
    Cout = out_ref.shape[-1]

    # Extended input rows: [j*TH - 2d, (j+1)*TH + 2d), zeros outside the image.
    xtv = jnp.where(j > 0, xt_ref[0], 0.0)
    xbv = jnp.where(j < nb - 1, xb_ref[0], 0.0)
    xmv = xm_ref[0]
    xe = jnp.concatenate([xtv, xmv, xbv], axis=0)            # (TH+4d, W, Cin)

    # conv1 + BN + ReLU over TH+2d output rows (extra d rows feed conv2's halo)
    _fill_im2col(xq1_ref, xe, d, W)
    y1 = _conv_kh(xq1_ref, w1_ref, TH + 2 * d, d)[:, :W, :]
    y1 = jnp.maximum(y1 * s1_ref[0] + b1_ref[0], 0.0)

    # conv2 must see ZERO padding outside the image, not conv1-of-padding.
    o = lax.broadcasted_iota(jnp.int32, (TH + 2 * d, 1, 1), 0)
    img_row = o + (j * TH - d)
    valid = jnp.logical_and(img_row >= 0, img_row < H)
    y1 = jnp.where(valid, y1, 0.0)

    # conv2 + BN + residual
    _fill_im2col(xq2_ref, y1, d, W)
    y2 = _conv_kh(xq2_ref, w2_ref, TH, d)[:, :W, :]
    y2 = y2 * s2_ref[0] + b2_ref[0]
    res = xmv if identity else res_ref[0]
    y2 = y2 + res.astype(jnp.float32)
    out_ref[...] = y2.astype(out_ref.dtype).reshape(1, TH, W, Cout)


def _conv3x3_bn_kernel(*refs, TH, W, d, relu, has_res):
    """Single 3x3 conv (stride 1) + folded BN (+ReLU) (+residual), row band."""
    if has_res:
        (xm_ref, xt_ref, xb_ref, res_ref, w_ref, s_ref, b_ref,
         out_ref, xq_ref) = refs
    else:
        (xm_ref, xt_ref, xb_ref, w_ref, s_ref, b_ref, out_ref, xq_ref) = refs
        res_ref = None

    j = pl.program_id(1)
    nb = pl.num_programs(1)
    Cout = out_ref.shape[-1]

    xtv = jnp.where(j > 0, xt_ref[0], 0.0)
    xbv = jnp.where(j < nb - 1, xb_ref[0], 0.0)
    xe = jnp.concatenate([xtv, xm_ref[0], xbv], axis=0)      # (TH+2d, W, Cin)

    _fill_im2col(xq_ref, xe, d, W)
    y = _conv_kh(xq_ref, w_ref, TH, d)[:, :W, :]
    y = y * s_ref[0] + b_ref[0]
    if relu:
        y = jnp.maximum(y, 0.0)
    if res_ref is not None:
        y = y + res_ref[0].astype(jnp.float32)
    out_ref[...] = y.astype(out_ref.dtype).reshape(1, TH, W, Cout)


def _conv3x3_s2_kernel(xf_ref, w_ref, s_ref, b_ref, out_ref, xq_ref,
                       *, Ho, Wo, C, relu):
    """Stride-2 3x3 conv + BN (+ReLU), computed only at output positions.
    The wrapper passes x reshaped (free) to (1, H/2, 2, W/2, 2C) so row/col
    parities are contiguous; the 9 taps are packed into one K=9*C matmul."""
    cdt = xq_ref.dtype
    Wq8 = xq_ref.shape[1]
    Cout = out_ref.shape[-1]
    x_e = xf_ref[0, :, 0, :, :].astype(cdt)      # even input rows (Ho, Wo, 2C)
    x_o = xf_ref[0, :, 1, :, :].astype(cdt)      # odd input rows
    zrow = jnp.zeros((1, Wo, C), cdt)
    zcol = jnp.zeros((Ho, 1, C), cdt)
    for kh in range(3):
        rsrc = x_e if kh == 1 else x_o
        for kw in range(3):
            lo = (kh * 3 + kw) * C
            csrc = rsrc[:, :, 0:C] if kw == 1 else rsrc[:, :, C:2 * C]
            r0 = 1 if kh == 0 else 0             # needs row 2*ho - 1
            c0 = 1 if kw == 0 else 0             # needs col 2*wo - 1
            xq_ref[r0:Ho, c0:Wo, lo:lo + C] = csrc[0:Ho - r0, 0:Wo - c0, :]
            if r0:
                xq_ref[0:1, 0:Wo, lo:lo + C] = zrow
            if c0:
                xq_ref[0:Ho, 0:1, lo:lo + C] = zcol
    acc = jnp.dot(xq_ref[...].reshape(Ho * Wq8, 9 * C), w_ref[...],
                  preferred_element_type=jnp.float32)
    y = acc.reshape(Ho, Wq8, Cout)[:, :Wo, :]
    y = y * s_ref[0] + b_ref[0]
    if relu:
        y = jnp.maximum(y, 0.0)
    out_ref[...] = y.astype(out_ref.dtype).reshape(1, Ho, Wo, Cout)


def _conv1x1_kernel(x_ref, w_ref, s_ref, b_ref, out_ref):
    _, H, W, Cin = x_ref.shape
    Cout = out_ref.shape[-1]
    x = x_ref[0].reshape(H * W, Cin).astype(w_ref.dtype)
    y = jnp.dot(x, w_ref[...], preferred_element_type=jnp.float32)
    y = y * s_ref[0] + b_ref[0]
    out_ref[...] = y.astype(out_ref.dtype).reshape(1, H, W, Cout)


def _conv1x1_s2_kernel(xf_ref, w_ref, s_ref, b_ref, out_ref):
    """1x1 stride-2 conv + BN (BasicBlock downsample): strided in-kernel."""
    Cin = w_ref.shape[0]
    _, Ho, _, Wo, _ = xf_ref.shape
    Cout = out_ref.shape[-1]
    xs = xf_ref[0, :, 0, :, 0:Cin]               # even rows & even cols
    y = jnp.dot(xs.reshape(Ho * Wo, Cin).astype(w_ref.dtype), w_ref[...],
                preferred_element_type=jnp.float32)
    y = y * s_ref[0] + b_ref[0]
    out_ref[...] = y.astype(out_ref.dtype).reshape(1, Ho, Wo, Cout)


# ---------------------------------------------------------------------------
# pallas_call builders (memoized so repeated layer shapes reuse executables)
# ---------------------------------------------------------------------------
def _cparams(sem):
    return pltpu.CompilerParams(dimension_semantics=sem,
                                vmem_limit_bytes=_VMEM_LIMIT_BYTES)


def _chan_specs_banded(cout):
    return [pl.BlockSpec((1, cout), lambda n, j: (0, 0)),
            pl.BlockSpec((1, cout), lambda n, j: (0, 0))]


def _band_specs(H, W, C, TH, hb):
    hblocks = (H + hb - 1) // hb
    main = lambda n, j: (n, j, 0, 0)
    top = lambda n, j: (n, jnp.maximum(j * (TH // hb) - 1, 0), 0, 0)
    bot = lambda n, j: (n, jnp.minimum((j + 1) * (TH // hb), hblocks - 1), 0, 0)
    return [pl.BlockSpec((1, TH, W, C), main),
            pl.BlockSpec((1, hb, W, C), top),
            pl.BlockSpec((1, hb, W, C), bot)], main


@functools.lru_cache(maxsize=None)
def _build_block_call(N, H, W, Cin, Cout, d, identity):
    hb = 2 * d                                    # halo grows through the fusion
    TH = _pick_band(H, hb)
    nb = H // TH
    Wq8 = _round_up(W + d, 8)
    specs, main = _band_specs(H, W, Cin, TH, hb)
    if not identity:
        specs.append(pl.BlockSpec((1, TH, W, Cout), main))
    specs += ([pl.BlockSpec((3, 3 * Cin, Cout), lambda n, j: (0, 0, 0))]
              + _chan_specs_banded(Cout)
              + [pl.BlockSpec((3, 3 * Cout, Cout), lambda n, j: (0, 0, 0))]
              + _chan_specs_banded(Cout))
    kernel = functools.partial(_block_kernel, TH=TH, W=W, d=d, H=H,
                               identity=identity)
    return pl.pallas_call(
        kernel,
        out_shape=jax.ShapeDtypeStruct((N, H, W, Cout), _ACT_DTYPE),
        grid_spec=pltpu.PrefetchScalarGridSpec(
            num_scalar_prefetch=0,
            grid=(N, nb),
            in_specs=specs,
            out_specs=pl.BlockSpec((1, TH, W, Cout), main),
            scratch_shapes=[pltpu.VMEM((TH + 4 * d, Wq8, 3 * Cin), _ACT_DTYPE),
                            pltpu.VMEM((TH + 2 * d, Wq8, 3 * Cout), _ACT_DTYPE)]),
        compiler_params=_cparams(("parallel", "parallel")))


@functools.lru_cache(maxsize=None)
def _build_conv3x3_call(N, H, W, Cin, Cout, d, relu, has_res):
    hb = d
    TH = _pick_band(H, hb)
    nb = H // TH
    Wq8 = _round_up(W + d, 8)
    specs, main = _band_specs(H, W, Cin, TH, hb)
    if has_res:
        specs.append(pl.BlockSpec((1, TH, W, Cout), main))
    specs += ([pl.BlockSpec((3, 3 * Cin, Cout), lambda n, j: (0, 0, 0))]
              + _chan_specs_banded(Cout))
    kernel = functools.partial(_conv3x3_bn_kernel, TH=TH, W=W, d=d,
                               relu=relu, has_res=has_res)
    return pl.pallas_call(
        kernel,
        out_shape=jax.ShapeDtypeStruct((N, H, W, Cout), _ACT_DTYPE),
        grid_spec=pltpu.PrefetchScalarGridSpec(
            num_scalar_prefetch=0,
            grid=(N, nb),
            in_specs=specs,
            out_specs=pl.BlockSpec((1, TH, W, Cout), main),
            scratch_shapes=[pltpu.VMEM((TH + 2 * d, Wq8, 3 * Cin), _ACT_DTYPE)]),
        compiler_params=_cparams(("parallel", "parallel")))


@functools.lru_cache(maxsize=None)
def _build_conv3x3_s2_call(N, H, W, Cin, Cout, relu):
    Ho, Wo = H // 2, W // 2
    Wq8 = _round_up(Wo, 8)
    kernel = functools.partial(_conv3x3_s2_kernel, Ho=Ho, Wo=Wo, C=Cin, relu=relu)
    in_specs = [pl.BlockSpec((1, Ho, 2, Wo, 2 * Cin), lambda n: (n, 0, 0, 0, 0)),
                pl.BlockSpec((9 * Cin, Cout), lambda n: (0, 0)),
                pl.BlockSpec((1, Cout), lambda n: (0, 0)),
                pl.BlockSpec((1, Cout), lambda n: (0, 0))]
    return pl.pallas_call(
        kernel,
        out_shape=jax.ShapeDtypeStruct((N, Ho, Wo, Cout), _ACT_DTYPE),
        grid_spec=pltpu.PrefetchScalarGridSpec(
            num_scalar_prefetch=0, grid=(N,),
            in_specs=in_specs,
            out_specs=pl.BlockSpec((1, Ho, Wo, Cout), lambda n: (n, 0, 0, 0)),
            scratch_shapes=[pltpu.VMEM((Ho, Wq8, 9 * Cin), _ACT_DTYPE)]),
        compiler_params=_cparams(("parallel",)))


@functools.lru_cache(maxsize=None)
def _build_conv1x1_call(N, H, W, Cin, Cout):
    in_specs = [pl.BlockSpec((1, H, W, Cin), lambda n: (n, 0, 0, 0)),
                pl.BlockSpec((Cin, Cout), lambda n: (0, 0)),
                pl.BlockSpec((1, Cout), lambda n: (0, 0)),
                pl.BlockSpec((1, Cout), lambda n: (0, 0))]
    return pl.pallas_call(
        _conv1x1_kernel,
        out_shape=jax.ShapeDtypeStruct((N, H, W, Cout), _ACT_DTYPE),
        grid_spec=pltpu.PrefetchScalarGridSpec(
            num_scalar_prefetch=0, grid=(N,),
            in_specs=in_specs,
            out_specs=pl.BlockSpec((1, H, W, Cout), lambda n: (n, 0, 0, 0))),
        compiler_params=_cparams(("parallel",)))


@functools.lru_cache(maxsize=None)
def _build_conv1x1_s2_call(N, H, W, Cin, Cout):
    Ho, Wo = H // 2, W // 2
    in_specs = [pl.BlockSpec((1, Ho, 2, Wo, 2 * Cin), lambda n: (n, 0, 0, 0, 0)),
                pl.BlockSpec((Cin, Cout), lambda n: (0, 0)),
                pl.BlockSpec((1, Cout), lambda n: (0, 0)),
                pl.BlockSpec((1, Cout), lambda n: (0, 0))]
    return pl.pallas_call(
        _conv1x1_s2_kernel,
        out_shape=jax.ShapeDtypeStruct((N, Ho, Wo, Cout), _ACT_DTYPE),
        grid_spec=pltpu.PrefetchScalarGridSpec(
            num_scalar_prefetch=0, grid=(N,),
            in_specs=in_specs,
            out_specs=pl.BlockSpec((1, Ho, Wo, Cout), lambda n: (n, 0, 0, 0))),
        compiler_params=_cparams(("parallel",)))


# ---------------------------------------------------------------------------
# Thin wrappers
# ---------------------------------------------------------------------------
def conv3x3_bn(x, cp, *, d=1, relu=True, residual=None):
    N, H, W, Cin = x.shape
    Cout = cp["w"].shape[-1]
    fn = _build_conv3x3_call(N, H, W, Cin, Cout, d, relu, residual is not None)
    args = (x, x, x) if residual is None else (x, x, x, residual)
    return fn(*args, cp["w"], cp["s"], cp["b"])


def conv3x3_s2_bn(x, cp, *, relu=True):
    N, H, W, Cin = x.shape
    Cout = cp["w"].shape[-1]
    xf = x.reshape(N, H // 2, 2, W // 2, 2 * Cin)      # free contiguous reshape
    fn = _build_conv3x3_s2_call(N, H, W, Cin, Cout, relu)
    return fn(xf, cp["w"].reshape(9 * Cin, Cout), cp["s"], cp["b"])


def conv1x1_bn(x, cp):
    N, H, W, Cin = x.shape
    Cout = cp["w"].shape[-1]
    return _build_conv1x1_call(N, H, W, Cin, Cout)(x, cp["w"], cp["s"], cp["b"])


def conv1x1_s2_bn(x, cp):
    N, H, W, Cin = x.shape
    Cout = cp["w"].shape[-1]
    xf = x.reshape(N, H // 2, 2, W // 2, 2 * Cin)
    return _build_conv1x1_s2_call(N, H, W, Cin, Cout)(xf, cp["w"], cp["s"], cp["b"])


def basic_block(x, blk, *, d=1, residual=None):
    """Fused stride-1 BasicBlock. `residual` overrides the identity shortcut
    (used when the PyTorch block has a 1x1 downsample)."""
    N, H, W, Cin = x.shape
    c1, c2 = blk["conv1"], blk["conv2"]
    Cout = c2["w"].shape[-1]
    identity = residual is None
    fn = _build_block_call(N, H, W, Cin, Cout, d, identity)
    args = (x, x, x) if identity else (x, x, x, residual)
    return fn(*args, c1["w"], c1["s"], c1["b"], c2["w"], c2["s"], c2["b"])


# ---------------------------------------------------------------------------
# feature_extraction.forward (concat_feature=False)
# ---------------------------------------------------------------------------
def feature_extraction_forward(x_nchw, params):
    x = jnp.transpose(x_nchw, (0, 2, 3, 1)).astype(_ACT_DTYPE)   # NCHW -> NHWC

    # firstconv: convbn(3,32,s2)+ReLU, convbn(32,32)+ReLU, convbn(32,32)+ReLU
    fc = params["firstconv"]
    y = conv3x3_s2_bn(x, fc[0], relu=True)
    y = conv3x3_bn(y, fc[1], relu=True)
    y = conv3x3_bn(y, fc[2], relu=True)

    # layer1: 3 x BasicBlock(32->32, stride 1, dilation 1)
    for blk in params["layer1"]:
        y = basic_block(y, blk, d=1)

    # layer2: BasicBlock(32->64, stride 2, 1x1-s2 downsample) + 15 x (64->64)
    b0 = params["layer2"][0]
    t = conv3x3_s2_bn(y, b0["conv1"], relu=True)
    ds = conv1x1_s2_bn(y, b0["down"])
    l2 = conv3x3_bn(t, b0["conv2"], relu=False, residual=ds)
    for blk in params["layer2"][1:]:
        l2 = basic_block(l2, blk, d=1)

    # layer3: BasicBlock(64->128, stride 1, 1x1 downsample) + 2 x (128->128)
    b0 = params["layer3"][0]
    l3 = basic_block(l2, b0, d=1, residual=conv1x1_bn(l2, b0["down"]))
    for blk in params["layer3"][1:]:
        l3 = basic_block(l3, blk, d=1)

    # layer4: 3 x BasicBlock(128->128, stride 1, dilation 2, padding 2)
    l4 = l3
    for blk in params["layer4"]:
        l4 = basic_block(l4, blk, d=2)

    gwc = jnp.concatenate([l2, l3, l4], axis=-1).astype(jnp.float32)
    # TODO(synk): concat_feature=True branch (lastconv: convbn(320,128)+ReLU +
    # 1x1 conv) not implemented; the module defaults to concat_feature=False.
    return {"gwc_feature": jnp.transpose(gwc, (0, 3, 1, 2))}     # -> NCHW


# ---------------------------------------------------------------------------
# Parameters (eval-mode BN folded into scale/bias), kernel-ready + HWIO copies
# ---------------------------------------------------------------------------
def _fold_bn(gamma, beta, mean, var, eps=1e-5):
    scale = gamma / jnp.sqrt(var + eps)
    return scale, beta - mean * scale


def _make_conv_params(key, cin, cout, ksize=3):
    kws, kg, kb, km, kv = jax.random.split(key, 5)
    fan_in = ksize * ksize * cin
    shape = (ksize, ksize, cin, cout) if ksize == 3 else (cin, cout)
    w = (jax.random.normal(kws, shape, jnp.float32)
         * np.sqrt(2.0 / fan_in) * 0.5)
    gamma = 1.0 + 0.1 * jax.random.normal(kg, (cout,), jnp.float32)
    beta = 0.1 * jax.random.normal(kb, (cout,), jnp.float32)
    mean = 0.05 * jax.random.normal(km, (cout,), jnp.float32)
    var = 1.0 + 0.1 * jax.random.uniform(kv, (cout,), jnp.float32)
    s, b = _fold_bn(gamma, beta, mean, var)
    wk = (w.reshape(3, 3 * cin, cout) if ksize == 3 else w).astype(_ACT_DTYPE)
    return {"w_hwio": w, "w": wk,
            "s": s.reshape(1, cout), "b": b.reshape(1, cout)}


def _make_block_params(key, cin, cout, with_down=False):
    k1, k2, k3 = jax.random.split(key, 3)
    blk = {"conv1": _make_conv_params(k1, cin, cout),
           "conv2": _make_conv_params(k2, cout, cout)}
    if with_down:
        blk["down"] = _make_conv_params(k3, cin, cout, ksize=1)
    return blk


def make_params(key):
    nxt = iter(list(jax.random.split(key, 32))).__next__
    return {
        "firstconv": [_make_conv_params(nxt(), 3, 32),
                      _make_conv_params(nxt(), 32, 32),
                      _make_conv_params(nxt(), 32, 32)],
        "layer1": [_make_block_params(nxt(), 32, 32) for _ in range(3)],
        "layer2": ([_make_block_params(nxt(), 32, 64, with_down=True)]
                   + [_make_block_params(nxt(), 64, 64) for _ in range(15)]),
        "layer3": ([_make_block_params(nxt(), 64, 128, with_down=True)]
                   + [_make_block_params(nxt(), 128, 128) for _ in range(2)]),
        "layer4": [_make_block_params(nxt(), 128, 128) for _ in range(3)],
    }


# ---------------------------------------------------------------------------
# Pure-JAX reference, mirroring the kernel precision policy exactly
# (bf16 conv operands / inter-layer activations, f32 accumulation + BN).
# ---------------------------------------------------------------------------
def _ref_conv3x3_bn(x, cp, stride=1, d=1, relu=False):
    N, H, W, Cin = x.shape
    w = cp["w_hwio"].astype(_ACT_DTYPE)
    Cout = w.shape[-1]
    pad = d
    xp = jnp.pad(x, ((0, 0), (pad, pad), (pad, pad), (0, 0)))
    Ho = (H - 1) // stride + 1
    Wo = (W - 1) // stride + 1
    acc = jnp.zeros((N, Ho, Wo, Cout), jnp.float32)
    for kh in range(3):
        for kw in range(3):
            tap = xp[:, kh * d:kh * d + (Ho - 1) * stride + 1:stride,
                     kw * d:kw * d + (Wo - 1) * stride + 1:stride, :]
            acc = acc + jnp.einsum('nhwc,co->nhwo', tap, w[kh, kw],
                                   preferred_element_type=jnp.float32)
    y = acc * cp["s"][0] + cp["b"][0]
    if relu:
        y = jnp.maximum(y, 0.0)
    return y                                                     # f32


def _ref_conv1x1_bn(x, cp, stride=1):
    xs = x[:, ::stride, ::stride, :].astype(_ACT_DTYPE)
    y = jnp.einsum('nhwc,co->nhwo', xs, cp["w_hwio"].astype(_ACT_DTYPE),
                   preferred_element_type=jnp.float32)
    return y * cp["s"][0] + cp["b"][0]                           # f32


def _ref_block(x, blk, d=1, res=None):
    y1 = _ref_conv3x3_bn(x, blk["conv1"], 1, d, relu=True).astype(_ACT_DTYPE)
    y2 = _ref_conv3x3_bn(y1, blk["conv2"], 1, d, relu=False)
    r = x if res is None else res
    return (y2 + r.astype(jnp.float32)).astype(_ACT_DTYPE)


def reference_forward(x_nchw, params):
    x = jnp.transpose(x_nchw, (0, 2, 3, 1)).astype(_ACT_DTYPE)
    fc = params["firstconv"]
    y = _ref_conv3x3_bn(x, fc[0], 2, 1, True).astype(_ACT_DTYPE)
    y = _ref_conv3x3_bn(y, fc[1], 1, 1, True).astype(_ACT_DTYPE)
    y = _ref_conv3x3_bn(y, fc[2], 1, 1, True).astype(_ACT_DTYPE)
    for blk in params["layer1"]:
        y = _ref_block(y, blk, d=1)
    b0 = params["layer2"][0]
    t = _ref_conv3x3_bn(y, b0["conv1"], 2, 1, True).astype(_ACT_DTYPE)
    ds = _ref_conv1x1_bn(y, b0["down"], stride=2).astype(_ACT_DTYPE)
    l2 = (_ref_conv3x3_bn(t, b0["conv2"], 1, 1, False)
          + ds.astype(jnp.float32)).astype(_ACT_DTYPE)
    for blk in params["layer2"][1:]:
        l2 = _ref_block(l2, blk, d=1)
    b0 = params["layer3"][0]
    ds = _ref_conv1x1_bn(l2, b0["down"], stride=1).astype(_ACT_DTYPE)
    l3 = _ref_block(l2, b0, d=1, res=ds)
    for blk in params["layer3"][1:]:
        l3 = _ref_block(l3, blk, d=1)
    l4 = l3
    for blk in params["layer4"]:
        l4 = _ref_block(l4, blk, d=2)
    gwc = jnp.concatenate([l2, l3, l4], axis=-1).astype(jnp.float32)
    return jnp.transpose(gwc, (0, 3, 1, 2))


if __name__ == "__main__":
    key = jax.random.PRNGKey(0)
    k_x, k_p = jax.random.split(key)

    N, C, H, W = 2, 3, 32, 32
    x = jax.random.normal(k_x, (N, C, H, W), jnp.float32)
    params = make_params(k_p)

    out = feature_extraction_forward(x, params)
    gwc = jax.block_until_ready(out["gwc_feature"])
    assert gwc.shape == (N, 320, H // 4, W // 4), gwc.shape

    ref = jax.block_until_ready(reference_forward(x, params))
    # Tolerance accounts for bf16 operands / inter-layer activations through a
    # 41-conv network (accumulation-order differences between the in-kernel
    # K=3*Cin matmuls and the reference taps round differently in bf16).
    np.testing.assert_allclose(np.asarray(gwc, dtype=np.float32),
                               np.asarray(ref, dtype=np.float32),
                               rtol=5e-2, atol=5e-2)
    print("KERNEL_OK")
</pallas_src>

<mosaic_0001>
module attributes {stable_mosaic.version = 11 : i64} {
  func.func @_conv3x3_s2_kernel(%arg0: i32, %arg1: memref<1x16x2x16x6xbf16, #tpu.memory_space<vmem>>, %arg2: memref<27x32xbf16, #tpu.memory_space<vmem>>, %arg3: memref<1x32xf32, #tpu.memory_space<vmem>>, %arg4: memref<1x32xf32, #tpu.memory_space<vmem>>, %arg5: memref<1x16x16x32xbf16, #tpu.memory_space<vmem>>, %arg6: memref<16x16x27xbf16, #tpu.memory_space<vmem>>) attributes {dimension_semantics = [#tpu.dimension_semantics<parallel>], iteration_bounds = array<i64: 2>, scalar_prefetch = 0 : i64, scratch_operands = 1 : i64, tpu.core_type = #tpu.core_type<tc>, window_params = [{transform_indices = @transform_0, window_bounds = array<i64: 1, 16, 2, 16, 6>}, {pipeline_mode = #tpu.pipeline_mode<synchronous>, transform_indices = @transform_1, window_bounds = array<i64: 27, 32>}, {pipeline_mode = #tpu.pipeline_mode<synchronous>, transform_indices = @transform_2, window_bounds = array<i64: 1, 32>}, {pipeline_mode = #tpu.pipeline_mode<synchronous>, transform_indices = @transform_3, window_bounds = array<i64: 1, 32>}, {transform_indices = @transform_4, window_bounds = array<i64: 1, 16, 16, 32>}]} {
    %c0 = arith.constant 0 : index
    %c0_0 = arith.constant 0 : index
    %c0_1 = arith.constant 0 : index
    %c0_2 = arith.constant 0 : index
    %c0_3 = arith.constant 0 : index
    %0 = vector.load %arg1[%c0, %c0_0, %c0_1, %c0_2, %c0_3] : memref<1x16x2x16x6xbf16, #tpu.memory_space<vmem>>, vector<1x16x1x16x6xbf16>
    %1 = vector.shape_cast %0 : vector<1x16x1x16x6xbf16> to vector<16x16x6xbf16>
    %c0_4 = arith.constant 0 : index
    %c0_5 = arith.constant 0 : index
    %c1 = arith.constant 1 : index
    %c0_6 = arith.constant 0 : index
    %c0_7 = arith.constant 0 : index
    %2 = vector.load %arg1[%c0_4, %c0_5, %c1, %c0_6, %c0_7] : memref<1x16x2x16x6xbf16, #tpu.memory_space<vmem>>, vector<1x16x1x16x6xbf16>
    %3 = vector.shape_cast %2 : vector<1x16x1x16x6xbf16> to vector<16x16x6xbf16>
    %cst = arith.constant 0.000000e+00 : bf16
    %4 = vector.broadcast %cst : bf16 to vector<1x16x3xbf16>
    %cst_8 = arith.constant 0.000000e+00 : bf16
    %5 = vector.broadcast %cst_8 : bf16 to vector<16x1x3xbf16>
    %6 = vector.extract_strided_slice %3 {offsets = [0, 0, 3], sizes = [16, 16, 3], strides = [1, 1, 1]} : vector<16x16x6xbf16> to vector<16x16x3xbf16>
    %7 = vector.extract_strided_slice %6 {offsets = [0, 0, 0], sizes = [15, 15, 3], strides = [1, 1, 1]} : vector<16x16x3xbf16> to vector<15x15x3xbf16>
    %c1_9 = arith.constant 1 : index
    %c1_10 = arith.constant 1 : index
    %c0_11 = arith.constant 0 : index
    %8 = vector.load %arg6[%c1_9, %c1_10, %c0_11] : memref<16x16x27xbf16, #tpu.memory_space<vmem>>, vector<15x15x3xbf16>
    tpu.vector_store %arg6[%c1_9, %c1_10, %c0_11], %7 {strides = array<i32>} : memref<16x16x27xbf16, #tpu.memory_space<vmem>>, vector<15x15x3xbf16>,
    %c0_12 = arith.constant 0 : index
    %c0_13 = arith.constant 0 : index
    %c0_14 = arith.constant 0 : index
    %9 = vector.load %arg6[%c0_12, %c0_13, %c0_14] : memref<16x16x27xbf16, #tpu.memory_space<vmem>>, vector<1x16x3xbf16>
    tpu.vector_store %arg6[%c0_12, %c0_13, %c0_14], %4 {strides = array<i32>} : memref<16x16x27xbf16, #tpu.memory_space<vmem>>, vector<1x16x3xbf16>,
    %c0_15 = arith.constant 0 : index
    %c0_16 = arith.constant 0 : index
    %c0_17 = arith.constant 0 : index
    %10 = vector.load %arg6[%c0_15, %c0_16, %c0_17] : memref<16x16x27xbf16, #tpu.memory_space<vmem>>, vector<16x1x3xbf16>
    tpu.vector_store %arg6[%c0_15, %c0_16, %c0_17], %5 {strides = array<i32>} : memref<16x16x27xbf16, #tpu.memory_space<vmem>>, vector<16x1x3xbf16>,
    %11 = vector.extract_strided_slice %3 {offsets = [0, 0, 0], sizes = [16, 16, 3], strides = [1, 1, 1]} : vector<16x16x6xbf16> to vector<16x16x3xbf16>
    %12 = vector.extract_strided_slice %11 {offsets = [0, 0, 0], sizes = [15, 16, 3], strides = [1, 1, 1]} : vector<16x16x3xbf16> to vector<15x16x3xbf16>
    %c1_18 = arith.constant 1 : index
    %c0_19 = arith.constant 0 : index
    %c3 = arith.constant 3 : index
    %13 = vector.load %arg6[%c1_18, %c0_19, %c3] : memref<16x16x27xbf16, #tpu.memory_space<vmem>>, vector<15x16x3xbf16>
    tpu.vector_store %arg6[%c1_18, %c0_19, %c3], %12 {strides = array<i32>} : memref<16x16x27xbf16, #tpu.memory_space<vmem>>, vector<15x16x3xbf16>,
    %c0_20 = arith.constant 0 : index
    %c0_21 = arith.constant 0 : index
    %c3_22 = arith.constant 3 : index
    %14 = vector.load %arg6[%c0_20, %c0_21, %c3_22] : memref<16x16x27xbf16, #tpu.memory_space<vmem>>, vector<1x16x3xbf16>
    tpu.vector_store %arg6[%c0_20, %c0_21, %c3_22], %4 {strides = array<i32>} : memref<16x16x27xbf16, #tpu.memory_space<vmem>>, vector<1x16x3xbf16>,
    %15 = vector.extract_strided_slice %3 {offsets = [0, 0, 3], sizes = [16, 16, 3], strides = [1, 1, 1]} : vector<16x16x6xbf16> to vector<16x16x3xbf16>
    %16 = vector.extract_strided_slice %15 {offsets = [0, 0, 0], sizes = [15, 16, 3], strides = [1, 1, 1]} : vector<16x16x3xbf16> to vector<15x16x3xbf16>
    %c1_23 = arith.constant 1 : index
    %c0_24 = arith.constant 0 : index
    %c6 = arith.constant 6 : index
    %17 = vector.load %arg6[%c1_23, %c0_24, %c6] : memref<16x16x27xbf16, #tpu.memory_space<vmem>>, vector<15x16x3xbf16>
    tpu.vector_store %arg6[%c1_23, %c0_24, %c6], %16 {strides = array<i32>} : memref<16x16x27xbf16, #tpu.memory_space<vmem>>, vector<15x16x3xbf16>,
    %c0_25 = arith.constant 0 : index
    %c0_26 = arith.constant 0 : index
    %c6_27 = arith.constant 6 : index
    %18 = vector.load %arg6[%c0_25, %c0_26, %c6_27] : memref<16x16x27xbf16, #tpu.memory_space<vmem>>, vector<1x16x3xbf16>
    tpu.vector_store %arg6[%c0_25, %c0_26, %c6_27], %4 {strides = array<i32>} : memref<16x16x27xbf16, #tpu.memory_space<vmem>>, vector<1x16x3xbf16>,
    %19 = vector.extract_strided_slice %1 {offsets = [0, 0, 3], sizes = [16, 16, 3], strides = [1, 1, 1]} : vector<16x16x6xbf16> to vector<16x16x3xbf16>
    %20 = vector.extract_strided_slice %19 {offsets = [0, 0, 0], sizes = [16, 15, 3], strides = [1, 1, 1]} : vector<16x16x3xbf16> to vector<16x15x3xbf16>
    %c0_28 = arith.constant 0 : index
    %c1_29 = arith.constant 1 : index
    %c9 = arith.constant 9 : index
    %21 = vector.load %arg6[%c0_28, %c1_29, %c9] : memref<16x16x27xbf16, #tpu.memory_space<vmem>>, vector<16x15x3xbf16>
    tpu.vector_store %arg6[%c0_28, %c1_29, %c9], %20 {strides = array<i32>} : memref<16x16x27xbf16, #tpu.memory_space<vmem>>, vector<16x15x3xbf16>,
    %c0_30 = arith.constant 0 : index
    %c0_31 = arith.constant 0 : index
    %c9_32 = arith.constant 9 : index
    %22 = vector.load %arg6[%c0_30, %c0_31, %c9_32] : memref<16x16x27xbf16, #tpu.memory_space<vmem>>, vector<16x1x3xbf16>
    tpu.vector_store %arg6[%c0_30, %c0_31, %c9_32], %5 {strides = array<i32>} : memref<16x16x27xbf16, #tpu.memory_space<vmem>>, vector<16x1x3xbf16>,
    %23 = vector.extract_strided_slice %1 {offsets = [0, 0, 0], sizes = [16, 16, 3], strides = [1, 1, 1]} : vector<16x16x6xbf16> to vector<16x16x3xbf16>
    %c0_33 = arith.constant 0 : index
    %c0_34 = arith.constant 0 : index
    %c12 = arith.constant 12 : index
    %24 = vector.load %arg6[%c0_33, %c0_34, %c12] : memref<16x16x27xbf16, #tpu.memory_space<vmem>>, vector<16x16x3xbf16>
    tpu.vector_store %arg6[%c0_33, %c0_34, %c12], %23 {strides = array<i32>} : memref<16x16x27xbf16, #tpu.memory_space<vmem>>, vector<16x16x3xbf16>,
    %25 = vector.extract_strided_slice %1 {offsets = [0, 0, 3], sizes = [16, 16, 3], strides = [1, 1, 1]} : vector<16x16x6xbf16> to vector<16x16x3xbf16>
    %c0_35 = arith.constant 0 : index
    %c0_36 = arith.constant 0 : index
    %c15 = arith.constant 15 : index
    %26 = vector.load %arg6[%c0_35, %c0_36, %c15] : memref<16x16x27xbf16, #tpu.memory_space<vmem>>, vector<16x16x3xbf16>
    tpu.vector_store %arg6[%c0_35, %c0_36, %c15], %25 {strides = array<i32>} : memref<16x16x27xbf16, #tpu.memory_space<vmem>>, vector<16x16x3xbf16>,
    %27 = vector.extract_strided_slice %3 {offsets = [0, 0, 3], sizes = [16, 16, 3], strides = [1, 1, 1]} : vector<16x16x6xbf16> to vector<16x16x3xbf16>
    %28 = vector.extract_strided_slice %27 {offsets = [0, 0, 0], sizes = [16, 15, 3], strides = [1, 1, 1]} : vector<16x16x3xbf16> to vector<16x15x3xbf16>
    %c0_37 = arith.constant 0 : index
    %c1_38 = arith.constant 1 : index
    %c18 = arith.constant 18 : index
    %29 = vector.load %arg6[%c0_37, %c1_38, %c18] : memref<16x16x27xbf16, #tpu.memory_space<vmem>>, vector<16x15x3xbf16>
    tpu.vector_store %arg6[%c0_37, %c1_38, %c18], %28 {strides = array<i32>} : memref<16x16x27xbf16, #tpu.memory_space<vmem>>, vector<16x15x3xbf16>,
    %c0_39 = arith.constant 0 : index
    %c0_40 = arith.constant 0 : index
    %c18_41 = arith.constant 18 : index
    %30 = vector.load %arg6[%c0_39, %c0_40, %c18_41] : memref<16x16x27xbf16, #tpu.memory_space<vmem>>, vector<16x1x3xbf16>
    tpu.vector_store %arg6[%c0_39, %c0_40, %c18_41], %5 {strides = array<i32>} : memref<16x16x27xbf16, #tpu.memory_space<vmem>>, vector<16x1x3xbf16>,
    %31 = vector.extract_strided_slice %3 {offsets = [0, 0, 0], sizes = [16, 16, 3], strides = [1, 1, 1]} : vector<16x16x6xbf16> to vector<16x16x3xbf16>
    %c0_42 = arith.constant 0 : index
    %c0_43 = arith.constant 0 : index
    %c21 = arith.constant 21 : index
    %32 = vector.load %arg6[%c0_42, %c0_43, %c21] : memref<16x16x27xbf16, #tpu.memory_space<vmem>>, vector<16x16x3xbf16>
    tpu.vector_store %arg6[%c0_42, %c0_43, %c21], %31 {strides = array<i32>} : memref<16x16x27xbf16, #tpu.memory_space<vmem>>, vector<16x16x3xbf16>,
    %33 = vector.extract_strided_slice %3 {offsets = [0, 0, 3], sizes = [16, 16, 3], strides = [1, 1, 1]} : vector<16x16x6xbf16> to vector<16x16x3xbf16>
    %c0_44 = arith.constant 0 : index
    %c0_45 = arith.constant 0 : index
    %c24 = arith.constant 24 : index
    %34 = vector.load %arg6[%c0_44, %c0_45, %c24] : memref<16x16x27xbf16, #tpu.memory_space<vmem>>, vector<16x16x3xbf16>
    tpu.vector_store %arg6[%c0_44, %c0_45, %c24], %33 {strides = array<i32>} : memref<16x16x27xbf16, #tpu.memory_space<vmem>>, vector<16x16x3xbf16>,
    %c0_46 = arith.constant 0 : index
    %c0_47 = arith.constant 0 : index
    %c0_48 = arith.constant 0 : index
    %35 = vector.load %arg6[%c0_46, %c0_47, %c0_48] : memref<16x16x27xbf16, #tpu.memory_space<vmem>>, vector<16x16x27xbf16>
    %36 = vector.shape_cast %35 : vector<16x16x27xbf16> to vector<256x27xbf16>
    %c0_49 = arith.constant 0 : index
    %c0_50 = arith.constant 0 : index
    %37 = vector.load %arg2[%c0_49, %c0_50] : memref<27x32xbf16, #tpu.memory_space<vmem>>, vector<27x32xbf16>
    %cst_51 = arith.constant dense<0.000000e+00> : vector<256x32xf32>
    %38 = tpu.matmul %36, %37, %cst_51 {dimension_numbers = #tpu.dot_dimension_numbers<[1], [0], [0], [1], [0, 0, 1, 1], [], []>} : vector<256x27xbf16>, vector<27x32xbf16>, vector<256x32xf32> -> vector<256x32xf32>
    %39 = vector.shape_cast %38 : vector<256x32xf32> to vector<16x16x32xf32>
    %c0_52 = arith.constant 0 : index
    %c0_53 = arith.constant 0 : index
    %40 = vector.load %arg3[%c0_52, %c0_53] : memref<1x32xf32, #tpu.memory_space<vmem>>, vector<1x32xf32>
    %41 = vector.shape_cast %40 : vector<1x32xf32> to vector<32xf32>
    %42 = vector.shape_cast %41 : vector<32xf32> to vector<1x1x32xf32>
    %43 = vector.broadcast %42 : vector<1x1x32xf32> to vector<16x16x32xf32>
    %44 = arith.mulf %39, %43 : vector<16x16x32xf32>
    %c0_54 = arith.constant 0 : index
    %c0_55 = arith.constant 0 : index
    %45 = vector.load %arg4[%c0_54, %c0_55] : memref<1x32xf32, #tpu.memory_space<vmem>>, vector<1x32xf32>
    %46 = vector.shape_cast %45 : vector<1x32xf32> to vector<32xf32>
    %47 = vector.shape_cast %46 : vector<32xf32> to vector<1x1x32xf32>
    %48 = vector.broadcast %47 : vector<1x1x32xf32> to vector<16x16x32xf32>
    %49 = arith.addf %44, %48 : vector<16x16x32xf32>
    %cst_56 = arith.constant 0.000000e+00 : f32
    %50 = vector.broadcast %cst_56 : f32 to vector<16x16x32xf32>
    %51 = arith.maximumf %49, %50 : vector<16x16x32xf32>
    %52 = arith.truncf %51 : vector<16x16x32xf32> to vector<16x16x32xbf16>
    %53 = vector.shape_cast %52 : vector<16x16x32xbf16> to vector<1x16x16x32xbf16>
    %c0_57 = arith.constant 0 : index
    %c0_58 = arith.constant 0 : index
    %c0_59 = arith.constant 0 : index
    %c0_60 = arith.constant 0 : index
    %54 = vector.load %arg5[%c0_57, %c0_58, %c0_59, %c0_60] : memref<1x16x16x32xbf16, #tpu.memory_space<vmem>>, vector<1x16x16x32xbf16>
    tpu.vector_store %arg5[%c0_57, %c0_58, %c0_59, %c0_60], %53 {strides = array<i32>} : memref<1x16x16x32xbf16, #tpu.memory_space<vmem>>, vector<1x16x16x32xbf16>,
    return
  }
  func.func @transform_0(%arg0: i32) -> (i32, i32, i32, i32, i32) {
    %c0_i32 = arith.constant 0 : i32
    %c0_i32_0 = arith.constant 0 : i32
    %c0_i32_1 = arith.constant 0 : i32
    %c0_i32_2 = arith.constant 0 : i32
    %c0_i32_3 = arith.constant 0 : i32
    return %arg0, %c0_i32, %c0_i32_0, %c0_i32_1, %c0_i32_2 : i32, i32, i32, i32, i32
  }
  func.func @transform_1(%arg0: i32) -> (i32, i32) {
    %c0_i32 = arith.constant 0 : i32
    %c0_i32_0 = arith.constant 0 : i32
    %c0_i32_1 = arith.constant 0 : i32
    return %c0_i32, %c0_i32_0 : i32, i32
  }
  func.func @transform_2(%arg0: i32) -> (i32, i32) {
    %c0_i32 = arith.constant 0 : i32
    %c0_i32_0 = arith.constant 0 : i32
    %c0_i32_1 = arith.constant 0 : i32
    return %c0_i32, %c0_i32_0 : i32, i32
  }
  func.func @transform_3(%arg0: i32) -> (i32, i32) {
    %c0_i32 = arith.constant 0 : i32
    %c0_i32_0 = arith.constant 0 : i32
    %c0_i32_1 = arith.constant 0 : i32
    return %c0_i32, %c0_i32_0 : i32, i32
  }
  func.func @transform_4(%arg0: i32) -> (i32, i32, i32, i32) {
    %c0_i32 = arith.constant 0 : i32
    %c0_i32_0 = arith.constant 0 : i32
    %c0_i32_1 = arith.constant 0 : i32
    %c0_i32_2 = arith.constant 0 : i32
    return %arg0, %c0_i32, %c0_i32_0, %c0_i32_1 : i32, i32, i32, i32
  }
}

</mosaic_0001>

<bundles_post_ra>
// kernel: tpu_custom_call.1
= control target key start
LH: loop header
LB: loop body
LE: loop exit
PB: predicated region body
PF: predicated region fallthrough
CT: control target
= control target key end

     0   :  { %9 = vsyncpa [#allocation4], 0  ;;  %s4616_s0 = inlined_call_operand.vmem [shape: bf16[2,16,2,16,6], index: 0, kind: input, shape index: {}]   ;;  %s4617_s1 = inlined_call_operand.vmem [shape: bf16[27,32], index: 1, kind: input, shape index: {}]   ;;  %s4618_s2 = inlined_call_operand.vmem [shape: f32[1,32], index: 2, kind: input, shape index: {}]   ;;  %s4619_s3 = inlined_call_operand.vmem [shape: f32[1,32], index: 3, kind: input, shape index: {}]   ;;  %s4620_s4 = inlined_call_operand.hbm [shape: bf16[2,16,16,32], index: 4, kind: output, shape index: {}]  }
   0x1   :  { %11 = vsyncpa [#allocation4 + $0x1], 0  ;;  %s3035_s15 = smov 0   ;;  %s3037_s16 = smov 0  }
   0x2   :  { %s3039_s17 = smov 0   ;;  %s3041_s18 = smov 0  }
   0x3 LB: > { %s3056_s19 = sadd.s32 4294967295, %s2997_s18   ;;  %s2645_s20 = sadd.s32 4294967294, %s2997_s18   ;;  %s2997_s18 = sphi %s3041_s18, %s4685_s18   ;;  %s2993_s17 = sphi %s3039_s17, %s4684_s17   ;;  %s2989_s16 = sphi %s3037_s16, %s4683_s16   ;;  %s2985_s15 = sphi %s3035_s15, %s4682_s15  }
   0x4   : > { %s3060_s21 = sadd.s32 1, %s2997_s18   ;;  %s113_s22 = sadd.s32 1, %s2993_s17 }
   0x5   : > { %s110_s23 = ssub.s32 %s2997_s18, %s3060_s21  ;;  %p123_p0 = scmp.ne.s32.totalorder %s2993_s17, %s2989_s16 }
   0x6   : > { %p111_p1 = scmp.eq.s32.totalorder %s110_s23, 0  ;;  %p124_p2 = scmp.eq.s32.totalorder %s3056_s19, 1 }
   0x7   : > { %p129_p3 = scmp.ne.s32.totalorder %s2989_s16, %s2985_s15  ;;  %p130_p4 = scmp.eq.s32.totalorder %s2645_s20, 1 }
   0x8   : > { %s3071_s24 = scalar_select %p111_p1, %s2993_s17, %s113_s22  }
   0x9   : > { %p3073_p5 = por %p124_p2, %p123_p0  ;;  %p3077_p6 = por %p130_p4, %p129_p3 }
   0xa   : > { %p2648_p7 = scmp.ge.s32.totalorder %s2997_s18, 1  ;;  %p165_p8 = scmp.lt.s32.totalorder %s2997_s18, 3 }
   0xc   : > { %p166_p9 = pnand %p2648_p7, %p165_p8 }
   0xe   : > { %169 = sbr.rel (%p166_p9) target bundleno = 749 (0x2ed), region = 36 }
  0x13   : > { %p191_p10 = scmp.lt.s32.totalorder %s3056_s19, 1  ;;  %vm262_vm0 = vsmask.f32 256  ;;  %vm263_vm1 = vsmask.f32 4368  ;;  %s2999_s6 = smov 125  }
  0x14   : > { %vm3118_vm2 = vmor %vm262_vm0, %vm263_vm1  ;;  %s3000_s7 = smov 3   ;;  %vm596_vm3 = vcmask 19456   ;;  %vm832_vm4 = vcmask 44056   ;;  %vm865_vm5 = vcmask 68656   ;;  %vm662_vm6 = vcmask 16384   ;;  %s3002_s8 = smov 6  }
  0x15   : > { %s192_s27 = scalar_select %p191_p10, %s3056_s19, 1  ;;  %vm3334_vm7 = vmand %vm662_vm6, %vm262_vm0  ;;  %vm597_vm8 = vsmask.f32 7938  ;;  %vm1250_vm10 = vcmask 93256   ;;  %vm1317_vm12 = vcmask 90184   ;;  %vm2130_vm14 = vcmask 1044480  }
  0x16   : > { %s3003_s9 = smov 12   ;;  %s3004_s10 = smov 15   ;;  %vm3473_vm9 = vmand %vm596_vm3, %vm597_vm8  ;;  %vm2131_vm15 = vcmask 1045504   ;;  %vm1495_vm1 = vcmask 117856   ;;  %vm1528_vm6 = vcmask 142456  }
  0x17   : > { %s2757_s28 = sshll.u32 %s192_s27, 8  ;;  %vm3666_vm11 = vmand %vm1250_vm10, %vm597_vm8  ;;  %s3006_s13 = smov 21  }
  0x18   : > { %s3088_s5 = scalar_lea.vmem %s4616_s0, %s2757_s28  ;;  %vm3691_vm13 = vmand %vm1317_vm12, %vm262_vm0  ;;  %s188_s27 = sand.u32 1, %s2989_s16  }
  0x19   : > { %v3091_v0 = vld [vmem:[%s3088_s5 + $0x18] sm:$0xf]  ;;  %v3094_v1 = vld [vmem:[%s3088_s5 + $0x8] sm:$0xf]  ;;  %v2655_v2 = vld [vmem:[%s3088_s5 + $0x1c] sm:$0xf] }
  0x1a   : > { %v282_v3 = vshrl.u32 %v3091_v0, 16  ;;  %v285_v4 = vshll.u32 %v3091_v0, 16  ;;  %v266_v5 = vshrl.u32 %v3094_v1, 16  ;;  %v269_v6 = vshll.u32 %v3094_v1, 16  ;;  %v3102_v7 = vld [vmem:[%s3088_s5 + $0x28] sm:$0xf] }
  0x1b   : > { %v290_v8 = vshrl.u32 %v2655_v2, 16  ;;  %v293_v9 = vshll.u32 %v2655_v2, 16  ;;  %v298_v10 = vshrl.u32 %v3102_v7, 16  ;;  %v301_v11 = vshll.u32 %v3102_v7, 16  ;;  %v2657_v12 = vld [vmem:[%s3088_s5 + $0x2c] sm:$0xf] }
  0x1c   : > { %v284_v13 = vrot.slane %v282_v3, 7  ;;  %v268_v14 = vrot.slane %v266_v5, 7  ;;  %v306_v15 = vshrl.u32 %v2657_v12, 16  ;;  %v3108_v16 = vld [vmem:[%s3088_s5 + $0x38] sm:$0xf]  ;;  %v309_v19 = vshll.u32 %v2657_v12, 16 }
  0x1d   : > { %v292_v17 = vrot.slane %v290_v8, 7  ;;  %v300_v18 = vrot.slane %v298_v10, 7  ;;  %v314_v20 = vshrl.u32 %v3108_v16, 16  ;;  %v2659_v21 = vld [vmem:[%s3088_s5 + $0x3c] sm:$0xf]  ;;  %v317_v26 = vshll.u32 %v3108_v16, 16 }
  0x1e   : > { %v3112_v22 = vor.u32 %v285_v4, %v284_v13  ;;  %v288_v23 = vrot.slane %v284_v13, 4  ;;  %v3114_v24 = vor.u32 %v269_v6, %v268_v14  ;;  %v3124_v27 = vld [vmem:[%s3088_s5 + $0xc] sm:$0xf]  ;;  %v3127_v28 = vld [vmem:[%s3088_s5 + $0x48] sm:$0xf]  ;;  %v308_v32 = vrot.slane %v306_v15, 7 }
  0x1f   : > { %v295_v29 = vor.u32 %v293_v9, %v292_v17  ;;  %v3129_v30 = vor.u32 %v301_v11, %v300_v18  ;;  %v304_v31 = vrot.slane %v300_v18, 4  ;;  %v316_v33 = vrot.slane %v314_v20, 7  ;;  %v2661_v37 = vld [vmem:[%s3088_s5 + $0x4c] sm:$0xf]  ;;  %v3144_v42 = vld [vmem:[%s3088_s5 + $0x58] sm:$0xf] }
  0x20   : > { %509 = vrot.lane.b32.xlu1 %v3112_v22, %s2999_s6  ;;  %505 = vrot.lane.b32.xlu0 %v3114_v24, %s2999_s6  ;;  %v322_v34 = vshrl.u32 %v2659_v21, 16  ;;  %v325_v35 = vshll.u32 %v2659_v21, 16  ;;  %v274_v36 = vshrl.u32 %v3124_v27, 16  ;;  %v311_v39 = vor.u32 %v309_v19, %v308_v32  ;;  %v2663_v45 = vld [vmem:[%s3088_s5 + $0x5c] sm:$0xf]  ;;  %s2649_s30 = sshll.u32 %s188_s27, 7 }
  0x21   : > { %v3139_v38 = vsel %vm3118_vm2, %v288_v23, %v295_v29  ;;  %v277_v40 = vshll.u32 %v3124_v27, 16  ;;  %v330_v41 = vshrl.u32 %v3127_v28, 16  ;;  %v272_v46 = vrot.slane %v268_v14, 4  ;;  %v3164_v62 = vld [vmem:[%s3088_s5 + $0x88] sm:$0xf]  ;;  %s3007_s12 = smov [#allocation3]  }
  0x22   : > { %v324_v43 = vrot.slane %v322_v34, 7  ;;  %v276_v44 = vrot.slane %v274_v36, 7  ;;  %v3147_v47 = vor.u32 %v317_v26, %v316_v33  ;;  %v320_v48 = vrot.slane %v316_v33, 4  ;;  %v2666_v5 = vld [vmem:[%s3088_s5 + $0x78] sm:$0xf] }
  0x23   : > { %v338_v49 = vshrl.u32 %v2661_v37, 16  ;;  %v3155_v50 = vsel %vm3118_vm2, %v304_v31, %v311_v39  ;;  %v332_v51 = vrot.slane %v330_v41, 7  ;;  %v341_v52 = vshll.u32 %v2661_v37, 16  ;;  %v3176_v6 = vld [vmem:[%s3088_s5 + $0x68] sm:$0xf] }
  0x24   : > { %511 = vrot.lane.b32.xlu1 %v3139_v38, %s2999_s6  ;;  %513 = vrot.lane.b32.xlu0 %v3129_v30, %s2999_s6  ;;  %v346_v53 = vshrl.u32 %v3144_v42, 16  ;;  %v327_v54 = vor.u32 %v325_v35, %v324_v43  ;;  %v279_v55 = vor.u32 %v277_v40, %v276_v44  ;;  %v354_v57 = vshrl.u32 %v2663_v45, 16  ;;  %v2665_v8 = vld [vmem:[%s3088_s5 + $0x6c] sm:$0xf]  ;;  %v3204_v29 = vld [vmem:[%s3088_s5 + $0xa8] sm:$0xf] }
  0x25   : > { %v340_v56 = vrot.slane %v338_v49, 7  ;;  %v336_v58 = vrot.slane %v332_v51, 4  ;;  %v333_v59 = vshll.u32 %v3127_v28, 16  ;;  %v357_v61 = vshll.u32 %v2663_v45, 16  ;;  %v3211_v35 = vld [vmem:[%s3088_s5 + $0x98] sm:$0xf] }
  0x26   : > { %v348_v60 = vrot.slane %v346_v53, 7  ;;  %v3168_v63 = vsel %vm3118_vm2, %v320_v48, %v327_v54  ;;  %v3172_v2 = vsel %vm3118_vm2, %v272_v46, %v279_v55  ;;  %v356_v4 = vrot.slane %v354_v57, 7  ;;  %v3243_v53 = vld [vmem:[%s3088_s5 + $0xb8] sm:$0xf]  ;;  %v3257_v57 = vld [vmem:[%s3088_s5 + $0xc8] sm:$0xf] }
  0x27   : > { %v343_v3 = vor.u32 %v341_v52, %v340_v56  ;;  %v394_v9 = vshrl.u32 %v3164_v62, 16  ;;  %v3184_v10 = vor.u32 %v333_v59, %v332_v51  ;;  %v349_v12 = vshll.u32 %v3144_v42, 16 }
  0x28   : > { %515 = vrot.lane.b32.xlu1 %v3155_v50, %s2999_s6  ;;  %517 = vrot.lane.b32.xlu0 %v3147_v47, %s2999_s6  ;;  %v352_v11 = vrot.slane %v348_v60, 4  ;;  %v378_v13 = vshrl.u32 %v2666_v5, 16  ;;  %v359_v15 = vor.u32 %v357_v61, %v356_v4  ;;  %v362_v17 = vshrl.u32 %v3176_v6, 16 }
  0x29   : > { %v3189_v14 = vsel %vm3118_vm2, %v336_v58, %v343_v3  ;;  %v370_v18 = vshrl.u32 %v2665_v8, 16  ;;  %v3192_v19 = vrot.slane %v394_v9, 7  ;;  %v397_v20 = vshll.u32 %v3164_v62, 16  ;;  %v3288_v9 = vld [vmem:[%s3088_s5 + $0x80] sm:$0xf] }
  0x2a   : > { %4640 = vst [vmem:[#allocation6_spill] sm:$0xff] %v3189_v14  ;;  %v3199_v21 = vor.u32 %v349_v12, %v348_v60  ;;  %v3201_v23 = vrot.slane %v378_v13, 7  ;;  %v381_v26 = vshll.u32 %v2666_v5, 16  ;;  %v3208_v31 = vsel %vm3118_vm2, %v352_v11, %v359_v15  ;;  %v3291_v11 = vld [vmem:[%s3088_s5 + $0x10] sm:$0xf] }
  0x2b   : > { %4641 = vst [vmem:[#allocation7_spill] sm:$0xff] %v3208_v31  ;;  %v364_v32 = vrot.slane %v362_v17, 7  ;;  %v372_v33 = vrot.slane %v370_v18, 7  ;;  %v373_v34 = vshll.u32 %v2665_v8, 16  ;;  %v3214_v36 = vor.u32 %v397_v20, %v3192_v19  ;;  %v3277_v8 = vld [vmem:[%s3088_s5] sm:$0xf] }
  0x2c   : > { %519 = vrot.lane.b32.xlu1 %v3168_v63, %s2999_s6  ;;  %507 = vrot.lane.b32.xlu0 %v3172_v2, %s2999_s6  ;;  %v3221_v37 = vor.u32 %v381_v26, %v3201_v23  ;;  %v365_v39 = vshll.u32 %v3176_v6, 16  ;;  %v426_v40 = vshrl.u32 %v3204_v29, 16  ;;  %v410_v41 = vshrl.u32 %v3211_v35, 16  ;;  %v3303_v18 = vld [vmem:[%s3088_s5 + $0x90] sm:$0xf] }
  0x2d   : > { %v368_v43 = vrot.slane %v364_v32, 4  ;;  %v375_v44 = vor.u32 %v373_v34, %v372_v33  ;;  %v429_v45 = vshll.u32 %v3204_v29, 16  ;;  %v413_v51 = vshll.u32 %v3211_v35, 16  ;;  %v3308_v26 = vld [vmem:[%s3088_s5 + $0xd8] sm:$0xf] }
  0x2e   : > { %4642 = vst [vmem:[#allocation8_spill] sm:$0xff] %v3221_v37  ;;  %v3231_v46 = vor.u32 %v365_v39, %v364_v32  ;;  %v3233_v48 = vrot.slane %v426_v40, 7  ;;  %v3235_v49 = vrot.slane %v410_v41, 7  ;;  %v442_v56 = vshrl.u32 %v3243_v53, 16 }
  0x2f   : > { %v3240_v52 = vsel %vm3118_vm2, %v368_v43, %v375_v44  ;;  %v445_v59 = vshll.u32 %v3243_v53, 16  ;;  %v458_v60 = vshrl.u32 %v3257_v57, 16  ;;  %v461_v4 = vshll.u32 %v3257_v57, 16  ;;  %v3326_v43 = vld [vmem:[%s3088_s5 + $0xe8] sm:$0xf] }
  0x30   : > { %523 = vrot.lane.b32.xlu1 %v3189_v14, %s2999_s6  ;;  %521 = vrot.lane.b32.xlu0 %v3184_v10, %s2999_s6  ;;  %4643 = vst [vmem:[#allocation9_spill] sm:$0xff] %v3231_v46  ;;  %4644 = vst [vmem:[#allocation10_spill] sm:$0xff] %v3240_v52  ;;  %v3250_v54 = vor.u32 %v429_v45, %v3233_v48  ;;  %v3253_v55 = vor.u32 %v413_v51, %v3235_v49  ;;  %v3263_v58 = vrot.slane %v442_v56, 7  ;;  %v3001_v20 = vmov 0  }
  0x31   : > { %v3273_v3 = vrot.slane %v458_v60, 7  ;;  %v1027_v12 = vshrl.u32 %v3288_v9, 16  ;;  %v902_v15 = vshll.u32 %v3277_v8, 16  ;;  %v915_v17 = vshrl.u32 %v3291_v11, 16  ;;  %660 = vst.msk [vmem:[#allocation2] sm:$0xf] %vm596_vm3, %v3001_v20 }
  0x32   : > { %v3271_v61 = vor.u32 %v445_v59, %v3263_v58  ;;  %661 = vst.msk [vmem:[#allocation2 + $0x4] sm:$0xf] %vm596_vm3, %v3001_v20  ;;  %v1030_v32 = vshll.u32 %v3288_v9, 16  ;;  %v1043_v33 = vshrl.u32 %v3303_v18, 16  ;;  %v918_v40 = vshll.u32 %v3291_v11, 16 }
  0x33   : > { %864 = vst.msk [vmem:[#allocation2 + $0x4] sm:$0xf] %vm832_vm4, %v3001_v20  ;;  %v3321_v39 = vrot.slane %v915_v17, 7  ;;  %v474_v41 = vshrl.u32 %v3308_v26, 16  ;;  %v1046_v51 = vshll.u32 %v3303_v18, 16 }
  0x34   : > { %527 = vrot.lane.b32.xlu1 %v3208_v31, %s2999_s6  ;;  %525 = vrot.lane.b32.xlu0 %v3199_v21, %s2999_s6  ;;  %897 = vst.msk [vmem:[#allocation2 + $0x4] sm:$0xf] %vm865_vm5, %v3001_v20  ;;  %v3329_v45 = vrot.slane %v1043_v33, 7  ;;  %v3359_v33 = vld [vmem:[%s3088_s5 + $0x20] sm:$0xf] }
  0x35   : > { %v920_v60 = vor.u32 %v918_v40, %v3321_v39  ;;  %v217_v40 = vld [vmem:[%s3088_s5 + $0xa0] sm:$0xf] }
  0x38   : > { %537 = vrot.lane.b32.xlu1 %v3214_v36, %s2999_s6  ;;  %533 = vrot.lane.b32.xlu0 %v3221_v37, %s2999_s6  ;;  %v664_v59 = vld [vmem:[#allocation2] sm:$0x1] }
  0x3c   : > { %531 = vrot.lane.b32.xlu1 %v3240_v52, %s2999_s6  ;;  %529 = vrot.lane.b32.xlu0 %v3231_v46, %s2999_s6 }
  0x40   : > { %545 = vrot.lane.b32.xlu1 %v3250_v54, %s2999_s6  ;;  %541 = vrot.lane.b32.xlu0 %v3253_v55, %s2999_s6 }
  0x44   : > { %742 = vrot.lane.b32.xlu1 %v3094_v1, %s3000_s7  ;;  %770 = vrot.lane.b32.xlu0 %v2666_v5, %s3000_s7  ;;  %v3284_v1 = vor.u32 %v461_v4, %v3273_v3  ;;  %v899_v5 = vshrl.u32 %v3277_v8, 16  ;;  %v3342_v4 = vrot.slane %v474_v41, 7  ;;  %v203_v41 = vld [vmem:[%s3088_s5 + $0x30] sm:$0xf] }
  0x46   : > { %v3298_v13 = vrot.slane %v899_v5, 7  ;;  %4647 = vst [vmem:[#allocation11_spill] sm:$0xff] %v3342_v4  ;;  %v490_v5 = vshrl.u32 %v3326_v43, 16 }
  0x48   : > { %549 = vrot.lane.b32.xlu1 %v3271_v61, %s2999_s6  ;;  %774 = vrot.lane.b32.xlu0 %v3164_v62, %s3000_s7  ;;  %v904_v34 = vor.u32 %v902_v15, %v3298_v13  ;;  %v3355_v17 = vrot.slane %v490_v5, 7  ;;  %v1062_v5 = vshll.u32 %v217_v40, 16 }
  0x4a   : > { %4648 = vst [vmem:[#allocation12_spill] sm:$0xff] %v3355_v17 }
  0x4c   : > { %746 = vrot.lane.b32.xlu1 %v3091_v0, %s3000_s7  ;;  %553 = vrot.lane.b32.xlu0 %v3284_v1, %s2999_s6  ;;  %v3312_v0 = vrot.slane %v1027_v12, 7  ;;  %v665_v12 = vsel %vm3334_vm7, 0, %v664_v59  ;;  %v947_v59 = vshrl.u32 %v203_v41, 16 }
  0x4d   : > { %666 = vst [vmem:[#allocation2] sm:$0x1] %v665_v12  ;;  %v950_v12 = vshll.u32 %v203_v41, 16 }
  0x4e   : > { %v1032_v44 = vor.u32 %v1030_v32, %v3312_v0  ;;  %863 = vst.msk [vmem:[#allocation2] sm:$0xf] %vm832_vm4, %v3001_v20  ;;  %v493_v32 = vshll.u32 %v3326_v43, 16 }
  0x4f   : > { %896 = vst.msk [vmem:[#allocation2] sm:$0xf] %vm865_vm5, %v3001_v20 }
  0x50   : > { %750 = vrot.lane.b32.xlu1 %v3102_v7, %s3000_s7  ;;  %778 = vrot.lane.b32.xlu0 %v3211_v35, %s3000_s7  ;;  %v477_v7 = vshll.u32 %v3308_v26, 16  ;;  %v3365_v20 = vor.u32 %v493_v32, %v3355_v17 }
  0x52   : > { %v3353_v15 = vor.u32 %v477_v7, %v3342_v4  ;;  %4649 = vst [vmem:[#allocation13_spill] sm:$0xff] %v3365_v20  ;;  %v1059_v7 = vshrl.u32 %v217_v40, 16 }
  0x54   : > { %782 = vrot.lane.b32.xlu0 %v3204_v29, %s3000_s7  ;;  %1154 = vrot.lane.b32.xlu1 %v904_v34, %s3002_s8  ;;  %v1048_v29 = vor.u32 %v1046_v51, %v3329_v45  ;;  %v931_v34 = vshrl.u32 %v3359_v33, 16  ;;  %v934_v51 = vshll.u32 %v3359_v33, 16  ;;  %v3383_v32 = vrot.slane %v1059_v7, 7 }
  0x58   : > { %1186 = vrot.lane.b32.xlu0 %v1032_v44, %s3002_s8  ;;  %1158 = vrot.lane.b32.xlu1 %v920_v60, %s3002_s8  ;;  %v3374_v44 = vrot.slane %v931_v34, 7  ;;  %v219_v60 = vld [vmem:[%s3088_s5 + $0xb0] sm:$0xf] }
  0x59   : > { %v1075_v34 = vshrl.u32 %v219_v60, 16 }
  0x5c   : > { %1190 = vrot.lane.b32.xlu0 %v1048_v29, %s3002_s8  ;;  %557 = vrot.lane.b32.xlu1 %v3353_v15, %s2999_s6  ;;  %v936_v29 = vor.u32 %v934_v51, %v3374_v44  ;;  %v1078_v51 = vshll.u32 %v219_v60, 16 }
  0x60   : > { %561 = vrot.lane.b32.xlu0 %v3365_v20, %s2999_s6  ;;  %754 = vrot.lane.b32.xlu1 %v3108_v16, %s3000_s7  ;;  %v3385_v16 = vrot.slane %v947_v59, 7 }
  0x62   : > { %v952_v52 = vor.u32 %v950_v12, %v3385_v16 }
  0x64   : > { %786 = vrot.lane.b32.xlu0 %v3243_v53, %s3000_s7  ;;  %758 = vrot.lane.b32.xlu1 %v3127_v28, %s3000_s7  ;;  %v1064_v53 = vor.u32 %v1062_v5, %v3383_v32  ;;  %v3392_v28 = vrot.slane %v1075_v34, 7  ;;  %v3412_v5 = vld [vmem:[%s3088_s5 + $0x50] sm:$0xf] }
  0x66   : > { %v1080_v7 = vor.u32 %v1078_v51, %v3392_v28 }
  0x68   : > { %790 = vrot.lane.b32.xlu0 %v3257_v57, %s3000_s7  ;;  %1162 = vrot.lane.b32.xlu1 %v936_v29, %s3002_s8  ;;  %v3401_v57 = vld [vmem:[%s3088_s5 + $0x40] sm:$0xf]  ;;  %v3424_v29 = vld [vmem:[%s3088_s5 + $0xd0] sm:$0xf] }
  0x69   : > { %v963_v59 = vshrl.u32 %v3401_v57, 16  ;;  %v966_v12 = vshll.u32 %v3401_v57, 16 }
  0x6c   : > { %1194 = vrot.lane.b32.xlu0 %v1064_v53, %s3002_s8  ;;  %1166 = vrot.lane.b32.xlu1 %v952_v52, %s3002_s8  ;;  %v3409_v52 = vld [vmem:[%s3088_s5 + $0xc0] sm:$0xf]  ;;  %v982_v53 = vshll.u32 %v3412_v5, 16 }
  0x6d   : > { %v1094_v34 = vshll.u32 %v3409_v52, 16 }
  0x70   : > { %1198 = vrot.lane.b32.xlu0 %v1080_v7, %s3002_s8  ;;  %1399 = vrot.lane.b32.xlu1 %v3277_v8, %s3003_s9  ;;  %v3418_v8 = vrot.slane %v963_v59, 7  ;;  %v1107_v7 = vshrl.u32 %v3424_v29, 16 }
  0x74   : > { %1431 = vrot.lane.b32.xlu0 %v3288_v9, %s3003_s9  ;;  %1403 = vrot.lane.b32.xlu1 %v3291_v11, %s3003_s9  ;;  %v1091_v9 = vshrl.u32 %v3409_v52, 16  ;;  %v979_v11 = vshrl.u32 %v3412_v5, 16 }
  0x76   : > { %v3435_v51 = vrot.slane %v979_v11, 7 }
  0x78   : > { %1435 = vrot.lane.b32.xlu0 %v3303_v18, %s3003_s9  ;;  %762 = vrot.lane.b32.xlu1 %v3144_v42, %s3000_s7  ;;  %v968_v42 = vor.u32 %v966_v12, %v3418_v8  ;;  %v3433_v18 = vrot.slane %v1091_v9, 7  ;;  %4650 = vst [vmem:[#allocation14_spill] sm:$0xff] %v3435_v51  ;;  %v1110_v12 = vshll.u32 %v3424_v29, 16 }
  0x7a   : > { %v1096_v59 = vor.u32 %v1094_v34, %v3433_v18 }
  0x7c   : > { %794 = vrot.lane.b32.xlu0 %v3308_v26, %s3000_s7  ;;  %766 = vrot.lane.b32.xlu1 %v3176_v6, %s3000_s7  ;;  %v984_v26 = vor.u32 %v982_v53, %v3435_v51  ;;  %v3443_v6 = vrot.slane %v1107_v7, 7  ;;  %v3463_v7 = vld [vmem:[%s3088_s5 + $0xe0] sm:$0xf] }
  0x7e   : > { %4651 = vst [vmem:[#allocation15_spill] sm:$0xff] %v3443_v6  ;;  %v1112_v9 = vor.u32 %v1110_v12, %v3443_v6  ;;  %v1123_v12 = vshrl.u32 %v3463_v7, 16  ;;  %v3561_v6 = vld [vmem:[%s3088_s5 + $0x94] sm:$0xf] }
  0x80   : > { %798 = vrot.lane.b32.xlu0 %v3326_v43, %s3000_s7  ;;  %1170 = vrot.lane.b32.xlu1 %v968_v42, %s3002_s8  ;;  %v3450_v43 = vld [vmem:[%s3088_s5 + $0x7c] sm:$0xf]  ;;  %v3460_v42 = vld [vmem:[%s3088_s5 + $0x60] sm:$0xf]  ;;  %v3492_v4 = vrot.slane %v1123_v12, 7 }
  0x81   : > { %v386_v11 = vshrl.u32 %v3450_v43, 16  ;;  %v389_v53 = vshll.u32 %v3450_v43, 16 }
  0x82   : > { %4655 = vst [vmem:[#allocation17_spill] sm:$0xff] %v3492_v4 }
  0x83   : > { %v388_v34 = vrot.slane %v386_v11, 7 }
  0x84   : > { %1202 = vrot.lane.b32.xlu0 %v1096_v59, %s3002_s8  ;;  %1174 = vrot.lane.b32.xlu1 %v984_v26, %s3002_s8  ;;  %v3466_v59 = vld [vmem:[%s3088_s5 + $0x8c] sm:$0xf]  ;;  %v995_v26 = vshrl.u32 %v3460_v42, 16 }
  0x85   : > { %v391_v11 = vor.u32 %v389_v53, %v388_v34  ;;  %v998_v53 = vshll.u32 %v3460_v42, 16 }
  0x86   : > { %v3489_v34 = vrot.slane %v995_v26, 7 }
  0x88   : > { %1206 = vrot.lane.b32.xlu0 %v1112_v9, %s3002_s8  ;;  %1407 = vrot.lane.b32.xlu1 %v3359_v33, %s3003_s9  ;;  %v384_v9 = vrot.slane %v3201_v23, 4  ;;  %v608_v23 = vld [vmem:[#allocation2 + $0x18] sm:$0xf]  ;;  %4654 = vst [vmem:[#allocation16_spill] sm:$0xff] %v3489_v34 }
  0x8c   : > { %1439 = vrot.lane.b32.xlu0 %v217_v40, %s3003_s9  ;;  %1411 = vrot.lane.b32.xlu1 %v203_v41, %s3003_s9  ;;  %v604_v40 = vld [vmem:[#allocation2 + $0x10] sm:$0xf]  ;;  %v599_v41 = vld [vmem:[#allocation2 + $0x8] sm:$0xf] }
  0x90   : > { %1443 = vrot.lane.b32.xlu0 %v219_v60, %s3003_s9  ;;  %1577 = vrot.lane.b32.xlu1 %v3114_v24, %s3004_s10  ;;  %v402_v60 = vshrl.u32 %v3466_v59, 16 }
  0x92   : > { %v510_v17 = vpop.permute.xlu1 %509  ;;  %v506_v24 = vpop.permute.xlu0 %505 }
  0x93   : > { %v605_v31 = vsel %vm3473_vm9, %v510_v17, %v604_v40  ;;  %v600_v14 = vsel %vm3473_vm9, %v506_v24, %v599_v41  ;;  %v1126_v17 = vshll.u32 %v3463_v7, 16  ;;  %v3497_v40 = vsel %vm3118_vm2, %v384_v9, %v391_v11  ;;  %v3504_v41 = vld [vmem:[%s3088_s5 + $0xf0] sm:$0xf]  ;;  %v612_v9 = vld [vmem:[#allocation2 + $0x20] sm:$0xf] }
  0x94   : > { %606 = vst [vmem:[#allocation2 + $0x10] sm:$0xf] %v605_v31  ;;  %601 = vst [vmem:[#allocation2 + $0x8] sm:$0xf] %v600_v14  ;;  %1609 = vrot.lane.b32.xlu0 %v3214_v36, %s3004_s10  ;;  %1581 = vrot.lane.b32.xlu1 %v3112_v22, %s3004_s10  ;;  %v404_v14 = vrot.slane %v402_v60, 7  ;;  %v405_v31 = vshll.u32 %v3466_v59, 16  ;;  %v1000_v11 = vor.u32 %v998_v53, %v3489_v34 }
  0x95   : > { %4656 = vst [vmem:[#allocation18_spill] sm:$0xff] %v3497_v40  ;;  %v3501_v36 = vld [vmem:[%s3088_s5 + $0x70] sm:$0xf]  ;;  %v1128_v60 = vor.u32 %v1126_v17, %v3492_v4  ;;  %v1139_v37 = vshrl.u32 %v3504_v41, 16  ;;  %v1142_v4 = vshll.u32 %v3504_v41, 16 }
  0x96   : > { %v512_v22 = vpop.permute.xlu1 %511  ;;  %v514_v26 = vpop.permute.xlu0 %513  ;;  %v1011_v24 = vshrl.u32 %v3501_v36, 16  ;;  %v407_v20 = vor.u32 %v405_v31, %v404_v14  ;;  %v1014_v17 = vshll.u32 %v3501_v36, 16 }
  0x97   : > { %607 = vst.msk [vmem:[#allocation2 + $0x14] sm:$0xf] %vm596_vm3, %v512_v22  ;;  %v609_v12 = vsel %vm3473_vm9, %v514_v26, %v608_v23  ;;  %v400_v22 = vrot.slane %v3192_v19, 4 }
  0x98   : > { %610 = vst [vmem:[#allocation2 + $0x18] sm:$0xf] %v609_v12  ;;  %1613 = vrot.lane.b32.xlu0 %v3253_v55, %s3004_s10  ;;  %535 = vrot.lane.b32.xlu1 %v3497_v40, %s2999_s6  ;;  %v3519_v12 = vld [vmem:[%s3088_s5 + $0x4] sm:$0xf]  ;;  %v3535_v31 = vrot.slane %v1011_v24, 7 }
  0x99   : > { %v3522_v55 = vld [vmem:[%s3088_s5 + $0x84] sm:$0xf] }
  0x9a   : > { %v516_v23 = vpop.permute.xlu1 %515  ;;  %v518_v26 = vpop.permute.xlu0 %517  ;;  %4657 = vst [vmem:[#allocation19_spill] sm:$0xff] %v3535_v31 }
  0x9b   : > { %v670_v46 = vld [vmem:[#allocation2 + $0x10] sm:$0x1]  ;;  %v667_v40 = vld [vmem:[#allocation2 + $0x8] sm:$0x1]  ;;  %611 = vst.msk [vmem:[#allocation2 + $0x1c] sm:$0xf] %vm596_vm3, %v516_v23  ;;  %v613_v53 = vsel %vm3473_vm9, %v518_v26, %v612_v9  ;;  %v3541_v9 = vsel %vm3118_vm2, %v400_v22, %v407_v20 }
  0x9c   : > { %v671_v19 = vsel %vm3334_vm7, 0, %v670_v46  ;;  %v668_v14 = vsel %vm3334_vm7, 0, %v667_v40  ;;  %614 = vst [vmem:[#allocation2 + $0x20] sm:$0xf] %v613_v53  ;;  %1178 = vrot.lane.b32.xlu0 %v1000_v11, %s3002_s8  ;;  %1210 = vrot.lane.b32.xlu1 %v1128_v60, %s3002_s8  ;;  %v3537_v23 = vrot.slane %v1139_v37, 7  ;;  %v907_v46 = vshrl.u32 %v3519_v12, 16 }
  0x9d   : > { %672 = vst [vmem:[#allocation2 + $0x10] sm:$0x1] %v671_v19  ;;  %669 = vst [vmem:[#allocation2 + $0x8] sm:$0x1] %v668_v14  ;;  %v1035_v26 = vshrl.u32 %v3522_v55, 16  ;;  %v1016_v60 = vor.u32 %v1014_v17, %v3535_v31  ;;  %v910_v19 = vshll.u32 %v3519_v12, 16 }
  0x9e   : > { %4658 = vst [vmem:[#allocation20_spill] sm:$0xff] %v3537_v23  ;;  %v520_v40 = vpop.permute.xlu1 %519  ;;  %v508_v53 = vpop.permute.xlu0 %507  ;;  %v616_v20 = vld [vmem:[#allocation2 + $0x28] sm:$0xf]  ;;  %v1144_v24 = vor.u32 %v1142_v4, %v3537_v23  ;;  %v909_v22 = vrot.slane %v907_v46, 7  ;;  %v620_v17 = vld [vmem:[#allocation2 + $0x30] sm:$0xf] }
  0x9f   : > { %v673_v11 = vld [vmem:[#allocation2 + $0x18] sm:$0x1]  ;;  %615 = vst.msk [vmem:[#allocation2 + $0x24] sm:$0xf] %vm596_vm3, %v520_v40  ;;  %603 = vst.msk [vmem:[#allocation2 + $0xc] sm:$0xf] %vm596_vm3, %v508_v53 }
  0xa0   : > { %v674_v37 = vsel %vm3334_vm7, 0, %v673_v11  ;;  %539 = vrot.lane.b32.xlu0 %v3541_v9, %s2999_s6  ;;  %772 = vrot.lane.b32.xlu1 %v3450_v43, %s3000_s7  ;;  %v1037_v14 = vrot.slane %v1035_v26, 7  ;;  %v1038_v40 = vshll.u32 %v3522_v55, 16  ;;  %v3558_v53 = vld [vmem:[%s3088_s5 + $0x14] sm:$0xf]  ;;  %v905_v46 = vrot.slane %v3298_v13, 4 }
  0xa1   : > { %675 = vst [vmem:[#allocation2 + $0x18] sm:$0x1] %v674_v37  ;;  %v923_v26 = vshrl.u32 %v3558_v53, 16  ;;  %v912_v37 = vor.u32 %v910_v19, %v909_v22  ;;  %v632_v13 = vld [vmem:[#allocation2 + $0x48] sm:$0xf] }
  0xa2   : > { %v524_v11 = vpop.permute.xlu1 %523  ;;  %v522_v34 = vpop.permute.xlu0 %521  ;;  %v1040_v23 = vor.u32 %v1038_v40, %v1037_v14 }
  0xa3   : > { %v676_v51 = vld [vmem:[#allocation2 + $0x20] sm:$0x1]  ;;  %619 = vst.msk [vmem:[#allocation2 + $0x2c] sm:$0xf] %vm596_vm3, %v524_v11  ;;  %v617_v43 = vsel %vm3473_vm9, %v522_v34, %v616_v20  ;;  %v1033_v11 = vrot.slane %v3312_v0, 4  ;;  %v1051_v34 = vshrl.u32 %v3561_v6, 16  ;;  %v913_v22 = vsel %vm3118_vm2, %v905_v46, %v912_v37 }
  0xa4   : > { %v677_v4 = vsel %vm3334_vm7, 0, %v676_v51  ;;  %618 = vst [vmem:[#allocation2 + $0x28] sm:$0xf] %v617_v43  ;;  %1182 = vrot.lane.b32.xlu0 %v1016_v60, %s3002_s8  ;;  %1214 = vrot.lane.b32.xlu1 %v1144_v24, %s3002_s8  ;;  %v628_v60 = vld [vmem:[#allocation2 + $0x40] sm:$0xf]  ;;  %v925_v0 = vrot.slane %v923_v26, 7 }
  0xa5   : > { %678 = vst [vmem:[#allocation2 + $0x20] sm:$0x1] %v677_v4  ;;  %v926_v24 = vshll.u32 %v3558_v53, 16  ;;  %v1041_v19 = vsel %vm3118_vm2, %v1033_v11, %v1040_v23  ;;  %v1053_v14 = vrot.slane %v1051_v34, 7  ;;  %v624_v23 = vld [vmem:[#allocation2 + $0x38] sm:$0xf] }
  0xa6   : > { %v528_v20 = vpop.permute.xlu1 %527  ;;  %v526_v31 = vpop.permute.xlu0 %525  ;;  %v921_v46 = vrot.slane %v3321_v39, 4  ;;  %v1049_v11 = vrot.slane %v3329_v45, 4  ;;  %v640_v39 = vld [vmem:[#allocation2 + $0x58] sm:$0xf]  ;;  %v636_v45 = vld [vmem:[#allocation2 + $0x50] sm:$0xf] }
  0xa7   : > { %623 = vst.msk [vmem:[#allocation2 + $0x34] sm:$0xf] %vm596_vm3, %v528_v20  ;;  %v621_v51 = vsel %vm3473_vm9, %v526_v31, %v620_v17  ;;  %v1054_v31 = vshll.u32 %v3561_v6, 16  ;;  %v928_v37 = vor.u32 %v926_v24, %v925_v0 }
  0xa8   : > { %622 = vst [vmem:[#allocation2 + $0x30] sm:$0xf] %v621_v51  ;;  %744 = vrot.lane.b32.xlu0 %v3124_v27, %s3000_s7  ;;  %776 = vrot.lane.b32.xlu1 %v3466_v59, %s3000_s7 }
  0xa9   : > { %v1056_v34 = vor.u32 %v1054_v31, %v1053_v14  ;;  %v929_v0 = vsel %vm3118_vm2, %v921_v46, %v928_v37  ;;  %v644_v46 = vld [vmem:[#allocation2 + $0x60] sm:$0xf] }
  0xaa   : > { %v538_v40 = vpop.permute.xlu1 %537  ;;  %v534_v43 = vpop.permute.xlu0 %533 }
  0xab   : > { %v679_v27 = vld [vmem:[#allocation2 + $0x28] sm:$0x1]  ;;  %v633_v4 = vsel %vm3473_vm9, %v538_v40, %v632_v13  ;;  %v629_v17 = vsel %vm3473_vm9, %v534_v43, %v628_v60  ;;  %v1057_v24 = vsel %vm3118_vm2, %v1049_v11, %v1056_v34 }
  0xac   : > { %v680_v26 = vsel %vm3334_vm7, 0, %v679_v27  ;;  %634 = vst [vmem:[#allocation2 + $0x48] sm:$0xf] %v633_v4  ;;  %630 = vst [vmem:[#allocation2 + $0x40] sm:$0xf] %v629_v17  ;;  %1156 = vrot.lane.b32.xlu0 %v913_v22, %s3002_s8  ;;  %1188 = vrot.lane.b32.xlu1 %v1041_v19, %s3002_s8 }
  0xad   : > { %681 = vst [vmem:[#allocation2 + $0x28] sm:$0x1] %v680_v26 }
  0xae   : > { %v532_v20 = vpop.permute.xlu1 %531  ;;  %v530_v51 = vpop.permute.xlu0 %529 }
  0xaf   : > { %v682_v13 = vld [vmem:[#allocation2 + $0x30] sm:$0x1]  ;;  %627 = vst.msk [vmem:[#allocation2 + $0x3c] sm:$0xf] %vm596_vm3, %v532_v20  ;;  %v625_v60 = vsel %vm3473_vm9, %v530_v51, %v624_v23 }
  0xb0   : > { %v683_v22 = vsel %vm3334_vm7, 0, %v682_v13  ;;  %626 = vst [vmem:[#allocation2 + $0x38] sm:$0xf] %v625_v60  ;;  %1415 = vrot.lane.b32.xlu0 %v3401_v57, %s3003_s9  ;;  %1447 = vrot.lane.b32.xlu1 %v3409_v52, %s3003_s9 }
  0xb1   : > { %684 = vst [vmem:[#allocation2 + $0x30] sm:$0x1] %v683_v22 }
  0xb2   : > { %v546_v19 = vpop.permute.xlu1 %545  ;;  %v542_v14 = vpop.permute.xlu0 %541 }
  0xb3   : > { %v691_v31 = vld [vmem:[#allocation2 + $0x48] sm:$0x1]  ;;  %v688_v40 = vld [vmem:[#allocation2 + $0x40] sm:$0x1]  ;;  %v641_v43 = vsel %vm3473_vm9, %v546_v19, %v640_v39  ;;  %v637_v57 = vsel %vm3473_vm9, %v542_v14, %v636_v45  ;;  %v3643_v39 = vld [vmem:[%s3088_s5 + $0x9c] sm:$0xf] }
  0xb4   : > { %v692_v52 = vsel %vm3334_vm7, 0, %v691_v31  ;;  %v689_v27 = vsel %vm3334_vm7, 0, %v688_v40  ;;  %642 = vst [vmem:[#allocation2 + $0x58] sm:$0xf] %v641_v43  ;;  %638 = vst [vmem:[#allocation2 + $0x50] sm:$0xf] %v637_v57  ;;  %1160 = vrot.lane.b32.xlu0 %v929_v0, %s3002_s8  ;;  %1192 = vrot.lane.b32.xlu1 %v1057_v24, %s3002_s8 }
  0xb5   : > { %693 = vst [vmem:[#allocation2 + $0x48] sm:$0x1] %v692_v52  ;;  %690 = vst [vmem:[#allocation2 + $0x40] sm:$0x1] %v689_v27  ;;  %v421_v31 = vshll.u32 %v3643_v39, 16  ;;  %v416_v52 = vrot.slane %v3235_v49, 4 }
  0xb6   : > { %v743_v4 = vpop.permute.xlu1 %742  ;;  %v771_v17 = vpop.permute.xlu0 %770 }
  0xb7   : > { %v685_v26 = vld [vmem:[#allocation2 + $0x38] sm:$0x1]  ;;  %833 = vst.msk [vmem:[#allocation2 + $0x8] sm:$0xf] %vm832_vm4, %v743_v4  ;;  %847 = vst.msk [vmem:[#allocation2 + $0x40] sm:$0xf] %vm832_vm4, %v771_v17 }
  0xb8   : > { %v686_v23 = vsel %vm3334_vm7, 0, %v685_v26  ;;  %866 = vst.msk [vmem:[#allocation2 + $0x8] sm:$0xf] %vm865_vm5, %v743_v4  ;;  %880 = vst.msk [vmem:[#allocation2 + $0x40] sm:$0xf] %vm865_vm5, %v771_v17  ;;  %1401 = vrot.lane.b32.xlu0 %v3519_v12, %s3003_s9  ;;  %1419 = vrot.lane.b32.xlu1 %v3412_v5, %s3003_s9 }
  0xb9   : > { %687 = vst [vmem:[#allocation2 + $0x38] sm:$0x1] %v686_v23  ;;  %v648_v5 = vld [vmem:[#allocation2 + $0x68] sm:$0xf] }
  0xba   : > { %v550_v37 = vpop.permute.xlu1 %549  ;;  %v775_v11 = vpop.permute.xlu0 %774 }
  0xbb   : > { %v697_v34 = vld [vmem:[#allocation2 + $0x58] sm:$0x1]  ;;  %v694_v20 = vld [vmem:[#allocation2 + $0x50] sm:$0x1]  ;;  %v645_v51 = vsel %vm3473_vm9, %v550_v37, %v644_v46  ;;  %849 = vst.msk [vmem:[#allocation2 + $0x48] sm:$0xf] %vm832_vm4, %v775_v11 }
  0xbc   : > { %v698_v13 = vsel %vm3334_vm7, 0, %v697_v34  ;;  %v695_v12 = vsel %vm3334_vm7, 0, %v694_v20  ;;  %646 = vst [vmem:[#allocation2 + $0x60] sm:$0xf] %v645_v51  ;;  %882 = vst.msk [vmem:[#allocation2 + $0x48] sm:$0xf] %vm865_vm5, %v775_v11  ;;  %1433 = vrot.lane.b32.xlu0 %v3522_v55, %s3003_s9  ;;  %1451 = vrot.lane.b32.xlu1 %v3424_v29, %s3003_s9 }
  0xbd   : > { %699 = vst [vmem:[#allocation2 + $0x58] sm:$0x1] %v698_v13  ;;  %696 = vst [vmem:[#allocation2 + $0x50] sm:$0x1] %v695_v12  ;;  %v418_v29 = vshrl.u32 %v3643_v39, 16 }
  0xbe   : > { %v747_v60 = vpop.permute.xlu1 %746  ;;  %v554_v22 = vpop.permute.xlu0 %553  ;;  %v656_v12 = vld [vmem:[#allocation2 + $0x78] sm:$0xf] }
  0xbf   : > { %835 = vst.msk [vmem:[#allocation2 + $0x10] sm:$0xf] %vm832_vm4, %v747_v60  ;;  %v649_v45 = vsel %vm3473_vm9, %v554_v22, %v648_v5  ;;  %v420_v14 = vrot.slane %v418_v29, 7  ;;  %v1285_v4 = vld [vmem:[#allocation2 + $0x40] sm:$0xf] }
  0xc0   : > { %868 = vst.msk [vmem:[#allocation2 + $0x10] sm:$0xf] %vm865_vm5, %v747_v60  ;;  %650 = vst [vmem:[#allocation2 + $0x68] sm:$0xf] %v649_v45  ;;  %1585 = vrot.lane.b32.xlu0 %v3129_v30, %s3004_s10  ;;  %1617 = vrot.lane.b32.xlu1 %v3250_v54, %s3004_s10  ;;  %v1252_v54 = vld [vmem:[#allocation2] sm:$0xf] }
  0xc1   : > { %v423_v27 = vor.u32 %v421_v31, %v420_v14  ;;  %v1257_v26 = vld [vmem:[#allocation2 + $0x8] sm:$0xf]  ;;  %v3005_v60 = vmov 65535  }
  0xc2   : > { %v751_v55 = vpop.permute.xlu1 %750  ;;  %v779_v0 = vpop.permute.xlu0 %778  ;;  %v2899_v5 = vld [vmem:[%s4617_s1 + $0x8] sm:$0x3f]   ;;  %v2132_v22 = vsel %vm2130_vm14, 4294967295, %v3005_v60 }
  0xc3   : > { %v700_v24 = vld [vmem:[#allocation2 + $0x60] sm:$0x1]  ;;  %837 = vst.msk [vmem:[#allocation2 + $0x18] sm:$0xf] %vm832_vm4, %v751_v55  ;;  %851 = vst.msk [vmem:[#allocation2 + $0x50] sm:$0xf] %vm832_vm4, %v779_v0 }
  0xc4   : > { %v701_v19 = vsel %vm3334_vm7, 0, %v700_v24  ;;  %870 = vst.msk [vmem:[#allocation2 + $0x18] sm:$0xf] %vm865_vm5, %v751_v55  ;;  %884 = vst.msk [vmem:[#allocation2 + $0x50] sm:$0xf] %vm865_vm5, %v779_v0  ;;  %1405 = vrot.lane.b32.xlu0 %v3558_v53, %s3003_s9  ;;  %1437 = vrot.lane.b32.xlu1 %v3561_v6, %s3003_s9 }
  0xc5   : > { %702 = vst [vmem:[#allocation2 + $0x60] sm:$0x1] %v701_v19  ;;  %v1289_v11 = vld [vmem:[#allocation2 + $0x48] sm:$0xf]  ;;  %v3713_v55 = vld [vmem:[%s3088_s5 + $0xac] sm:$0xf] }
  0xc6   : > { %v783_v40 = vpop.permute.xlu0 %782  ;;  %v1155_v43 = vpop.permute.xlu1 %1154  ;;  %v434_v33 = vshrl.u32 %v3713_v55, 16 }
  0xc7   : > { %v703_v57 = vld [vmem:[#allocation2 + $0x68] sm:$0x1]  ;;  %853 = vst.msk [vmem:[#allocation2 + $0x58] sm:$0xf] %vm832_vm4, %v783_v40  ;;  %v1253_v53 = vsel %vm3666_vm11, %v1155_v43, %v1252_v54  ;;  %v2917_v43 = vld [vmem:[%s3088_s5 + $0xc] sm:$0xf] }
  0xc8   : > { %v704_v6 = vsel %vm3334_vm7, 0, %v703_v57  ;;  %886 = vst.msk [vmem:[#allocation2 + $0x58] sm:$0xf] %vm865_vm5, %v783_v40  ;;  %1254 = vst [vmem:[#allocation2] sm:$0xf] %v1253_v53  ;;  %1589 = vrot.lane.b32.xlu0 %v3147_v47, %s3004_s10  ;;  %1621 = vrot.lane.b32.xlu1 %v3271_v61, %s3004_s10  ;;  %v3697_v61 = vsel %vm3118_vm2, %v416_v52, %v423_v27  ;;  %v2901_v27 = vld [vmem:[%s4617_s1] sm:$0xff]  }
  0xc9   : > { %705 = vst [vmem:[#allocation2 + $0x68] sm:$0x1] %v704_v6  ;;  %v652_v47 = vld [vmem:[#allocation2 + $0x70] sm:$0xf]  ;;  %v2916_v40 = vld [vmem:[%s3088_s5 + $0x8] sm:$0xf] }
  0xca   : > { %v1187_v17 = vpop.permute.xlu0 %1186  ;;  %v1159_v23 = vpop.permute.xlu1 %1158 }
  0xcb   : > { %v1286_v46 = vsel %vm3666_vm11, %v1187_v17, %v1285_v4  ;;  %v1258_v37 = vsel %vm3666_vm11, %v1159_v23, %v1257_v26  ;;  %v436_v26 = vrot.slane %v434_v33, 7  ;;  %v437_v23 = vshll.u32 %v3713_v55, 16  ;;  %v1293_v56 = vld [vmem:[#allocation2 + $0x50] sm:$0xf] }
  0xcc   : > { %1287 = vst [vmem:[#allocation2 + $0x40] sm:$0xf] %v1286_v46  ;;  %1259 = vst [vmem:[#allocation2 + $0x8] sm:$0xf] %v1258_v37  ;;  %1579 = vrot.lane.b32.xlu0 %v3172_v2, %s3004_s10  ;;  %1611 = vrot.lane.b32.xlu1 %v3541_v9, %s3004_s10  ;;  %v1261_v37 = vld [vmem:[#allocation2 + $0x10] sm:$0xf] }
  0xce   : > { %v1191_v34 = vpop.permute.xlu0 %1190  ;;  %v558_v20 = vpop.permute.xlu1 %557 }
  0xcf   : > { %v1319_v51 = vld [vmem:[#allocation2] sm:$0x1]  ;;  %v1290_v2 = vsel %vm3666_vm11, %v1191_v34, %v1289_v11  ;;  %v653_v9 = vsel %vm3473_vm9, %v558_v20, %v652_v47  ;;  %v2918_v34 = vld [vmem:[%s3088_s5 + $0x18] sm:$0xf]  ;;  %v3755_v20 = vld [vmem:[%s3088_s5 + $0x24] sm:$0xf] }
  0xd0   : > { %v1320_v13 = vsel %vm3691_vm13, 0, %v1319_v51  ;;  %1291 = vst [vmem:[#allocation2 + $0x48] sm:$0xf] %v1290_v2  ;;  %654 = vst [vmem:[#allocation2 + $0x70] sm:$0xf] %v653_v9  ;;  %1583 = vrot.lane.b32.xlu0 %v3139_v38, %s3004_s10  ;;  %1615 = vrot.lane.b32.xlu1 %v3697_v61, %s3004_s10  ;;  %v2133_v38 = vsel %vm2131_vm15, %v2132_v22, 0  ;;  %v439_v2 = vor.u32 %v437_v23, %v436_v26 }
  0xd1   : > { %1321 = vst [vmem:[#allocation2] sm:$0x1] %v1320_v13  ;;  %v2135_v54 = vand.u32 %v2899_v5, %v2133_v38  ;;  %v432_v51 = vrot.slane %v3233_v48, 4  ;;  %v3759_v9 = vld [vmem:[%s3088_s5 + $0xa4] sm:$0xf]  ;;  %v939_v22 = vshrl.u32 %v3755_v20, 16 }
  0xd2   : > { %v562_v45 = vpop.permute.xlu0 %561  ;;  %v755_v29 = vpop.permute.xlu1 %754  ;;  %v1067_v48 = vshrl.u32 %v3759_v9, 16  ;;  %v1297_v38 = vld [vmem:[#allocation2 + $0x58] sm:$0xf] }
  0xd3   : > { %v1343_v0 = vld [vmem:[#allocation2 + $0x40] sm:$0x1]  ;;  %v1322_v24 = vld [vmem:[#allocation2 + $0x8] sm:$0x1]  ;;  %v657_v19 = vsel %vm3473_vm9, %v562_v45, %v656_v12  ;;  %839 = vst.msk [vmem:[#allocation2 + $0x20] sm:$0xf] %vm832_vm4, %v755_v29  ;;  %2809 = vmatprep.subr.bf16.mxu0 %v2135_v54  ;;  %2845 = vmatprep.subr.bf16.mxu1 %v2135_v54 }
  0xd4   : > { %v1344_v14 = vsel %vm3691_vm13, 0, %v1343_v0  ;;  %v1323_v31 = vsel %vm3691_vm13, 0, %v1322_v24  ;;  %658 = vst [vmem:[#allocation2 + $0x78] sm:$0xf] %v657_v19  ;;  %872 = vst.msk [vmem:[#allocation2 + $0x20] sm:$0xf] %vm865_vm5, %v755_v29  ;;  %1792 = vrot.lane.b32.xlu0 %v2916_v40, %s3006_s13  ;;  %1794 = vrot.lane.b32.xlu1 %v2917_v43, %s3006_s13  ;;  %v3773_v29 = vsel %vm3118_vm2, %v432_v51, %v439_v2 }
  0xd5   : > { %1345 = vst [vmem:[#allocation2 + $0x40] sm:$0x1] %v1344_v14  ;;  %1324 = vst [vmem:[#allocation2 + $0x8] sm:$0x1] %v1323_v31  ;;  %2810 = vmatpush3.bf16.msra.mxu0 %v2135_v54  ;;  %2847 = vmatpush3.bf16.msra.mxu1 %v2135_v54  ;;  %v1265_v12 = vld [vmem:[#allocation2 + $0x18] sm:$0xf] }
  0xd6   : > { %v787_v57 = vpop.permute.xlu0 %786  ;;  %v759_v53 = vpop.permute.xlu1 %758  ;;  %2811 = vmatprep.subr.bf16.mxu0 %v2901_v27  ;;  %2846 = vmatprep.subr.bf16.mxu1 %v2901_v27  ;;  %v2919_v45 = vld [vmem:[%s3088_s5 + $0x1c] sm:$0xf]  ;;  %v942_v14 = vshll.u32 %v3755_v20, 16  ;;  %v1069_v40 = vrot.slane %v1067_v48, 7  ;;  %v1070_v43 = vshll.u32 %v3759_v9, 16 }
  0xd7   : > { %v1346_v6 = vld [vmem:[#allocation2 + $0x48] sm:$0x1]  ;;  %v706_v52 = vld [vmem:[#allocation2 + $0x70] sm:$0x1]  ;;  %855 = vst.msk [vmem:[#allocation2 + $0x60] sm:$0xf] %vm832_vm4, %v787_v57 }
  0xd8   : > { %841 = vst.msk [vmem:[#allocation2 + $0x28] sm:$0xf] %vm832_vm4, %v759_v53  ;;  %v1347_v4 = vsel %vm3691_vm13, 0, %v1346_v6  ;;  %v707_v17 = vsel %vm3334_vm7, 0, %v706_v52  ;;  %1824 = vrot.lane.b32.xlu0 %v3164_v62, %s3006_s13  ;;  %1826 = vrot.lane.b32.xlu1 %v3466_v59, %s3006_s13  ;;  %v3791_v6 = vld [vmem:[%s3088_s5 + $0xb4] sm:$0xf] }
  0xd9   : > { %888 = vst.msk [vmem:[#allocation2 + $0x60] sm:$0xf] %vm865_vm5, %v787_v57  ;;  %874 = vst.msk [vmem:[#allocation2 + $0x28] sm:$0xf] %vm865_vm5, %v759_v53  ;;  %2812 = vmatpush3.bf16.msra.mxu0 %v2901_v27  ;;  %2848 = vmatpush3.bf16.msra.mxu1 %v2901_v27  ;;  %v3788_v53 = vld [vmem:[%s3088_s5 + $0x34] sm:$0xf] }
  0xda   : > { %1348 = vst [vmem:[#allocation2 + $0x48] sm:$0x1] %v1347_v4  ;;  %708 = vst [vmem:[#allocation2 + $0x70] sm:$0x1] %v707_v17  ;;  %v791_v46 = vpop.permute.xlu0 %790  ;;  %v1163_v47 = vpop.permute.xlu1 %1162  ;;  %v937_v4 = vrot.slane %v3374_v44, 4  ;;  %v1072_v44 = vor.u32 %v1070_v43, %v1069_v40 }
  0xdb   : > { %v709_v11 = vld [vmem:[#allocation2 + $0x78] sm:$0x1]  ;;  %857 = vst.msk [vmem:[#allocation2 + $0x68] sm:$0xf] %vm832_vm4, %v791_v46  ;;  %v1262_v62 = vsel %vm3666_vm11, %v1163_v47, %v1261_v37  ;;  %v955_v37 = vshrl.u32 %v3788_v53, 16  ;;  %v1083_v47 = vshrl.u32 %v3791_v6, 16 }
  0xdc   : > { %v710_v59 = vsel %vm3334_vm7, 0, %v709_v11  ;;  %890 = vst.msk [vmem:[#allocation2 + $0x68] sm:$0xf] %vm865_vm5, %v791_v46  ;;  %1263 = vst [vmem:[#allocation2 + $0x10] sm:$0xf] %v1262_v62  ;;  %543 = vrot.lane.b32.xlu0 %v3697_v61, %s2999_s6  ;;  %1796 = vrot.lane.b32.xlu1 %v2918_v34, %s3006_s13  ;;  %v1065_v46 = vrot.slane %v3383_v32, 4 }
  0xdd   : > { %711 = vst [vmem:[#allocation2 + $0x78] sm:$0x1] %v710_v59  ;;  %v3815_v32 = vld [vmem:[%s3088_s5 + $0x2c] sm:$0xf]  ;;  %v957_v2 = vrot.slane %v955_v37, 7  ;;  %vm1673_vm7 = vcmask 167056  }
  0xde   : > { %v1195_v13 = vpop.permute.xlu0 %1194  ;;  %v1167_v5 = vpop.permute.xlu1 %1166  ;;  %v1073_v51 = vsel %vm3118_vm2, %v1065_v46, %v1072_v44  ;;  %vm3877_vm9 = vmand %vm1673_vm7, %vm597_vm8  ;;  %vm1740_vm8 = vcmask 163984  }
  0xdf   : > { %v1294_v60 = vsel %vm3666_vm11, %v1195_v13, %v1293_v56  ;;  %v1266_v61 = vsel %vm3666_vm11, %v1167_v5, %v1265_v12  ;;  %v958_v56 = vshll.u32 %v3788_v53, 16  ;;  %v1085_v13 = vrot.slane %v1083_v47, 7  ;;  %vm3904_vm12 = vmand %vm1740_vm8, %vm262_vm0 }
  0xe0   : > { %1295 = vst [vmem:[#allocation2 + $0x50] sm:$0xf] %v1294_v60  ;;  %1267 = vst [vmem:[#allocation2 + $0x18] sm:$0xf] %v1266_v61  ;;  %1798 = vrot.lane.b32.xlu0 %v2919_v45, %s3006_s13  ;;  %1828 = vrot.lane.b32.xlu1 %v3211_v35, %s3006_s13  ;;  %v941_v35 = vrot.slane %v939_v22, 7  ;;  %v1086_v12 = vshll.u32 %v3791_v6, 16 }
  0xe1   : > { %v953_v61 = vrot.slane %v3385_v16, 4  ;;  %v960_v22 = vor.u32 %v958_v56, %v957_v2  ;;  %vm1888_vm0 = vcmask 191656  }
  0xe2   : > { %v1199_v0 = vpop.permute.xlu0 %1198  ;;  %v1400_v24 = vpop.permute.xlu1 %1399  ;;  %v944_v17 = vor.u32 %v942_v14, %v941_v35  ;;  %v1088_v48 = vor.u32 %v1086_v12, %v1085_v13  ;;  %v1273_v14 = vld [vmem:[#allocation2 + $0x28] sm:$0xf] }
  0xe3   : > { %v1325_v19 = vld [vmem:[#allocation2 + $0x10] sm:$0x1]  ;;  %v1298_v54 = vsel %vm3666_vm11, %v1199_v0, %v1297_v38  ;;  %1496 = vst.msk [vmem:[#allocation2] sm:$0xf] %vm1495_vm1, %v1400_v24  ;;  %v1269_v0 = vld [vmem:[#allocation2 + $0x20] sm:$0xf]  ;;  %v961_v16 = vsel %vm3118_vm2, %v953_v61, %v960_v22 }
  0xe4   : > { %v1326_v31 = vsel %vm3691_vm13, 0, %v1325_v19  ;;  %1299 = vst [vmem:[#allocation2 + $0x58] sm:$0xf] %v1298_v54  ;;  %1529 = vst.msk [vmem:[#allocation2] sm:$0xf] %vm1528_vm6, %v1400_v24  ;;  %1830 = vrot.lane.b32.xlu0 %v3643_v39, %s3006_s13  ;;  %547 = vrot.lane.b32.xlu1 %v3773_v29, %s2999_s6 }
  0xe5   : > { %1327 = vst [vmem:[#allocation2 + $0x10] sm:$0x1] %v1326_v31  ;;  %v1301_v54 = vld [vmem:[#allocation2 + $0x60] sm:$0xf] }
  0xe6   : > { %v1432_v33 = vpop.permute.xlu0 %1431  ;;  %v1404_v57 = vpop.permute.xlu1 %1403 }
  0xe7   : > { %v1349_v52 = vld [vmem:[#allocation2 + $0x50] sm:$0x1]  ;;  %v1328_v27 = vld [vmem:[#allocation2 + $0x18] sm:$0x1]  ;;  %1512 = vst.msk [vmem:[#allocation2 + $0x40] sm:$0xf] %vm1495_vm1, %v1432_v33 }
  0xe8   : > { %1498 = vst.msk [vmem:[#allocation2 + $0x8] sm:$0xf] %vm1495_vm1, %v1404_v57  ;;  %v1350_v26 = vsel %vm3691_vm13, 0, %v1349_v52  ;;  %v1329_v23 = vsel %vm3691_vm13, 0, %v1328_v27  ;;  %748 = vrot.lane.b32.xlu0 %v2919_v45, %s3000_s7  ;;  %780 = vrot.lane.b32.xlu1 %v3643_v39, %s3000_s7  ;;  %v945_v39 = vsel %vm3118_vm2, %v937_v4, %v944_v17  ;;  %v1081_v45 = vrot.slane %v3392_v28, 4 }
  0xe9   : > { %1545 = vst.msk [vmem:[#allocation2 + $0x40] sm:$0xf] %vm1528_vm6, %v1432_v33  ;;  %1531 = vst.msk [vmem:[#allocation2 + $0x8] sm:$0xf] %vm1528_vm6, %v1404_v57 }
  0xea   : > { %1351 = vst [vmem:[#allocation2 + $0x50] sm:$0x1] %v1350_v26  ;;  %1330 = vst [vmem:[#allocation2 + $0x18] sm:$0x1] %v1329_v23  ;;  %v1436_v11 = vpop.permute.xlu0 %1435  ;;  %v763_v62 = vpop.permute.xlu1 %762  ;;  %v1089_v28 = vsel %vm3118_vm2, %v1081_v45, %v1088_v48 }
  0xeb   : > { %v1352_v59 = vld [vmem:[#allocation2 + $0x58] sm:$0x1]  ;;  %1514 = vst.msk [vmem:[#allocation2 + $0x48] sm:$0xf] %vm1495_vm1, %v1436_v11  ;;  %v1675_v37 = vld [vmem:[#allocation2] sm:$0xf] }
  0xec   : > { %843 = vst.msk [vmem:[#allocation2 + $0x30] sm:$0xf] %vm832_vm4, %v763_v62  ;;  %v1353_v34 = vsel %vm3691_vm13, 0, %v1352_v59  ;;  %752 = vrot.lane.b32.xlu0 %v3815_v32, %s3000_s7  ;;  %784 = vrot.lane.b32.xlu1 %v3713_v55, %s3000_s7 }
  0xed   : > { %1547 = vst.msk [vmem:[#allocation2 + $0x48] sm:$0xf] %vm1528_vm6, %v1436_v11  ;;  %1354 = vst [vmem:[#allocation2 + $0x58] sm:$0x1] %v1353_v34  ;;  %v3882_v11 = vld [vmem:[%s3088_s5 + $0xbc] sm:$0xf] }
  0xee   : > { %876 = vst.msk [vmem:[#allocation2 + $0x30] sm:$0xf] %vm865_vm5, %v763_v62  ;;  %v795_v5 = vpop.permute.xlu0 %794  ;;  %v767_v60 = vpop.permute.xlu1 %766  ;;  %v450_v59 = vshrl.u32 %v3882_v11, 16  ;;  %v453_v12 = vshll.u32 %v3882_v11, 16 }
  0xef   : > { %859 = vst.msk [vmem:[#allocation2 + $0x70] sm:$0xf] %vm832_vm4, %v795_v5  ;;  %845 = vst.msk [vmem:[#allocation2 + $0x38] sm:$0xf] %vm832_vm4, %v767_v60 }
  0xf0   : > { %892 = vst.msk [vmem:[#allocation2 + $0x70] sm:$0xf] %vm865_vm5, %v795_v5  ;;  %878 = vst.msk [vmem:[#allocation2 + $0x38] sm:$0xf] %vm865_vm5, %v767_v60  ;;  %1164 = vrot.lane.b32.xlu0 %v945_v39, %s3002_s8  ;;  %1196 = vrot.lane.b32.xlu1 %v1073_v51, %s3002_s8  ;;  %v1708_v34 = vld [vmem:[#allocation2 + $0x40] sm:$0xf] }
  0xf1   : > { %v1680_v51 = vld [vmem:[#allocation2 + $0x8] sm:$0xf] }
  0xf2   : > { %v799_v38 = vpop.permute.xlu0 %798  ;;  %v1171_v24 = vpop.permute.xlu1 %1170 }
  0xf3   : > { %861 = vst.msk [vmem:[#allocation2 + $0x78] sm:$0xf] %vm832_vm4, %v799_v38  ;;  %v1270_v19 = vsel %vm3666_vm11, %v1171_v24, %v1269_v0 }
  0xf4   : > { %894 = vst.msk [vmem:[#allocation2 + $0x78] sm:$0xf] %vm865_vm5, %v799_v38  ;;  %1271 = vst [vmem:[#allocation2 + $0x20] sm:$0xf] %v1270_v19  ;;  %1423 = vrot.lane.b32.xlu0 %v3460_v42, %s3003_s9  ;;  %1455 = vrot.lane.b32.xlu1 %v3463_v7, %s3003_s9  ;;  %v1305_v42 = vld [vmem:[#allocation2 + $0x68] sm:$0xf] }
  0xf5   : > { %v1712_v5 = vld [vmem:[#allocation2 + $0x48] sm:$0xf]  ;;  %v1277_v0 = vld [vmem:[#allocation2 + $0x30] sm:$0xf] }
  0xf6   : > { %v1203_v35 = vpop.permute.xlu0 %1202  ;;  %v1175_v31 = vpop.permute.xlu1 %1174 }
  0xf7   : > { %v1302_v40 = vsel %vm3666_vm11, %v1203_v35, %v1301_v54  ;;  %v1274_v43 = vsel %vm3666_vm11, %v1175_v31, %v1273_v14  ;;  %v1309_v24 = vld [vmem:[#allocation2 + $0x70] sm:$0xf] }
  0xf8   : > { %1303 = vst [vmem:[#allocation2 + $0x60] sm:$0xf] %v1302_v40  ;;  %1275 = vst [vmem:[#allocation2 + $0x28] sm:$0xf] %v1274_v43  ;;  %1168 = vrot.lane.b32.xlu0 %v961_v16, %s3002_s8  ;;  %1200 = vrot.lane.b32.xlu1 %v1089_v28, %s3002_s8 }
  0xfa   : > { %v1207_v7 = vpop.permute.xlu0 %1206  ;;  %v1408_v33 = vpop.permute.xlu1 %1407 }
  0xfb   : > { %v1331_v57 = vld [vmem:[#allocation2 + $0x20] sm:$0x1]  ;;  %v1306_v52 = vsel %vm3666_vm11, %v1207_v7, %v1305_v42  ;;  %1500 = vst.msk [vmem:[#allocation2 + $0x10] sm:$0xf] %vm1495_vm1, %v1408_v33  ;;  %v1313_v42 = vld [vmem:[#allocation2 + $0x78] sm:$0xf] }
  0xfc   : > { %v1332_v27 = vsel %vm3691_vm13, 0, %v1331_v57  ;;  %1307 = vst [vmem:[#allocation2 + $0x68] sm:$0xf] %v1306_v52  ;;  %1533 = vst.msk [vmem:[#allocation2 + $0x10] sm:$0xf] %vm1528_vm6, %v1408_v33  ;;  %1409 = vrot.lane.b32.xlu0 %v3755_v20, %s3003_s9  ;;  %1427 = vrot.lane.b32.xlu1 %v3501_v36, %s3003_s9 }
  0xfd   : > { %1333 = vst [vmem:[#allocation2 + $0x20] sm:$0x1] %v1332_v27  ;;  %v3942_v33 = vld [vmem:[%s3088_s5 + $0xcc] sm:$0xf] }
  0xfe   : > { %v1440_v4 = vpop.permute.xlu0 %1439  ;;  %v1412_v17 = vpop.permute.xlu1 %1411  ;;  %v466_v30 = vshrl.u32 %v3942_v33, 16 }
  0xff   : > { %v1355_v26 = vld [vmem:[#allocation2 + $0x60] sm:$0x1]  ;;  %v1334_v23 = vld [vmem:[#allocation2 + $0x28] sm:$0x1]  ;;  %1516 = vst.msk [vmem:[#allocation2 + $0x50] sm:$0xf] %vm1495_vm1, %v1440_v4 }
 0x100   : > { %1502 = vst.msk [vmem:[#allocation2 + $0x18] sm:$0xf] %vm1495_vm1, %v1412_v17  ;;  %v1356_v46 = vsel %vm3691_vm13, 0, %v1355_v26  ;;  %v1335_v20 = vsel %vm3691_vm13, 0, %v1334_v23  ;;  %1441 = vrot.lane.b32.xlu0 %v3759_v9, %s3003_s9  ;;  %1459 = vrot.lane.b32.xlu1 %v3504_v41, %s3003_s9  ;;  %v2921_v26 = vld [vmem:[%s3088_s5 + $0x28] sm:$0xf] }
 0x101   : > { %1549 = vst.msk [vmem:[#allocation2 + $0x50] sm:$0xf] %vm1528_vm6, %v1440_v4  ;;  %1535 = vst.msk [vmem:[#allocation2 + $0x18] sm:$0xf] %vm1528_vm6, %v1412_v17 }
 0x102   : > { %1357 = vst [vmem:[#allocation2 + $0x60] sm:$0x1] %v1356_v46  ;;  %1336 = vst [vmem:[#allocation2 + $0x28] sm:$0x1] %v1335_v20  ;;  %v1444_v44 = vpop.permute.xlu0 %1443  ;;  %v1578_v47 = vpop.permute.xlu1 %1577  ;;  %v2922_v20 = vld [vmem:[%s3088_s5 + $0xa8] sm:$0xf] }
 0x103   : > { %v1358_v62 = vld [vmem:[#allocation2 + $0x68] sm:$0x1]  ;;  %1518 = vst.msk [vmem:[#allocation2 + $0x58] sm:$0xf] %vm1495_vm1, %v1444_v44  ;;  %v1676_v9 = vsel %vm3877_vm9, %v1578_v47, %v1675_v37 }
 0x104   : > { %v1359_v41 = vsel %vm3691_vm13, 0, %v1358_v62  ;;  %1551 = vst.msk [vmem:[#allocation2 + $0x58] sm:$0xf] %vm1528_vm6, %v1444_v44  ;;  %1677 = vst [vmem:[#allocation2] sm:$0xf] %v1676_v9  ;;  %1593 = vrot.lane.b32.xlu0 %v3184_v10, %s3004_s10  ;;  %1625 = vrot.lane.b32.xlu1 %v3284_v1, %s3004_s10  ;;  %v452_v1 = vrot.slane %v450_v59, 7 }
 0x105   : > { %1360 = vst [vmem:[#allocation2 + $0x68] sm:$0x1] %v1359_v41  ;;  %v469_v44 = vshll.u32 %v3942_v33, 16 }
 0x106   : > { %v1610_v39 = vpop.permute.xlu0 %1609  ;;  %v1582_v2 = vpop.permute.xlu1 %1581  ;;  %v455_v48 = vor.u32 %v453_v12, %v452_v1 }
 0x107   : > { %v1709_v56 = vsel %vm3877_vm9, %v1610_v39, %v1708_v34  ;;  %v1681_v13 = vsel %vm3877_vm9, %v1582_v2, %v1680_v51  ;;  %v464_v34 = vrot.slane %v3273_v3, 4  ;;  %v3977_v51 = vld [vmem:[%s3088_s5 + $0x44] sm:$0xf]  ;;  %v2925_v3 = vld [vmem:[%s3088_s5 + $0xb8] sm:$0xf] }
 0x108   : > { %1710 = vst [vmem:[#allocation2 + $0x40] sm:$0xf] %v1709_v56  ;;  %1682 = vst [vmem:[#allocation2 + $0x8] sm:$0xf] %v1681_v13  ;;  %1413 = vrot.lane.b32.xlu0 %v3788_v53, %s3003_s9  ;;  %1445 = vrot.lane.b32.xlu1 %v3791_v6, %s3003_s9  ;;  %v448_v6 = vrot.slane %v3263_v58, 4  ;;  %v971_v1 = vshrl.u32 %v3977_v51, 16 }
 0x109   : > { %v3980_v2 = vld [vmem:[%s3088_s5 + $0xc4] sm:$0xf]  ;;  %v2924_v13 = vld [vmem:[%s3088_s5 + $0x3c] sm:$0xf] }
 0x10a   : > { %v1614_v60 = vpop.permute.xlu0 %1613  ;;  %v536_v61 = vpop.permute.xlu1 %535  ;;  %v456_v58 = vsel %vm3118_vm2, %v448_v6, %v455_v48  ;;  %v1099_v12 = vshrl.u32 %v3980_v2, 16  ;;  %v974_v6 = vshll.u32 %v3977_v51, 16 }
 0x10b   : > { %v1742_v22 = vld [vmem:[#allocation2] sm:$0x1]  ;;  %v1713_v45 = vsel %vm3877_vm9, %v1614_v60, %v1712_v5  ;;  %631 = vst.msk [vmem:[#allocation2 + $0x44] sm:$0xf] %vm596_vm3, %v536_v61 }
 0x10c   : > { %v1743_v53 = vsel %vm3904_vm12, 0, %v1742_v22  ;;  %1714 = vst [vmem:[#allocation2 + $0x48] sm:$0xf] %v1713_v45  ;;  %1597 = vrot.lane.b32.xlu0 %v3199_v21, %s3004_s10  ;;  %1629 = vrot.lane.b32.xlu1 %v3353_v15, %s3004_s10  ;;  %v3997_v22 = vld [vmem:[%s3088_s5 + $0x54] sm:$0xf]  ;;  %v1101_v48 = vrot.slane %v1099_v12, 7 }
 0x10d   : > { %1744 = vst [vmem:[#allocation2] sm:$0x1] %v1743_v53  ;;  %v4000_v45 = vld [vmem:[%s3088_s5 + $0xd4] sm:$0xf]  ;;  %v973_v53 = vrot.slane %v971_v1, 7  ;;  %v4669_v12 = vld [vmem:[#allocation9_spill] sm:$0xff] }
 0x10e   : > { %v1179_v38 = vpop.permute.xlu0 %1178  ;;  %v1211_v19 = vpop.permute.xlu1 %1210  ;;  %v4073_v1 = vld [vmem:[%s3088_s5 + $0xdc] sm:$0xf] }
 0x10f   : > { %v1766_v16 = vld [vmem:[#allocation2 + $0x40] sm:$0x1]  ;;  %v1745_v28 = vld [vmem:[#allocation2 + $0x8] sm:$0x1]  ;;  %v1278_v54 = vsel %vm3666_vm11, %v1179_v38, %v1277_v0  ;;  %v1310_v35 = vsel %vm3666_vm11, %v1211_v19, %v1309_v24  ;;  %v1102_v38 = vshll.u32 %v3980_v2, 16  ;;  %v987_v0 = vshrl.u32 %v3997_v22, 16 }
 0x110   : > { %v1767_v21 = vsel %vm3904_vm12, 0, %v1766_v16  ;;  %v1746_v15 = vsel %vm3904_vm12, 0, %v1745_v28  ;;  %1279 = vst [vmem:[#allocation2 + $0x30] sm:$0xf] %v1278_v54  ;;  %1311 = vst [vmem:[#allocation2 + $0x70] sm:$0xf] %v1310_v35  ;;  %1587 = vrot.lane.b32.xlu0 %v3155_v50, %s3004_s10  ;;  %1619 = vrot.lane.b32.xlu1 %v3773_v29, %s3004_s10  ;;  %v976_v54 = vor.u32 %v974_v6, %v973_v53 }
 0x111   : > { %1768 = vst [vmem:[#allocation2 + $0x40] sm:$0x1] %v1767_v21  ;;  %1747 = vst [vmem:[#allocation2 + $0x8] sm:$0x1] %v1746_v15  ;;  %v1281_v29 = vld [vmem:[#allocation2 + $0x38] sm:$0xf]  ;;  %v1104_v21 = vor.u32 %v1102_v38, %v1101_v48 }
 0x112   : > { %v540_v14 = vpop.permute.xlu0 %539  ;;  %v773_v31 = vpop.permute.xlu1 %772  ;;  %v1115_v24 = vshrl.u32 %v4000_v45, 16  ;;  %v969_v28 = vrot.slane %v3418_v8, 4  ;;  %v1097_v35 = vrot.slane %v3433_v18, 4  ;;  %v989_v15 = vrot.slane %v987_v0, 7  ;;  %v4028_v8 = vld [vmem:[%s3088_s5 + $0x4c] sm:$0xf] }
 0x113   : > { %v1769_v40 = vld [vmem:[#allocation2 + $0x48] sm:$0x1]  ;;  %635 = vst.msk [vmem:[#allocation2 + $0x4c] sm:$0xf] %vm596_vm3, %v540_v14 }
 0x114   : > { %848 = vst.msk [vmem:[#allocation2 + $0x44] sm:$0xf] %vm832_vm4, %v773_v31  ;;  %v1770_v43 = vsel %vm3904_vm12, 0, %v1769_v40  ;;  %1591 = vrot.lane.b32.xlu0 %v3168_v63, %s3004_s10  ;;  %1623 = vrot.lane.b32.xlu1 %v456_v58, %s3004_s10  ;;  %v1117_v14 = vrot.slane %v1115_v24, 7  ;;  %v977_v18 = vsel %vm3118_vm2, %v969_v28, %v976_v54  ;;  %v485_v28 = vshll.u32 %v4073_v1, 16 }
 0x115   : > { %881 = vst.msk [vmem:[#allocation2 + $0x44] sm:$0xf] %vm865_vm5, %v773_v31  ;;  %1771 = vst [vmem:[#allocation2 + $0x48] sm:$0x1] %v1770_v43  ;;  %v1118_v31 = vshll.u32 %v4000_v45, 16 }
 0x116   : > { %v1183_v50 = vpop.permute.xlu0 %1182  ;;  %v1215_v7 = vpop.permute.xlu1 %1214 }
 0x117   : > { %v1337_v57 = vld [vmem:[#allocation2 + $0x30] sm:$0x1]  ;;  %v1282_v27 = vsel %vm3666_vm11, %v1183_v50, %v1281_v29  ;;  %v1314_v4 = vsel %vm3666_vm11, %v1215_v7, %v1313_v42  ;;  %v4667_v50 = vld [vmem:[#allocation14_spill] sm:$0xff]  ;;  %v4668_v7 = vld [vmem:[#allocation15_spill] sm:$0xff]  ;;  %vm1921_vm11 = vcmask 216256  }
 0x118   : > { %v1361_v52 = vld [vmem:[#allocation2 + $0x70] sm:$0x1]  ;;  %v1338_v63 = vsel %vm3691_vm13, 0, %v1337_v57  ;;  %1283 = vst [vmem:[#allocation2 + $0x38] sm:$0xf] %v1282_v27  ;;  %1800 = vrot.lane.b32.xlu0 %v2921_v26, %s3006_s13  ;;  %1802 = vrot.lane.b32.xlu1 %v3815_v32, %s3006_s13  ;;  %v468_v32 = vrot.slane %v466_v30, 7 }
 0x119   : > { %v1362_v17 = vsel %vm3691_vm13, 0, %v1361_v52  ;;  %1315 = vst [vmem:[#allocation2 + $0x78] sm:$0xf] %v1314_v4  ;;  %1339 = vst [vmem:[#allocation2 + $0x30] sm:$0x1] %v1338_v63  ;;  %v985_v29 = vrot.slane %v4667_v50, 4  ;;  %v1120_v52 = vor.u32 %v1118_v31, %v1117_v14 }
 0x11a   : > { %1363 = vst [vmem:[#allocation2 + $0x70] sm:$0x1] %v1362_v17  ;;  %v745_v23 = vpop.permute.xlu0 %744  ;;  %v777_v46 = vpop.permute.xlu1 %776  ;;  %v471_v39 = vor.u32 %v469_v44, %v468_v32  ;;  %v1113_v57 = vrot.slane %v4668_v7, 4  ;;  %v1684_v4 = vld [vmem:[#allocation2 + $0x10] sm:$0xf]  ;;  %v4673_v31 = vld [vmem:[#allocation6_spill] sm:$0xff] }
 0x11b   : > { %834 = vst.msk [vmem:[#allocation2 + $0xc] sm:$0xf] %vm832_vm4, %v745_v23  ;;  %850 = vst.msk [vmem:[#allocation2 + $0x4c] sm:$0xf] %vm832_vm4, %v777_v46  ;;  %v1716_v63 = vld [vmem:[#allocation2 + $0x50] sm:$0xf] }
 0x11c   : > { %867 = vst.msk [vmem:[#allocation2 + $0xc] sm:$0xf] %vm865_vm5, %v745_v23  ;;  %883 = vst.msk [vmem:[#allocation2 + $0x4c] sm:$0xf] %vm865_vm5, %v777_v46  ;;  %1832 = vrot.lane.b32.xlu0 %v2922_v20, %s3006_s13  ;;  %1834 = vrot.lane.b32.xlu1 %v3713_v55, %s3006_s13  ;;  %v2923_v55 = vld [vmem:[%s3088_s5 + $0x38] sm:$0xf]  ;;  %v3994_v5 = vsel %vm3118_vm2, %v464_v34, %v471_v39  ;;  %v1121_v46 = vsel %vm3118_vm2, %v1113_v57, %v1120_v52 }
 0x11d   : > { %v4057_v44 = vld [vmem:[%s3088_s5 + $0xf8] sm:$0xf]  ;;  %v4674_v50 = vld [vmem:[#allocation7_spill] sm:$0xff] }
 0x11e   : > { %v1157_v37 = vpop.permute.xlu0 %1156  ;;  %v1189_v47 = vpop.permute.xlu1 %1188  ;;  %v2927_v57 = vld [vmem:[%s3088_s5 + $0x48] sm:$0xf] }
 0x11f   : > { %v1340_v62 = vld [vmem:[#allocation2 + $0x38] sm:$0x1]  ;;  %1256 = vst.msk [vmem:[#allocation2 + $0x4] sm:$0xf] %vm1250_vm10, %v1157_v37  ;;  %1288 = vst.msk [vmem:[#allocation2 + $0x44] sm:$0xf] %vm1250_vm10, %v1189_v47 }
 0x120   : > { %v1364_v9 = vld [vmem:[#allocation2 + $0x78] sm:$0x1]  ;;  %v1341_v41 = vsel %vm3691_vm13, 0, %v1340_v62  ;;  %551 = vrot.lane.b32.xlu0 %v456_v58, %s2999_s6  ;;  %1804 = vrot.lane.b32.xlu1 %v2923_v55, %s3006_s13  ;;  %v990_v58 = vshll.u32 %v3997_v22, 16 }
 0x121   : > { %v1365_v59 = vsel %vm3691_vm13, 0, %v1364_v9  ;;  %1342 = vst [vmem:[#allocation2 + $0x38] sm:$0x1] %v1341_v41  ;;  %v1688_v47 = vld [vmem:[#allocation2 + $0x18] sm:$0xf]  ;;  %vm2081_vm13 = vcmask 220160  }
 0x122   : > { %1366 = vst [vmem:[#allocation2 + $0x78] sm:$0x1] %v1365_v59  ;;  %v1416_v56 = vpop.permute.xlu0 %1415  ;;  %v1448_v49 = vpop.permute.xlu1 %1447  ;;  %v992_v42 = vor.u32 %v990_v58, %v989_v15  ;;  %v1720_v62 = vld [vmem:[#allocation2 + $0x58] sm:$0xf] }
 0x123   : > { %1504 = vst.msk [vmem:[#allocation2 + $0x20] sm:$0xf] %vm1495_vm1, %v1416_v56  ;;  %1520 = vst.msk [vmem:[#allocation2 + $0x60] sm:$0xf] %vm1495_vm1, %v1448_v49 }
 0x124   : > { %1537 = vst.msk [vmem:[#allocation2 + $0x20] sm:$0xf] %vm1528_vm6, %v1416_v56  ;;  %1553 = vst.msk [vmem:[#allocation2 + $0x60] sm:$0xf] %vm1528_vm6, %v1448_v49  ;;  %1806 = vrot.lane.b32.xlu0 %v2924_v13, %s3006_s13  ;;  %1836 = vrot.lane.b32.xlu1 %v2925_v3, %s3006_s13  ;;  %v993_v23 = vsel %vm3118_vm2, %v985_v29, %v992_v42  ;;  %v1562_v49 = vshrl.u32 %v4057_v44, 16 }
 0x125   : > { %v4123_v42 = vld [vmem:[%s3088_s5 + $0xec] sm:$0xf] }
 0x126   : > { %v1161_v60 = vpop.permute.xlu0 %1160  ;;  %v1193_v61 = vpop.permute.xlu1 %1192  ;;  %v498_v52 = vshrl.u32 %v4123_v42, 16 }
 0x127   : > { %1260 = vst.msk [vmem:[#allocation2 + $0xc] sm:$0xf] %vm1250_vm10, %v1161_v60  ;;  %1292 = vst.msk [vmem:[#allocation2 + $0x4c] sm:$0xf] %vm1250_vm10, %v1193_v61  ;;  %v4081_v60 = vrot.slane %v1562_v49, 7  ;;  %v482_v61 = vshrl.u32 %v4073_v1, 16 }
 0x128   : > { %1838 = vrot.lane.b32.xlu0 %v3882_v11, %s3006_s13  ;;  %555 = vrot.lane.b32.xlu1 %v3994_v5, %s2999_s6 }
 0x12a   : > { %v1402_v19 = vpop.permute.xlu0 %1401  ;;  %v1420_v16 = vpop.permute.xlu1 %1419 }
 0x12b   : > { %1497 = vst.msk [vmem:[#allocation2 + $0x4] sm:$0xf] %vm1495_vm1, %v1402_v19  ;;  %1506 = vst.msk [vmem:[#allocation2 + $0x28] sm:$0xf] %vm1495_vm1, %v1420_v16 }
 0x12c   : > { %1530 = vst.msk [vmem:[#allocation2 + $0x4] sm:$0xf] %vm1528_vm6, %v1402_v19  ;;  %1539 = vst.msk [vmem:[#allocation2 + $0x28] sm:$0xf] %vm1528_vm6, %v1420_v16  ;;  %756 = vrot.lane.b32.xlu0 %v2924_v13, %s3000_s7  ;;  %788 = vrot.lane.b32.xlu1 %v3882_v11, %s3000_s7  ;;  %v1105_v11 = vsel %vm3118_vm2, %v1097_v35, %v1104_v21  ;;  %v484_v16 = vrot.slane %v482_v61, 7 }
 0x12e   : > { %v1434_v40 = vpop.permute.xlu0 %1433  ;;  %v1452_v43 = vpop.permute.xlu1 %1451  ;;  %v487_v15 = vor.u32 %v485_v28, %v484_v16  ;;  %v4677_v28 = vld [vmem:[#allocation17_spill] sm:$0xff] }
 0x12f   : > { %1513 = vst.msk [vmem:[#allocation2 + $0x44] sm:$0xf] %vm1495_vm1, %v1434_v40  ;;  %1522 = vst.msk [vmem:[#allocation2 + $0x68] sm:$0xf] %vm1495_vm1, %v1452_v43 }
 0x130   : > { %1546 = vst.msk [vmem:[#allocation2 + $0x44] sm:$0xf] %vm1528_vm6, %v1434_v40  ;;  %1555 = vst.msk [vmem:[#allocation2 + $0x68] sm:$0xf] %vm1528_vm6, %v1452_v43  ;;  %760 = vrot.lane.b32.xlu0 %v4028_v8, %s3000_s7  ;;  %792 = vrot.lane.b32.xlu1 %v3942_v33, %s3000_s7 }
 0x132   : > { %v1586_v27 = vpop.permute.xlu0 %1585  ;;  %v1618_v17 = vpop.permute.xlu1 %1617 }
 0x133   : > { %v1685_v26 = vsel %vm3877_vm9, %v1586_v27, %v1684_v4  ;;  %v1717_v30 = vsel %vm3877_vm9, %v1618_v17, %v1716_v63  ;;  %v2928_v63 = vld [vmem:[%s3088_s5 + $0xc8] sm:$0xf]  ;;  %v501_v17 = vshll.u32 %v4123_v42, 16 }
 0x134   : > { %1686 = vst [vmem:[#allocation2 + $0x10] sm:$0xf] %v1685_v26  ;;  %1718 = vst [vmem:[#allocation2 + $0x50] sm:$0xf] %v1717_v30  ;;  %1172 = vrot.lane.b32.xlu0 %v977_v18, %s3002_s8  ;;  %1204 = vrot.lane.b32.xlu1 %v1105_v11, %s3002_s8 }
 0x136   : > { %v1406_v20 = vpop.permute.xlu0 %1405  ;;  %v1438_v32 = vpop.permute.xlu1 %1437 }
 0x137   : > { %1499 = vst.msk [vmem:[#allocation2 + $0xc] sm:$0xf] %vm1495_vm1, %v1406_v20  ;;  %1515 = vst.msk [vmem:[#allocation2 + $0x4c] sm:$0xf] %vm1495_vm1, %v1438_v32 }
 0x138   : > { %1532 = vst.msk [vmem:[#allocation2 + $0xc] sm:$0xf] %vm1528_vm6, %v1406_v20  ;;  %1548 = vst.msk [vmem:[#allocation2 + $0x4c] sm:$0xf] %vm1528_vm6, %v1438_v32  ;;  %1176 = vrot.lane.b32.xlu0 %v993_v23, %s3002_s8  ;;  %1208 = vrot.lane.b32.xlu1 %v1121_v46, %s3002_s8  ;;  %v4675_v46 = vld [vmem:[#allocation12_spill] sm:$0xff] }
 0x139   : > { %v496_v20 = vrot.slane %v4675_v46, 4 }
 0x13a   : > { %v1590_v37 = vpop.permute.xlu0 %1589  ;;  %v1622_v9 = vpop.permute.xlu1 %1621 }
 0x13b   : > { %v1748_v41 = vld [vmem:[#allocation2 + $0x10] sm:$0x1]  ;;  %v1689_v55 = vsel %vm3877_vm9, %v1590_v37, %v1688_v47  ;;  %v1721_v34 = vsel %vm3877_vm9, %v1622_v9, %v1720_v62  ;;  %v4153_v37 = vld [vmem:[%s3088_s5 + $0x64] sm:$0xf] }
 0x13c   : > { %v1772_v59 = vld [vmem:[#allocation2 + $0x50] sm:$0x1]  ;;  %v1749_v39 = vsel %vm3904_vm12, 0, %v1748_v41  ;;  %1690 = vst [vmem:[#allocation2 + $0x18] sm:$0xf] %v1689_v55  ;;  %1417 = vrot.lane.b32.xlu0 %v3977_v51, %s3003_s9  ;;  %1449 = vrot.lane.b32.xlu1 %v3980_v2, %s3003_s9  ;;  %v4670_v51 = vld [vmem:[#allocation13_spill] sm:$0xff] }
 0x13d   : > { %v1773_v56 = vsel %vm3904_vm12, 0, %v1772_v59  ;;  %1722 = vst [vmem:[#allocation2 + $0x58] sm:$0xf] %v1721_v34  ;;  %1750 = vst [vmem:[#allocation2 + $0x10] sm:$0x1] %v1749_v39  ;;  %v1565_v2 = vshll.u32 %v4057_v44, 16 }
 0x13e   : > { %1774 = vst [vmem:[#allocation2 + $0x50] sm:$0x1] %v1773_v56  ;;  %v1580_v13 = vpop.permute.xlu0 %1579  ;;  %v1612_v3 = vpop.permute.xlu1 %1611  ;;  %v4156_v47 = vld [vmem:[%s3088_s5 + $0xe4] sm:$0xf]  ;;  %v2930_v59 = vld [vmem:[%s3088_s5 + $0x5c] sm:$0xf] }
 0x13f   : > { %1679 = vst.msk [vmem:[#allocation2 + $0x4] sm:$0xf] %vm1673_vm7, %v1580_v13  ;;  %1711 = vst.msk [vmem:[#allocation2 + $0x44] sm:$0xf] %vm1673_vm7, %v1612_v3  ;;  %v1567_v19 = vor.u32 %v1565_v2, %v4081_v60  ;;  %v2931_v55 = vld [vmem:[%s3088_s5 + $0xd8] sm:$0xf] }
 0x140   : > { %1601 = vrot.lane.b32.xlu0 %v4669_v12, %s3004_s10  ;;  %1633 = vrot.lane.b32.xlu1 %v4670_v51, %s3004_s10  ;;  %v1003_v34 = vshrl.u32 %v4153_v37, 16  ;;  %v1131_v39 = vshrl.u32 %v4156_v47, 16  ;;  %v4174_v3 = vld [vmem:[%s3088_s5 + $0x74] sm:$0xf]  ;;  %v1006_v2 = vshll.u32 %v4153_v37, 16 }
 0x141   : > { %v4177_v12 = vld [vmem:[%s3088_s5 + $0xf4] sm:$0xf] }
 0x142   : > { %v1584_v53 = vpop.permute.xlu0 %1583  ;;  %v1616_v6 = vpop.permute.xlu1 %1615  ;;  %v1005_v51 = vrot.slane %v1003_v34, 7  ;;  %v1133_v61 = vrot.slane %v1131_v39, 7  ;;  %v1728_v34 = vld [vmem:[#allocation2 + $0x68] sm:$0xf] }
 0x143   : > { %v1751_v48 = vld [vmem:[#allocation2 + $0x18] sm:$0x1]  ;;  %1683 = vst.msk [vmem:[#allocation2 + $0xc] sm:$0xf] %vm1673_vm7, %v1584_v53  ;;  %1715 = vst.msk [vmem:[#allocation2 + $0x4c] sm:$0xf] %vm1673_vm7, %v1616_v6 }
 0x144   : > { %v1775_v38 = vld [vmem:[#allocation2 + $0x58] sm:$0x1]  ;;  %v1752_v0 = vsel %vm3904_vm12, 0, %v1751_v48  ;;  %1421 = vrot.lane.b32.xlu0 %v3997_v22, %s3003_s9  ;;  %1453 = vrot.lane.b32.xlu1 %v4000_v45, %s3003_s9  ;;  %v4671_v22 = vld [vmem:[#allocation8_spill] sm:$0xff]  ;;  %v4672_v45 = vld [vmem:[#allocation11_spill] sm:$0xff]  ;;  %v1134_v53 = vshll.u32 %v4156_v47, 16  ;;  %v1008_v16 = vor.u32 %v1006_v2, %v1005_v51 }
 0x145   : > { %v1776_v24 = vsel %vm3904_vm12, 0, %v1775_v38  ;;  %1753 = vst [vmem:[#allocation2 + $0x18] sm:$0x1] %v1752_v0  ;;  %v480_v21 = vrot.slane %v4672_v45, 4  ;;  %v1019_v6 = vshrl.u32 %v4174_v3, 16  ;;  %v1147_v48 = vshrl.u32 %v4177_v12, 16 }
 0x146   : > { %1777 = vst [vmem:[#allocation2 + $0x58] sm:$0x1] %v1776_v24  ;;  %v1793_v54 = vpop.permute.xlu0 %1792  ;;  %v1795_v35 = vpop.permute.xlu1 %1794  ;;  %v4676_v24 = vld [vmem:[#allocation16_spill] sm:$0xff]  ;;  %v1022_v45 = vshll.u32 %v4174_v3, 16 }
 0x147   : > { %1889 = vst.msk [vmem:[#allocation2] sm:$0xf] %vm1888_vm0, %v1793_v54  ;;  %1890 = vst.msk [vmem:[#allocation2 + $0x4] sm:$0xf] %vm1888_vm0, %v1795_v35  ;;  %v488_v40 = vsel %vm3118_vm2, %v480_v21, %v487_v15  ;;  %v1149_v21 = vrot.slane %v1147_v48, 7  ;;  %v1150_v15 = vshll.u32 %v4177_v12, 16 }
 0x148   : > { %1922 = vst.msk [vmem:[#allocation2] sm:$0xf] %vm1921_vm11, %v1793_v54  ;;  %1923 = vst.msk [vmem:[#allocation2 + $0x4] sm:$0xf] %vm1921_vm11, %v1795_v35  ;;  %1605 = vrot.lane.b32.xlu0 %v4671_v22, %s3004_s10  ;;  %1637 = vrot.lane.b32.xlu1 %v1567_v19, %s3004_s10  ;;  %v1001_v19 = vrot.slane %v4676_v24, 4  ;;  %v1129_v54 = vrot.slane %v4677_v28, 4  ;;  %v1136_v35 = vor.u32 %v1134_v53, %v1133_v61 }
 0x149   : > { %v1021_v22 = vrot.slane %v1019_v6, 7  ;;  %v4681_v48 = vld [vmem:[#allocation18_spill] sm:$0xff] }
 0x14a   : > { %v1825_v58 = vpop.permute.xlu0 %1824  ;;  %v1827_v14 = vpop.permute.xlu1 %1826 }
 0x14b   : > { %1905 = vst.msk [vmem:[#allocation2 + $0x40] sm:$0xf] %vm1888_vm0, %v1825_v58  ;;  %1906 = vst.msk [vmem:[#allocation2 + $0x44] sm:$0xf] %vm1888_vm0, %v1827_v14 }
 0x14c   : > { %1938 = vst.msk [vmem:[#allocation2 + $0x40] sm:$0xf] %vm1921_vm11, %v1825_v58  ;;  %1939 = vst.msk [vmem:[#allocation2 + $0x44] sm:$0xf] %vm1921_vm11, %v1827_v14  ;;  %1595 = vrot.lane.b32.xlu0 %v4673_v31, %s3004_s10  ;;  %1627 = vrot.lane.b32.xlu1 %v3994_v5, %s3004_s10  ;;  %v4203_v31 = vld [vmem:[%s3088_s5 + $0x6c] sm:$0xf] }
 0x14e   : > { %v544_v43 = vpop.permute.xlu0 %543  ;;  %v1797_v18 = vpop.permute.xlu1 %1796 }
 0x14f   : > { %639 = vst.msk [vmem:[#allocation2 + $0x54] sm:$0xf] %vm596_vm3, %v544_v43  ;;  %v2898_v11 = vld [vmem:[#allocation2] sm:$0xff]   ;;  %v4678_v43 = vld [vmem:[#allocation19_spill] sm:$0xff] }
 0x150   : > { %1891 = vst.msk [vmem:[#allocation2 + $0x8] sm:$0xf] %vm1888_vm0, %v1797_v18  ;;  %1599 = vrot.lane.b32.xlu0 %v4674_v50, %s3004_s10  ;;  %1631 = vrot.lane.b32.xlu1 %v488_v40, %s3004_s10  ;;  %v4679_v50 = vld [vmem:[#allocation20_spill] sm:$0xff] }
 0x151   : > { %1924 = vst.msk [vmem:[#allocation2 + $0x8] sm:$0xf] %vm1921_vm11, %v1797_v18  ;;  %2813 = vmatprep.mubr.msk.bf16.mxu0 %vm2081_vm13, %v2898_v11  ;;  %v1017_v18 = vrot.slane %v4678_v43, 4  ;;  %v1024_v11 = vor.u32 %v1022_v45, %v1021_v22 }
 0x152   : > { %v1799_v5 = vpop.permute.xlu0 %1798  ;;  %v1829_v29 = vpop.permute.xlu1 %1828 }
 0x153   : > { %1892 = vst.msk [vmem:[#allocation2 + $0xc] sm:$0xf] %vm1888_vm0, %v1799_v5  ;;  %1907 = vst.msk [vmem:[#allocation2 + $0x48] sm:$0xf] %vm1888_vm0, %v1829_v29  ;;  %v2900_v7 = vld [vmem:[#allocation2 + $0x40] sm:$0xff]  }
 0x154   : > { %1925 = vst.msk [vmem:[#allocation2 + $0xc] sm:$0xf] %vm1921_vm11, %v1799_v5  ;;  %1940 = vst.msk [vmem:[#allocation2 + $0x48] sm:$0xf] %vm1921_vm11, %v1829_v29  ;;  %1808 = vrot.lane.b32.xlu0 %v2927_v57, %s3006_s13  ;;  %1810 = vrot.lane.b32.xlu1 %v4028_v8, %s3006_s13  ;;  %v500_v8 = vrot.slane %v498_v52, 7  ;;  %v1145_v5 = vrot.slane %v4679_v50, 4  ;;  %v1152_v29 = vor.u32 %v1150_v15, %v1149_v21 }
 0x155   : > { %2829 = vmatprep.mubr.msk.bf16.mxu1 %vm2081_vm13, %v2900_v7  ;;  %v1025_v52 = vsel %vm3118_vm2, %v1017_v18, %v1024_v11  ;;  %v2935_v21 = vld [vmem:[%s3088_s5 + $0x78] sm:$0xf]  ;;  %v2936_v15 = vld [vmem:[%s3088_s5 + $0x7c] sm:$0xf] }
 0x156   : > { %v1831_v27 = vpop.permute.xlu0 %1830  ;;  %v548_v4 = vpop.permute.xlu1 %547  ;;  %v503_v32 = vor.u32 %v501_v17, %v500_v8  ;;  %v4226_v8 = vld [vmem:[%s3088_s5 + $0xfc] sm:$0xf] }
 0x157   : > { %1908 = vst.msk [vmem:[#allocation2 + $0x4c] sm:$0xf] %vm1888_vm0, %v1831_v27  ;;  %v1570_v17 = vshrl.u32 %v4226_v8, 16 }
 0x158   : > { %643 = vst.msk [vmem:[#allocation2 + $0x5c] sm:$0xf] %vm596_vm3, %v548_v4  ;;  %1840 = vrot.lane.b32.xlu0 %v2928_v63, %s3006_s13  ;;  %1842 = vrot.lane.b32.xlu1 %v3942_v33, %s3006_s13  ;;  %v2929_v33 = vld [vmem:[%s3088_s5 + $0x58] sm:$0xf]  ;;  %v4171_v56 = vsel %vm3118_vm2, %v496_v20, %v503_v32 }
 0x159   : > { %1941 = vst.msk [vmem:[#allocation2 + $0x4c] sm:$0xf] %vm1921_vm11, %v1831_v27  ;;  %v1153_v27 = vsel %vm3118_vm2, %v1145_v5, %v1152_v29  ;;  %v1572_v32 = vrot.slane %v1570_v17, 7 }
 0x15a   : > { %v749_v26 = vpop.permute.xlu0 %748  ;;  %v781_v30 = vpop.permute.xlu1 %780 }
 0x15b   : > { %836 = vst.msk [vmem:[#allocation2 + $0x14] sm:$0xf] %vm832_vm4, %v749_v26  ;;  %852 = vst.msk [vmem:[#allocation2 + $0x54] sm:$0xf] %vm832_vm4, %v781_v30  ;;  %v2902_v23 = vld [vmem:[#allocation2 + $0x8] sm:$0xff]  }
 0x15c   : > { %869 = vst.msk [vmem:[#allocation2 + $0x14] sm:$0xf] %vm865_vm5, %v749_v26  ;;  %885 = vst.msk [vmem:[#allocation2 + $0x54] sm:$0xf] %vm865_vm5, %v781_v30  ;;  %559 = vrot.lane.b32.xlu0 %v488_v40, %s2999_s6  ;;  %1812 = vrot.lane.b32.xlu1 %v2929_v33, %s3006_s13  ;;  %v1137_v40 = vsel %vm3118_vm2, %v1129_v54, %v1136_v35  ;;  %v1692_v30 = vld [vmem:[#allocation2 + $0x20] sm:$0xf] }
 0x15d   : > { %2814 = vmatmul.mubr.msk.bf16.vlgmr.msra.gmra.mxu0 %vm2081_vm13, %v2902_v23  ;;  %v1724_v23 = vld [vmem:[#allocation2 + $0x60] sm:$0xf]  ;;  %v2934_v35 = vld [vmem:[%s3088_s5 + $0xe8] sm:$0xf] }
 0x15e   : > { %v753_v62 = vpop.permute.xlu0 %752  ;;  %v785_v9 = vpop.permute.xlu1 %784 }
 0x15f   : > { %838 = vst.msk [vmem:[#allocation2 + $0x1c] sm:$0xf] %vm832_vm4, %v753_v62  ;;  %854 = vst.msk [vmem:[#allocation2 + $0x5c] sm:$0xf] %vm832_vm4, %v785_v9 }
 0x160   : > { %v2903_v41 = vld [vmem:[#allocation2 + $0x48] sm:$0xff]   ;;  %871 = vst.msk [vmem:[#allocation2 + $0x1c] sm:$0xf] %vm865_vm5, %v753_v62  ;;  %887 = vst.msk [vmem:[#allocation2 + $0x5c] sm:$0xf] %vm865_vm5, %v785_v9  ;;  %1814 = vrot.lane.b32.xlu0 %v2930_v59, %s3006_s13  ;;  %1844 = vrot.lane.b32.xlu1 %v2931_v55, %s3006_s13  ;;  %v1573_v62 = vshll.u32 %v4226_v8, 16 }
 0x161   : > { %2830 = vmatmul.mubr.msk.bf16.vlgmr.msra.gmra.mxu1 %vm2081_vm13, %v2903_v41  ;;  %v1696_v55 = vld [vmem:[#allocation2 + $0x28] sm:$0xf] }
 0x162   : > { %v1165_v49 = vpop.permute.xlu0 %1164  ;;  %v1197_v13 = vpop.permute.xlu1 %1196 }
 0x163   : > { %1264 = vst.msk [vmem:[#allocation2 + $0x14] sm:$0xf] %vm1250_vm10, %v1165_v49  ;;  %1296 = vst.msk [vmem:[#allocation2 + $0x54] sm:$0xf] %vm1250_vm10, %v1197_v13 }
 0x164   : > { %1846 = vrot.lane.b32.xlu0 %v4073_v1, %s3006_s13  ;;  %563 = vrot.lane.b32.xlu1 %v4171_v56, %s2999_s6  ;;  %s2790_s6 = sshll.u32 %s3056_s19, 11  ;;  %s4576_s19 = scalar_lea.sflag [#allocation4], %s188_s27 }
 0x166   : > { %v1424_v38 = vpop.permute.xlu0 %1423  ;;  %v1456_v0 = vpop.permute.xlu1 %1455 }
 0x167   : > { %1508 = vst.msk [vmem:[#allocation2 + $0x30] sm:$0xf] %vm1495_vm1, %v1424_v38  ;;  %1524 = vst.msk [vmem:[#allocation2 + $0x70] sm:$0xf] %vm1495_vm1, %v1456_v0 }
 0x168   : > { %1541 = vst.msk [vmem:[#allocation2 + $0x30] sm:$0xf] %vm1528_vm6, %v1424_v38  ;;  %1557 = vst.msk [vmem:[#allocation2 + $0x70] sm:$0xf] %vm1528_vm6, %v1456_v0  ;;  %764 = vrot.lane.b32.xlu0 %v2930_v59, %s3000_s7  ;;  %796 = vrot.lane.b32.xlu1 %v4073_v1, %s3000_s7  ;;  %v1009_v1 = vsel %vm3118_vm2, %v1001_v19, %v1008_v16  ;;  %v2933_v16 = vld [vmem:[%s3088_s5 + $0x68] sm:$0xf] }
 0x169   : > { %s4445_s5 = scalar_lea.vmem [#allocation3], %s2649_s30 }
 0x16a   : > { %v1169_v58 = vpop.permute.xlu0 %1168  ;;  %v1201_v14 = vpop.permute.xlu1 %1200 }
 0x16b   : > { %1268 = vst.msk [vmem:[#allocation2 + $0x1c] sm:$0xf] %vm1250_vm10, %v1169_v58  ;;  %1300 = vst.msk [vmem:[#allocation2 + $0x5c] sm:$0xf] %vm1250_vm10, %v1201_v14 }
 0x16c   : > { %768 = vrot.lane.b32.xlu0 %v4203_v31, %s3000_s7  ;;  %800 = vrot.lane.b32.xlu1 %v4123_v42, %s3000_s7  ;;  %s2583_s7 = sshll.u32 %s4445_s5, 4  ;;  %s4568_s7 = int_to_ptr.vmem [resolvable:$true] %s2583_s7 }
 0x16d   : > { %s2937_s11 = scalar_lea.vmem %s4568_s7, 2048 }
 0x16e   : > { %v1410_v7 = vpop.permute.xlu0 %1409  ;;  %v1428_v57 = vpop.permute.xlu1 %1427  ;;  %p2938_p11 = scmp.ne.s32.totalorder %s4568_s7, %s2937_s11 }
 0x16f   : > { %1501 = vst.msk [vmem:[#allocation2 + $0x14] sm:$0xf] %vm1495_vm1, %v1410_v7  ;;  %1510 = vst.msk [vmem:[#allocation2 + $0x38] sm:$0xf] %vm1495_vm1, %v1428_v57 }
 0x170   : > { %1534 = vst.msk [vmem:[#allocation2 + $0x14] sm:$0xf] %vm1528_vm6, %v1410_v7  ;;  %1543 = vst.msk [vmem:[#allocation2 + $0x38] sm:$0xf] %vm1528_vm6, %v1428_v57  ;;  %1180 = vrot.lane.b32.xlu0 %v1009_v1, %s3002_s8  ;;  %1212 = vrot.lane.b32.xlu1 %v1137_v40, %s3002_s8  ;;  %p2939_p12 = pnand %p2938_p11, %p3073_p5 }
 0x172   : > { %v1442_v4 = vpop.permute.xlu0 %1441  ;;  %v1460_v63 = vpop.permute.xlu1 %1459  ;;  %p2940_p13 = pneg %p2939_p12 }
 0x173   : > { %1517 = vst.msk [vmem:[#allocation2 + $0x54] sm:$0xf] %vm1495_vm1, %v1442_v4  ;;  %1526 = vst.msk [vmem:[#allocation2 + $0x78] sm:$0xf] %vm1495_vm1, %v1460_v63 }
 0x174   : > { %1550 = vst.msk [vmem:[#allocation2 + $0x54] sm:$0xf] %vm1528_vm6, %v1442_v4  ;;  %1559 = vst.msk [vmem:[#allocation2 + $0x78] sm:$0xf] %vm1528_vm6, %v1460_v63  ;;  %1184 = vrot.lane.b32.xlu0 %v1025_v52, %s3002_s8  ;;  %1216 = vrot.lane.b32.xlu1 %v1153_v27, %s3002_s8 }
 0x176   : > { %v1594_v26 = vpop.permute.xlu0 %1593  ;;  %v1626_v33 = vpop.permute.xlu1 %1625 }
 0x177   : > { %v1693_v46 = vsel %vm3877_vm9, %v1594_v26, %v1692_v30  ;;  %v1725_v20 = vsel %vm3877_vm9, %v1626_v33, %v1724_v23  ;;  %v1700_v26 = vld [vmem:[#allocation2 + $0x30] sm:$0xf] }
 0x178   : > { %1694 = vst [vmem:[#allocation2 + $0x20] sm:$0xf] %v1693_v46  ;;  %1726 = vst [vmem:[#allocation2 + $0x60] sm:$0xf] %v1725_v20  ;;  %1425 = vrot.lane.b32.xlu0 %v4153_v37, %s3003_s9  ;;  %1457 = vrot.lane.b32.xlu1 %v4156_v47, %s3003_s9  ;;  %v1568_v37 = vrot.slane %v4081_v60, 4  ;;  %v1575_v47 = vor.u32 %v1573_v62, %v1572_v32  ;;  %v4680_v60 = vld [vmem:[#allocation10_spill] sm:$0xff] }
 0x179   : > { %v1732_v30 = vld [vmem:[#allocation2 + $0x70] sm:$0xf] }
 0x17a   : > { %v1414_v9 = vpop.permute.xlu0 %1413  ;;  %v1446_v41 = vpop.permute.xlu1 %1445  ;;  %v1576_v61 = vsel %vm3118_vm2, %v1568_v37, %v1575_v47  ;;  %vm2536_vm2 = vcmask 257024  }
 0x17b   : > { %1503 = vst.msk [vmem:[#allocation2 + $0x1c] sm:$0xf] %vm1495_vm1, %v1414_v9  ;;  %1519 = vst.msk [vmem:[#allocation2 + $0x5c] sm:$0xf] %vm1495_vm1, %v1446_v41 }
 0x17c   : > { %1536 = vst.msk [vmem:[#allocation2 + $0x1c] sm:$0xf] %vm1528_vm6, %v1414_v9  ;;  %1552 = vst.msk [vmem:[#allocation2 + $0x5c] sm:$0xf] %vm1528_vm6, %v1446_v41  ;;  %1429 = vrot.lane.b32.xlu0 %v4174_v3, %s3003_s9  ;;  %1461 = vrot.lane.b32.xlu1 %v4177_v12, %s3003_s9  ;;  %v1704_v9 = vld [vmem:[#allocation2 + $0x38] sm:$0xf] }
 0x17d   : > { %v1736_v41 = vld [vmem:[#allocation2 + $0x78] sm:$0xf] }
 0x17e   : > { %v1598_v59 = vpop.permute.xlu0 %1597  ;;  %v1630_v39 = vpop.permute.xlu1 %1629 }
 0x17f   : > { %v1754_v49 = vld [vmem:[#allocation2 + $0x20] sm:$0x1]  ;;  %v1697_v51 = vsel %vm3877_vm9, %v1598_v59, %v1696_v55  ;;  %v1729_v2 = vsel %vm3877_vm9, %v1630_v39, %v1728_v34 }
 0x180   : > { %v1778_v13 = vld [vmem:[#allocation2 + $0x60] sm:$0x1]  ;;  %v1755_v3 = vsel %vm3904_vm12, 0, %v1754_v49  ;;  %1698 = vst [vmem:[#allocation2 + $0x28] sm:$0xf] %v1697_v51  ;;  %1603 = vrot.lane.b32.xlu0 %v4680_v60, %s3004_s10  ;;  %1635 = vrot.lane.b32.xlu1 %v4171_v56, %s3004_s10 }
 0x181   : > { %v1779_v12 = vsel %vm3904_vm12, 0, %v1778_v13  ;;  %1730 = vst [vmem:[#allocation2 + $0x68] sm:$0xf] %v1729_v2  ;;  %1756 = vst [vmem:[#allocation2 + $0x20] sm:$0x1] %v1755_v3 }
 0x182   : > { %1780 = vst [vmem:[#allocation2 + $0x60] sm:$0x1] %v1779_v12  ;;  %v1588_v53 = vpop.permute.xlu0 %1587  ;;  %v1620_v6 = vpop.permute.xlu1 %1619 }
 0x183   : > { %1687 = vst.msk [vmem:[#allocation2 + $0x14] sm:$0xf] %vm1673_vm7, %v1588_v53  ;;  %1719 = vst.msk [vmem:[#allocation2 + $0x54] sm:$0xf] %vm1673_vm7, %v1620_v6 }
 0x184   : > { %1607 = vrot.lane.b32.xlu0 %v4681_v48, %s3004_s10  ;;  %1639 = vrot.lane.b32.xlu1 %v1576_v61, %s3004_s10  ;;  %s4566_s10 = scalar_lea.hbm %s4620_s4, %s2790_s6 }
 0x186   : > { %v1592_v38 = vpop.permute.xlu0 %1591  ;;  %v1624_v0 = vpop.permute.xlu1 %1623 }
 0x187   : > { %v1757_v56 = vld [vmem:[#allocation2 + $0x28] sm:$0x1]  ;;  %1691 = vst.msk [vmem:[#allocation2 + $0x1c] sm:$0xf] %vm1673_vm7, %v1592_v38  ;;  %1723 = vst.msk [vmem:[#allocation2 + $0x5c] sm:$0xf] %vm1673_vm7, %v1624_v0 }
 0x188   : > { %v1781_v24 = vld [vmem:[#allocation2 + $0x68] sm:$0x1]  ;;  %v1758_v25 = vsel %vm3904_vm12, 0, %v1757_v56  ;;  %1816 = vrot.lane.b32.xlu0 %v2933_v16, %s3006_s13  ;;  %1818 = vrot.lane.b32.xlu1 %v4203_v31, %s3006_s13 }
 0x189   : > { %v1782_v19 = vsel %vm3904_vm12, 0, %v1781_v24  ;;  %1759 = vst [vmem:[#allocation2 + $0x28] sm:$0x1] %v1758_v25 }
 0x18a   : > { %1783 = vst [vmem:[#allocation2 + $0x68] sm:$0x1] %v1782_v19  ;;  %v1801_v28 = vpop.permute.xlu0 %1800  ;;  %v1803_v54 = vpop.permute.xlu1 %1802 }
 0x18b   : > { %1893 = vst.msk [vmem:[#allocation2 + $0x10] sm:$0xf] %vm1888_vm0, %v1801_v28  ;;  %1894 = vst.msk [vmem:[#allocation2 + $0x14] sm:$0xf] %vm1888_vm0, %v1803_v54 }
 0x18c   : > { %1926 = vst.msk [vmem:[#allocation2 + $0x10] sm:$0xf] %vm1921_vm11, %v1801_v28  ;;  %1927 = vst.msk [vmem:[#allocation2 + $0x14] sm:$0xf] %vm1921_vm11, %v1803_v54  ;;  %1848 = vrot.lane.b32.xlu0 %v2934_v35, %s3006_s13  ;;  %1850 = vrot.lane.b32.xlu1 %v4123_v42, %s3006_s13 }
 0x18e   : > { %v1833_v22 = vpop.permute.xlu0 %1832  ;;  %v1835_v45 = vpop.permute.xlu1 %1834 }
 0x18f   : > { %1909 = vst.msk [vmem:[#allocation2 + $0x50] sm:$0xf] %vm1888_vm0, %v1833_v22  ;;  %1910 = vst.msk [vmem:[#allocation2 + $0x54] sm:$0xf] %vm1888_vm0, %v1835_v45 }
 0x190   : > { %1942 = vst.msk [vmem:[#allocation2 + $0x50] sm:$0xf] %vm1921_vm11, %v1833_v22  ;;  %1943 = vst.msk [vmem:[#allocation2 + $0x54] sm:$0xf] %vm1921_vm11, %v1835_v45  ;;  %1820 = vrot.lane.b32.xlu0 %v2935_v21, %s3006_s13  ;;  %1822 = vrot.lane.b32.xlu1 %v2936_v15, %s3006_s13 }
 0x192   : > { %v552_v58 = vpop.permute.xlu0 %551  ;;  %v1805_v14 = vpop.permute.xlu1 %1804 }
 0x193   : > { %647 = vst.msk [vmem:[#allocation2 + $0x64] sm:$0xf] %vm596_vm3, %v552_v58  ;;  %v2904_v42 = vld [vmem:[#allocation2 + $0x10] sm:$0xff]  }
 0x194   : > { %1895 = vst.msk [vmem:[#allocation2 + $0x18] sm:$0xf] %vm1888_vm0, %v1805_v14  ;;  %1852 = vrot.lane.b32.xlu0 %v4057_v44, %s3006_s13  ;;  %1854 = vrot.lane.b32.xlu1 %v4226_v8, %s3006_s13  ;;  %s2941_s13 = sshll.u32 %s3007_s12, 4  ;;  %s2942_s13 = int_to_ptr.vmem [resolvable:$false] %s2941_s13 }
 0x195   : > { %1928 = vst.msk [vmem:[#allocation2 + $0x18] sm:$0xf] %vm1921_vm11, %v1805_v14  ;;  %2817 = vmatprep.mubr.msk.bf16.mxu0 %vm2081_vm13, %v2904_v42  ;;  %s2943_s14 = scalar_lea.vmem %s2942_s13, 4096  ;;  %p2944_p0 = scmp.lt.s32.totalorder %s4568_s7, %s2942_s13 }
 0x196   : > { %v1807_v31 = vpop.permute.xlu0 %1806  ;;  %v1837_v1 = vpop.permute.xlu1 %1836  ;;  %p2945_p1 = scmp.lt.s32.totalorder %s2943_s14, %s2937_s11 }
 0x197   : > { %1896 = vst.msk [vmem:[#allocation2 + $0x1c] sm:$0xf] %vm1888_vm0, %v1807_v31  ;;  %1911 = vst.msk [vmem:[#allocation2 + $0x58] sm:$0xf] %vm1888_vm0, %v1837_v1  ;;  %v2905_v40 = vld [vmem:[#allocation2 + $0x50] sm:$0xff]  }
 0x198   : > { %1929 = vst.msk [vmem:[#allocation2 + $0x1c] sm:$0xf] %vm1921_vm11, %v1807_v31  ;;  %1944 = vst.msk [vmem:[#allocation2 + $0x58] sm:$0xf] %vm1921_vm11, %v1837_v1  ;;  %2833 = vmatprep.mubr.msk.bf16.mxu1 %vm2081_vm13, %v2905_v40  ;;  %p2946_p2 = por %p2945_p1, %p2944_p0 }
 0x19a   : > { %v1839_v43 = vpop.permute.xlu0 %1838  ;;  %v556_v44 = vpop.permute.xlu1 %555  ;;  %p2947_p3 = pnand %p2946_p2, %p2940_p13 }
 0x19b   : > { %1912 = vst.msk [vmem:[#allocation2 + $0x5c] sm:$0xf] %vm1888_vm0, %v1839_v43 }
 0x19c   : > { %651 = vst.msk [vmem:[#allocation2 + $0x6c] sm:$0xf] %vm596_vm3, %v556_v44 }
 0x19d   : > { %1945 = vst.msk [vmem:[#allocation2 + $0x5c] sm:$0xf] %vm1921_vm11, %v1839_v43 }
 0x19e   : > { %v757_v18 = vpop.permute.xlu0 %756  ;;  %v789_v11 = vpop.permute.xlu1 %788 }
 0x19f   : > { %840 = vst.msk [vmem:[#allocation2 + $0x24] sm:$0xf] %vm832_vm4, %v757_v18  ;;  %856 = vst.msk [vmem:[#allocation2 + $0x64] sm:$0xf] %vm832_vm4, %v789_v11  ;;  %v2906_v50 = vld [vmem:[#allocation2 + $0x18] sm:$0xff]  }
 0x1a0   : > { %873 = vst.msk [vmem:[#allocation2 + $0x24] sm:$0xf] %vm865_vm5, %v757_v18  ;;  %889 = vst.msk [vmem:[#allocation2 + $0x64] sm:$0xf] %vm865_vm5, %v789_v11  ;;  %2818 = vmatmul.mubr.msk.bf16.gmra.mxu0 %vm2081_vm13, %v2906_v50 }
 0x1a2   : > { %v761_v5 = vpop.permute.xlu0 %760  ;;  %v793_v29 = vpop.permute.xlu1 %792 }
 0x1a3   : > { %842 = vst.msk [vmem:[#allocation2 + $0x2c] sm:$0xf] %vm832_vm4, %v761_v5  ;;  %858 = vst.msk [vmem:[#allocation2 + $0x6c] sm:$0xf] %vm832_vm4, %v793_v29 }
 0x1a4   : > { %v2907_v7 = vld [vmem:[#allocation2 + $0x58] sm:$0xff]   ;;  %875 = vst.msk [vmem:[#allocation2 + $0x2c] sm:$0xf] %vm865_vm5, %v761_v5  ;;  %891 = vst.msk [vmem:[#allocation2 + $0x6c] sm:$0xf] %vm865_vm5, %v793_v29 }
 0x1a5   : > { %2834 = vmatmul.mubr.msk.bf16.gmra.mxu1 %vm2081_vm13, %v2907_v7 }
 0x1a6   : > { %v1173_v57 = vpop.permute.xlu0 %1172  ;;  %v1205_v52 = vpop.permute.xlu1 %1204 }
 0x1a7   : > { %1272 = vst.msk [vmem:[#allocation2 + $0x24] sm:$0xf] %vm1250_vm10, %v1173_v57  ;;  %1304 = vst.msk [vmem:[#allocation2 + $0x64] sm:$0xf] %vm1250_vm10, %v1205_v52 }
 0x1aa   : > { %v1177_v27 = vpop.permute.xlu0 %1176  ;;  %v1209_v4 = vpop.permute.xlu1 %1208 }
 0x1ab   : > { %1276 = vst.msk [vmem:[#allocation2 + $0x2c] sm:$0xf] %vm1250_vm10, %v1177_v27  ;;  %1308 = vst.msk [vmem:[#allocation2 + $0x6c] sm:$0xf] %vm1250_vm10, %v1209_v4 }
 0x1ae   : > { %v1418_v63 = vpop.permute.xlu0 %1417  ;;  %v1450_v8 = vpop.permute.xlu1 %1449 }
 0x1af   : > { %1505 = vst.msk [vmem:[#allocation2 + $0x24] sm:$0xf] %vm1495_vm1, %v1418_v63  ;;  %1521 = vst.msk [vmem:[#allocation2 + $0x64] sm:$0xf] %vm1495_vm1, %v1450_v8 }
 0x1b0   : > { %1538 = vst.msk [vmem:[#allocation2 + $0x24] sm:$0xf] %vm1528_vm6, %v1418_v63  ;;  %1554 = vst.msk [vmem:[#allocation2 + $0x64] sm:$0xf] %vm1528_vm6, %v1450_v8 }
 0x1b2   : > { %v1602_v17 = vpop.permute.xlu0 %1601  ;;  %v1634_v23 = vpop.permute.xlu1 %1633 }
 0x1b3   : > { %v1701_v33 = vsel %vm3877_vm9, %v1602_v17, %v1700_v26  ;;  %v1733_v46 = vsel %vm3877_vm9, %v1634_v23, %v1732_v30 }
 0x1b4   : > { %1702 = vst [vmem:[#allocation2 + $0x30] sm:$0xf] %v1701_v33  ;;  %1734 = vst [vmem:[#allocation2 + $0x70] sm:$0xf] %v1733_v46  ;;  %v4425_v33 = vld [vmem:[%s4618_s2] ss:$0 sm:$0xff] }
 0x1b6   : > { %v1422_v20 = vpop.permute.xlu0 %1421  ;;  %v1454_v32 = vpop.permute.xlu1 %1453 }
 0x1b7   : > { %1507 = vst.msk [vmem:[#allocation2 + $0x2c] sm:$0xf] %vm1495_vm1, %v1422_v20  ;;  %1523 = vst.msk [vmem:[#allocation2 + $0x6c] sm:$0xf] %vm1495_vm1, %v1454_v32 }
 0x1b8   : > { %1540 = vst.msk [vmem:[#allocation2 + $0x2c] sm:$0xf] %vm1528_vm6, %v1422_v20  ;;  %1556 = vst.msk [vmem:[#allocation2 + $0x6c] sm:$0xf] %vm1528_vm6, %v1454_v32  ;;  %v4431_v20 = vld [vmem:[%s4619_s3] ss:$0 sm:$0xff] }
 0x1ba   : > { %v1606_v62 = vpop.permute.xlu0 %1605  ;;  %v1638_v37 = vpop.permute.xlu1 %1637 }
 0x1bb   : > { %v1760_v47 = vld [vmem:[#allocation2 + $0x30] sm:$0x1]  ;;  %v1705_v55 = vsel %vm3877_vm9, %v1606_v62, %v1704_v9  ;;  %v1737_v34 = vsel %vm3877_vm9, %v1638_v37, %v1736_v41 }
 0x1bc   : > { %v1784_v59 = vld [vmem:[#allocation2 + $0x70] sm:$0x1]  ;;  %v1761_v39 = vsel %vm3904_vm12, 0, %v1760_v47  ;;  %1706 = vst [vmem:[#allocation2 + $0x38] sm:$0xf] %v1705_v55 }
 0x1bd   : > { %v1785_v49 = vsel %vm3904_vm12, 0, %v1784_v59  ;;  %1738 = vst [vmem:[#allocation2 + $0x78] sm:$0xf] %v1737_v34  ;;  %1762 = vst [vmem:[#allocation2 + $0x30] sm:$0x1] %v1761_v39 }
 0x1be   : > { %1786 = vst [vmem:[#allocation2 + $0x70] sm:$0x1] %v1785_v49  ;;  %v1596_v13 = vpop.permute.xlu0 %1595  ;;  %v1628_v51 = vpop.permute.xlu1 %1627 }
 0x1bf   : > { %1695 = vst.msk [vmem:[#allocation2 + $0x24] sm:$0xf] %vm1673_vm7, %v1596_v13  ;;  %1727 = vst.msk [vmem:[#allocation2 + $0x64] sm:$0xf] %vm1673_vm7, %v1628_v51 }
 0x1c2   : > { %v1600_v2 = vpop.permute.xlu0 %1599  ;;  %v1632_v3 = vpop.permute.xlu1 %1631 }
 0x1c3   : > { %v1763_v36 = vld [vmem:[#allocation2 + $0x38] sm:$0x1]  ;;  %1699 = vst.msk [vmem:[#allocation2 + $0x2c] sm:$0xf] %vm1673_vm7, %v1600_v2  ;;  %1731 = vst.msk [vmem:[#allocation2 + $0x6c] sm:$0xf] %vm1673_vm7, %v1632_v3 }
 0x1c4   : > { %v1787_v12 = vld [vmem:[#allocation2 + $0x78] sm:$0x1]  ;;  %v1764_v60 = vsel %vm3904_vm12, 0, %v1763_v36 }
 0x1c5   : > { %v1788_v61 = vsel %vm3904_vm12, 0, %v1787_v12  ;;  %1765 = vst [vmem:[#allocation2 + $0x38] sm:$0x1] %v1764_v60 }
 0x1c6   : > { %1789 = vst [vmem:[#allocation2 + $0x78] sm:$0x1] %v1788_v61  ;;  %v1809_v53 = vpop.permute.xlu0 %1808  ;;  %v1811_v6 = vpop.permute.xlu1 %1810 }
 0x1c7   : > { %1897 = vst.msk [vmem:[#allocation2 + $0x20] sm:$0xf] %vm1888_vm0, %v1809_v53  ;;  %1898 = vst.msk [vmem:[#allocation2 + $0x24] sm:$0xf] %vm1888_vm0, %v1811_v6 }
 0x1c8   : > { %1930 = vst.msk [vmem:[#allocation2 + $0x20] sm:$0xf] %vm1921_vm11, %v1809_v53  ;;  %1931 = vst.msk [vmem:[#allocation2 + $0x24] sm:$0xf] %vm1921_vm11, %v1811_v6 }
 0x1ca   : > { %v1841_v48 = vpop.permute.xlu0 %1840  ;;  %v1843_v38 = vpop.permute.xlu1 %1842 }
 0x1cb   : > { %1913 = vst.msk [vmem:[#allocation2 + $0x60] sm:$0xf] %vm1888_vm0, %v1841_v48  ;;  %1914 = vst.msk [vmem:[#allocation2 + $0x64] sm:$0xf] %vm1888_vm0, %v1843_v38 }
 0x1cc   : > { %1946 = vst.msk [vmem:[#allocation2 + $0x60] sm:$0xf] %vm1921_vm11, %v1841_v48  ;;  %1947 = vst.msk [vmem:[#allocation2 + $0x64] sm:$0xf] %vm1921_vm11, %v1843_v38 }
 0x1ce   : > { %v560_v10 = vpop.permute.xlu0 %559  ;;  %v1813_v0 = vpop.permute.xlu1 %1812 }
 0x1cf   : > { %655 = vst.msk [vmem:[#allocation2 + $0x74] sm:$0xf] %vm596_vm3, %v560_v10  ;;  %v2908_v56 = vld [vmem:[#allocation2 + $0x20] sm:$0xff]  }
 0x1d0   : > { %1899 = vst.msk [vmem:[#allocation2 + $0x28] sm:$0xf] %vm1888_vm0, %v1813_v0  ;;  %2821 = vmatprep.mubr.msk.bf16.mxu0 %vm2081_vm13, %v2908_v56 }
 0x1d1   : > { %1932 = vst.msk [vmem:[#allocation2 + $0x28] sm:$0xf] %vm1921_vm11, %v1813_v0 }
 0x1d2   : > { %v1815_v24 = vpop.permute.xlu0 %1814  ;;  %v1845_v25 = vpop.permute.xlu1 %1844 }
 0x1d3   : > { %1900 = vst.msk [vmem:[#allocation2 + $0x2c] sm:$0xf] %vm1888_vm0, %v1815_v24  ;;  %1915 = vst.msk [vmem:[#allocation2 + $0x68] sm:$0xf] %vm1888_vm0, %v1845_v25  ;;  %v2909_v19 = vld [vmem:[#allocation2 + $0x60] sm:$0xff]  }
 0x1d4   : > { %1933 = vst.msk [vmem:[#allocation2 + $0x2c] sm:$0xf] %vm1921_vm11, %v1815_v24  ;;  %1948 = vst.msk [vmem:[#allocation2 + $0x68] sm:$0xf] %vm1921_vm11, %v1845_v25  ;;  %2837 = vmatprep.mubr.msk.bf16.mxu1 %vm2081_vm13, %v2909_v19 }
 0x1d6   : > { %v1847_v16 = vpop.permute.xlu0 %1846  ;;  %v564_v28 = vpop.permute.xlu1 %563 }
 0x1d7   : > { %1916 = vst.msk [vmem:[#allocation2 + $0x6c] sm:$0xf] %vm1888_vm0, %v1847_v16 }
 0x1d8   : > { %659 = vst.msk [vmem:[#allocation2 + $0x7c] sm:$0xf] %vm596_vm3, %v564_v28 }
 0x1d9   : > { %1949 = vst.msk [vmem:[#allocation2 + $0x6c] sm:$0xf] %vm1921_vm11, %v1847_v16 }
 0x1da   : > { %v765_v54 = vpop.permute.xlu0 %764  ;;  %v797_v35 = vpop.permute.xlu1 %796 }
 0x1db   : > { %844 = vst.msk [vmem:[#allocation2 + $0x34] sm:$0xf] %vm832_vm4, %v765_v54  ;;  %860 = vst.msk [vmem:[#allocation2 + $0x74] sm:$0xf] %vm832_vm4, %v797_v35  ;;  %v2910_v22 = vld [vmem:[#allocation2 + $0x28] sm:$0xff]  }
 0x1dc   : > { %877 = vst.msk [vmem:[#allocation2 + $0x34] sm:$0xf] %vm865_vm5, %v765_v54  ;;  %893 = vst.msk [vmem:[#allocation2 + $0x74] sm:$0xf] %vm865_vm5, %v797_v35  ;;  %2822 = vmatmul.mubr.msk.bf16.gmra.mxu0 %vm2081_vm13, %v2910_v22 }
 0x1de   : > { %v769_v45 = vpop.permute.xlu0 %768  ;;  %v801_v21 = vpop.permute.xlu1 %800 }
 0x1df   : > { %846 = vst.msk [vmem:[#allocation2 + $0x3c] sm:$0xf] %vm832_vm4, %v769_v45  ;;  %862 = vst.msk [vmem:[#allocation2 + $0x7c] sm:$0xf] %vm832_vm4, %v801_v21 }
 0x1e0   : > { %v2911_v15 = vld [vmem:[#allocation2 + $0x68] sm:$0xff]   ;;  %879 = vst.msk [vmem:[#allocation2 + $0x3c] sm:$0xf] %vm865_vm5, %v769_v45  ;;  %895 = vst.msk [vmem:[#allocation2 + $0x7c] sm:$0xf] %vm865_vm5, %v801_v21 }
 0x1e1   : > { %2838 = vmatmul.mubr.msk.bf16.gmra.mxu1 %vm2081_vm13, %v2911_v15 }
 0x1e2   : > { %v1181_v58 = vpop.permute.xlu0 %1180  ;;  %v1213_v14 = vpop.permute.xlu1 %1212 }
 0x1e3   : > { %1280 = vst.msk [vmem:[#allocation2 + $0x34] sm:$0xf] %vm1250_vm10, %v1181_v58  ;;  %1312 = vst.msk [vmem:[#allocation2 + $0x74] sm:$0xf] %vm1250_vm10, %v1213_v14 }
 0x1e6   : > { %v1185_v42 = vpop.permute.xlu0 %1184  ;;  %v1217_v31 = vpop.permute.xlu1 %1216 }
 0x1e7   : > { %1284 = vst.msk [vmem:[#allocation2 + $0x3c] sm:$0xf] %vm1250_vm10, %v1185_v42  ;;  %1316 = vst.msk [vmem:[#allocation2 + $0x7c] sm:$0xf] %vm1250_vm10, %v1217_v31 }
 0x1ea   : > { %v1426_v1 = vpop.permute.xlu0 %1425  ;;  %v1458_v40 = vpop.permute.xlu1 %1457 }
 0x1eb   : > { %1509 = vst.msk [vmem:[#allocation2 + $0x34] sm:$0xf] %vm1495_vm1, %v1426_v1  ;;  %1525 = vst.msk [vmem:[#allocation2 + $0x74] sm:$0xf] %vm1495_vm1, %v1458_v40 }
 0x1ec   : > { %1542 = vst.msk [vmem:[#allocation2 + $0x34] sm:$0xf] %vm1528_vm6, %v1426_v1  ;;  %1558 = vst.msk [vmem:[#allocation2 + $0x74] sm:$0xf] %vm1528_vm6, %v1458_v40 }
 0x1ee   : > { %v1430_v43 = vpop.permute.xlu0 %1429  ;;  %v1462_v44 = vpop.permute.xlu1 %1461 }
 0x1ef   : > { %1511 = vst.msk [vmem:[#allocation2 + $0x3c] sm:$0xf] %vm1495_vm1, %v1430_v43  ;;  %1527 = vst.msk [vmem:[#allocation2 + $0x7c] sm:$0xf] %vm1495_vm1, %v1462_v44 }
 0x1f0   : > { %1544 = vst.msk [vmem:[#allocation2 + $0x3c] sm:$0xf] %vm1528_vm6, %v1430_v43  ;;  %1560 = vst.msk [vmem:[#allocation2 + $0x7c] sm:$0xf] %vm1528_vm6, %v1462_v44 }
 0x1f2   : > { %v1604_v18 = vpop.permute.xlu0 %1603  ;;  %v1636_v11 = vpop.permute.xlu1 %1635 }
 0x1f3   : > { %1703 = vst.msk [vmem:[#allocation2 + $0x34] sm:$0xf] %vm1673_vm7, %v1604_v18  ;;  %1735 = vst.msk [vmem:[#allocation2 + $0x74] sm:$0xf] %vm1673_vm7, %v1636_v11 }
 0x1f6   : > { %v1608_v50 = vpop.permute.xlu0 %1607  ;;  %v1640_v5 = vpop.permute.xlu1 %1639 }
 0x1f7   : > { %1707 = vst.msk [vmem:[#allocation2 + $0x3c] sm:$0xf] %vm1673_vm7, %v1608_v50  ;;  %1739 = vst.msk [vmem:[#allocation2 + $0x7c] sm:$0xf] %vm1673_vm7, %v1640_v5 }
 0x1fa   : > { %v1817_v29 = vpop.permute.xlu0 %1816  ;;  %v1819_v7 = vpop.permute.xlu1 %1818 }
 0x1fb   : > { %1901 = vst.msk [vmem:[#allocation2 + $0x30] sm:$0xf] %vm1888_vm0, %v1817_v29  ;;  %1902 = vst.msk [vmem:[#allocation2 + $0x34] sm:$0xf] %vm1888_vm0, %v1819_v7 }
 0x1fc   : > { %1934 = vst.msk [vmem:[#allocation2 + $0x30] sm:$0xf] %vm1921_vm11, %v1817_v29  ;;  %1935 = vst.msk [vmem:[#allocation2 + $0x34] sm:$0xf] %vm1921_vm11, %v1819_v7 }
 0x1fe   : > { %v1849_v57 = vpop.permute.xlu0 %1848  ;;  %v1851_v52 = vpop.permute.xlu1 %1850 }
 0x1ff   : > { %1917 = vst.msk [vmem:[#allocation2 + $0x70] sm:$0xf] %vm1888_vm0, %v1849_v57  ;;  %1918 = vst.msk [vmem:[#allocation2 + $0x74] sm:$0xf] %vm1888_vm0, %v1851_v52 }
 0x200   : > { %1950 = vst.msk [vmem:[#allocation2 + $0x70] sm:$0xf] %vm1921_vm11, %v1849_v57  ;;  %1951 = vst.msk [vmem:[#allocation2 + $0x74] sm:$0xf] %vm1921_vm11, %v1851_v52 }
 0x202   : > { %v1821_v27 = vpop.permute.xlu0 %1820  ;;  %v1823_v4 = vpop.permute.xlu1 %1822 }
 0x203   : > { %1903 = vst.msk [vmem:[#allocation2 + $0x38] sm:$0xf] %vm1888_vm0, %v1821_v27  ;;  %1904 = vst.msk [vmem:[#allocation2 + $0x3c] sm:$0xf] %vm1888_vm0, %v1823_v4  ;;  %v2912_v63 = vld [vmem:[#allocation2 + $0x30] sm:$0xff]  }
 0x204   : > { %1936 = vst.msk [vmem:[#allocation2 + $0x38] sm:$0xf] %vm1921_vm11, %v1821_v27  ;;  %1937 = vst.msk [vmem:[#allocation2 + $0x3c] sm:$0xf] %vm1921_vm11, %v1823_v4  ;;  %2825 = vmatprep.mubr.msk.bf16.mxu0 %vm2081_vm13, %v2912_v63 }
 0x206   : > { %v1853_v8 = vpop.permute.xlu0 %1852  ;;  %v1855_v17 = vpop.permute.xlu1 %1854 }
 0x207   : > { %1919 = vst.msk [vmem:[#allocation2 + $0x78] sm:$0xf] %vm1888_vm0, %v1853_v8  ;;  %1920 = vst.msk [vmem:[#allocation2 + $0x7c] sm:$0xf] %vm1888_vm0, %v1855_v17  ;;  %v2913_v26 = vld [vmem:[#allocation2 + $0x70] sm:$0xff]  }
 0x208   : > { %1952 = vst.msk [vmem:[#allocation2 + $0x78] sm:$0xf] %vm1921_vm11, %v1853_v8  ;;  %1953 = vst.msk [vmem:[#allocation2 + $0x7c] sm:$0xf] %vm1921_vm11, %v1855_v17  ;;  %2841 = vmatprep.mubr.msk.bf16.mxu1 %vm2081_vm13, %v2913_v26 }
 0x20b   : > { %v2914_v30 = vld [vmem:[#allocation2 + $0x38] sm:$0xff]  }
 0x20c   : > { %2826 = vmatmul.mubr.msk.bf16.gmra.mxu0 %vm2081_vm13, %v2914_v30 }
 0x20f   : > { %v2915_v23 = vld [vmem:[#allocation2 + $0x78] sm:$0xff]  }
 0x210   : > { %2842 = vmatmul.mubr.msk.bf16.gmra.mxu1 %vm2081_vm13, %v2915_v23 }
 0x21d   : > { %v2815_v46 = vpop.f32.mrf.mxu0 }
 0x21e   : > { %v2307_v32 = vmul.f32 %v2815_v46, %v4425_v33 }
 0x21f   : > { %v2171_v62 = vpop.f32.mrf.mxu0 }
 0x220   : > { %v2346_v9 = vadd.f32 %v4431_v20, %v2307_v32  ;;  %v2305_v41 = vmul.f32 %v4425_v33, %v2171_v62 }
 0x221   : > { %v2816_v37 = vpop.f32.mrf.mxu0  ;;  %v2831_v47 = vpop.f32.mrf.mxu1 }
 0x222   : > { %v2378_v59 = vmax.f32 %v2346_v9, 0.0  ;;  %v2344_v55 = vadd.f32 %v4431_v20, %v2305_v41  ;;  %v2308_v34 = vmul.f32 %v2816_v37, %v4425_v33  ;;  %v2323_v39 = vmul.f32 %v2831_v47, %v4425_v33 }
 0x223   : > { %v2174_v49 = vpop.f32.mrf.mxu0  ;;  %v2235_v13 = vpop.f32.mrf.mxu1 }
 0x224   : > { %v2760_v51 = vpack.c.bf16 %v2378_v59, %v2378_v59  ;;  %v2376_v2 = vmax.f32 %v2344_v55, 0.0  ;;  %v2347_v3 = vadd.f32 %v4431_v20, %v2308_v34  ;;  %v2362_v36 = vadd.f32 %v4431_v20, %v2323_v39 }
 0x225   : > { %v2306_v12 = vmul.f32 %v4425_v33, %v2174_v49  ;;  %v2321_v60 = vmul.f32 %v4425_v33, %v2235_v13  ;;  %v2832_v61 = vpop.f32.mrf.mxu1 }
 0x226   : > { %2539 = vst.msk [vmem:[%s4445_s5 + $0x8] sm:$0xf] %vm2536_vm2, %v2760_v51  ;;  %v2758_v53 = vpack.c.bf16 %v2376_v2, %v2376_v2  ;;  %v2379_v6 = vmax.f32 %v2347_v3, 0.0  ;;  %v2394_v48 = vmax.f32 %v2362_v36, 0.0  ;;  %v2324_v38 = vmul.f32 %v2832_v61, %v4425_v33 }
 0x227   : > { %v2345_v10 = vadd.f32 %v4431_v20, %v2306_v12  ;;  %v2360_v0 = vadd.f32 %v4431_v20, %v2321_v60  ;;  %v2238_v56 = vpop.f32.mrf.mxu1 }
 0x228   : > { %2537 = vst.msk [vmem:[%s4445_s5] sm:$0xf] %vm2536_vm2, %v2758_v53  ;;  %v2761_v24 = vpack.c.bf16 %v2379_v6, %v2379_v6  ;;  %v2776_v25 = vpack.c.bf16 %v2394_v48, %v2394_v48  ;;  %v2363_v19 = vadd.f32 %v4431_v20, %v2324_v38  ;;  %v2322_v16 = vmul.f32 %v4425_v33, %v2238_v56 }
 0x229   : > { %v2377_v28 = vmax.f32 %v2345_v10, 0.0  ;;  %v2392_v54 = vmax.f32 %v2360_v0, 0.0 }
 0x22a   : > { %2540 = vst.msk [vmem:[%s4445_s5 + $0xc] sm:$0xf] %vm2536_vm2, %v2761_v24  ;;  %2555 = vst.msk [vmem:[%s4445_s5 + $0x48] sm:$0xf] %vm2536_vm2, %v2776_v25  ;;  %v2395_v35 = vmax.f32 %v2363_v19, 0.0  ;;  %v2361_v22 = vadd.f32 %v4431_v20, %v2322_v16 }
 0x22b   : > { %v2759_v45 = vpack.c.bf16 %v2377_v28, %v2377_v28  ;;  %v2774_v21 = vpack.c.bf16 %v2392_v54, %v2392_v54 }
 0x22c   : > { %v2777_v15 = vpack.c.bf16 %v2395_v35, %v2395_v35  ;;  %v2393_v58 = vmax.f32 %v2361_v22, 0.0 }
 0x22d   : > { %2538 = vst.msk [vmem:[%s4445_s5 + $0x4] sm:$0xf] %vm2536_vm2, %v2759_v45  ;;  %2553 = vst.msk [vmem:[%s4445_s5 + $0x40] sm:$0xf] %vm2536_vm2, %v2774_v21 }
 0x22e   : > { %2556 = vst.msk [vmem:[%s4445_s5 + $0x4c] sm:$0xf] %vm2536_vm2, %v2777_v15  ;;  %v2775_v14 = vpack.c.bf16 %v2393_v58, %v2393_v58 }
 0x230   : > { %2554 = vst.msk [vmem:[%s4445_s5 + $0x44] sm:$0xf] %vm2536_vm2, %v2775_v14 }
 0x260   : > { %v2819_v42 = vpop.f32.mrf.mxu0 }
 0x261   : > { %v2311_v31 = vmul.f32 %v2819_v42, %v4425_v33 }
 0x262   : > { %v2187_v1 = vpop.f32.mrf.mxu0 }
 0x263   : > { %v2350_v40 = vadd.f32 %v4431_v20, %v2311_v31  ;;  %v2309_v43 = vmul.f32 %v4425_v33, %v2187_v1 }
 0x264   : > { %v2820_v44 = vpop.f32.mrf.mxu0 }
 0x265   : > { %v2835_v18 = vpop.f32.mrf.mxu1  ;;  %v2382_v11 = vmax.f32 %v2350_v40, 0.0  ;;  %v2348_v50 = vadd.f32 %v4431_v20, %v2309_v43  ;;  %v2312_v5 = vmul.f32 %v2820_v44, %v4425_v33 }
 0x266   : > { %v2327_v29 = vmul.f32 %v2835_v18, %v4425_v33  ;;  %v2190_v7 = vpop.f32.mrf.mxu0 }
 0x267   : > { %v2251_v57 = vpop.f32.mrf.mxu1  ;;  %v2764_v52 = vpack.c.bf16 %v2382_v11, %v2382_v11  ;;  %v2380_v27 = vmax.f32 %v2348_v50, 0.0  ;;  %v2351_v4 = vadd.f32 %v4431_v20, %v2312_v5  ;;  %v2310_v8 = vmul.f32 %v4425_v33, %v2190_v7 }
 0x268   : > { %v2366_v63 = vadd.f32 %v4431_v20, %v2327_v29  ;;  %v2325_v17 = vmul.f32 %v4425_v33, %v2251_v57 }
 0x269   : > { %v2836_v26 = vpop.f32.mrf.mxu1  ;;  %2543 = vst.msk [vmem:[%s4445_s5 + $0x18] sm:$0xf] %vm2536_vm2, %v2764_v52  ;;  %v2762_v30 = vpack.c.bf16 %v2380_v27, %v2380_v27  ;;  %v2383_v23 = vmax.f32 %v2351_v4, 0.0  ;;  %v2349_v62 = vadd.f32 %v4431_v20, %v2310_v8 }
 0x26a   : > { %v2398_v46 = vmax.f32 %v2366_v63, 0.0  ;;  %v2328_v32 = vmul.f32 %v2836_v26, %v4425_v33  ;;  %v2364_v9 = vadd.f32 %v4431_v20, %v2325_v17 }
 0x26b   : > { %v2254_v41 = vpop.f32.mrf.mxu1  ;;  %2541 = vst.msk [vmem:[%s4445_s5 + $0x10] sm:$0xf] %vm2536_vm2, %v2762_v30  ;;  %v2765_v37 = vpack.c.bf16 %v2383_v23, %v2383_v23  ;;  %v2381_v34 = vmax.f32 %v2349_v62, 0.0 }
 0x26c   : > { %v2780_v47 = vpack.c.bf16 %v2398_v46, %v2398_v46  ;;  %v2367_v59 = vadd.f32 %v4431_v20, %v2328_v32  ;;  %v2326_v55 = vmul.f32 %v4425_v33, %v2254_v41  ;;  %v2396_v39 = vmax.f32 %v2364_v9, 0.0 }
 0x26d   : > { %2544 = vst.msk [vmem:[%s4445_s5 + $0x1c] sm:$0xf] %vm2536_vm2, %v2765_v37  ;;  %v2763_v51 = vpack.c.bf16 %v2381_v34, %v2381_v34 }
 0x26e   : > { %2559 = vst.msk [vmem:[%s4445_s5 + $0x58] sm:$0xf] %vm2536_vm2, %v2780_v47  ;;  %v2399_v49 = vmax.f32 %v2367_v59, 0.0  ;;  %v2365_v13 = vadd.f32 %v4431_v20, %v2326_v55  ;;  %v2778_v2 = vpack.c.bf16 %v2396_v39, %v2396_v39 }
 0x26f   : > { %2542 = vst.msk [vmem:[%s4445_s5 + $0x14] sm:$0xf] %vm2536_vm2, %v2763_v51 }
 0x270   : > { %v2781_v3 = vpack.c.bf16 %v2399_v49, %v2399_v49  ;;  %v2397_v36 = vmax.f32 %v2365_v13, 0.0  ;;  %2557 = vst.msk [vmem:[%s4445_s5 + $0x50] sm:$0xf] %vm2536_vm2, %v2778_v2 }
 0x272   : > { %2560 = vst.msk [vmem:[%s4445_s5 + $0x5c] sm:$0xf] %vm2536_vm2, %v2781_v3  ;;  %v2779_v12 = vpack.c.bf16 %v2397_v36, %v2397_v36 }
 0x274   : > { %2558 = vst.msk [vmem:[%s4445_s5 + $0x54] sm:$0xf] %vm2536_vm2, %v2779_v12 }
 0x29c   : > { %v2823_v60 = vpop.f32.mrf.mxu0 }
 0x29d   : > { %v2315_v61 = vmul.f32 %v2823_v60, %v4425_v33 }
 0x29e   : > { %v2203_v53 = vpop.f32.mrf.mxu0 }
 0x29f   : > { %v2354_v6 = vadd.f32 %v4431_v20, %v2315_v61  ;;  %v2313_v48 = vmul.f32 %v4425_v33, %v2203_v53 }
 0x2a0   : > { %v2824_v38 = vpop.f32.mrf.mxu0 }
 0x2a1   : > { %v2839_v10 = vpop.f32.mrf.mxu1  ;;  %v2386_v0 = vmax.f32 %v2354_v6, 0.0  ;;  %v2352_v56 = vadd.f32 %v4431_v20, %v2313_v48  ;;  %v2316_v24 = vmul.f32 %v2824_v38, %v4425_v33 }
 0x2a2   : > { %v2331_v25 = vmul.f32 %v2839_v10, %v4425_v33  ;;  %v2206_v19 = vpop.f32.mrf.mxu0 }
 0x2a3   : > { %v2267_v16 = vpop.f32.mrf.mxu1  ;;  %v2768_v28 = vpack.c.bf16 %v2386_v0, %v2386_v0  ;;  %v2384_v54 = vmax.f32 %v2352_v56, 0.0  ;;  %v2355_v35 = vadd.f32 %v4431_v20, %v2316_v24  ;;  %v2314_v45 = vmul.f32 %v4425_v33, %v2206_v19 }
 0x2a4   : > { %v2370_v22 = vadd.f32 %v4431_v20, %v2331_v25  ;;  %v2329_v21 = vmul.f32 %v4425_v33, %v2267_v16 }
 0x2a5   : > { %v2840_v15 = vpop.f32.mrf.mxu1  ;;  %2547 = vst.msk [vmem:[%s4445_s5 + $0x28] sm:$0xf] %vm2536_vm2, %v2768_v28  ;;  %v2766_v58 = vpack.c.bf16 %v2384_v54, %v2384_v54  ;;  %v2387_v14 = vmax.f32 %v2355_v35, 0.0  ;;  %v2353_v1 = vadd.f32 %v4431_v20, %v2314_v45 }
 0x2a6   : > { %v2402_v42 = vmax.f32 %v2370_v22, 0.0  ;;  %v2332_v31 = vmul.f32 %v2840_v15, %v4425_v33  ;;  %v2368_v40 = vadd.f32 %v4431_v20, %v2329_v21 }
 0x2a7   : > { %v2270_v43 = vpop.f32.mrf.mxu1  ;;  %2545 = vst.msk [vmem:[%s4445_s5 + $0x20] sm:$0xf] %vm2536_vm2, %v2766_v58  ;;  %v2769_v44 = vpack.c.bf16 %v2387_v14, %v2387_v14  ;;  %v2385_v5 = vmax.f32 %v2353_v1, 0.0 }
 0x2a8   : > { %v2784_v18 = vpack.c.bf16 %v2402_v42, %v2402_v42  ;;  %v2371_v11 = vadd.f32 %v4431_v20, %v2332_v31  ;;  %v2330_v50 = vmul.f32 %v4425_v33, %v2270_v43  ;;  %v2400_v29 = vmax.f32 %v2368_v40, 0.0 }
 0x2a9   : > { %2548 = vst.msk [vmem:[%s4445_s5 + $0x2c] sm:$0xf] %vm2536_vm2, %v2769_v44  ;;  %v2767_v52 = vpack.c.bf16 %v2385_v5, %v2385_v5 }
 0x2aa   : > { %2563 = vst.msk [vmem:[%s4445_s5 + $0x68] sm:$0xf] %vm2536_vm2, %v2784_v18  ;;  %v2403_v7 = vmax.f32 %v2371_v11, 0.0  ;;  %v2369_v57 = vadd.f32 %v4431_v20, %v2330_v50  ;;  %v2782_v27 = vpack.c.bf16 %v2400_v29, %v2400_v29 }
 0x2ab   : > { %2546 = vst.msk [vmem:[%s4445_s5 + $0x24] sm:$0xf] %vm2536_vm2, %v2767_v52 }
 0x2ac   : > { %v2785_v4 = vpack.c.bf16 %v2403_v7, %v2403_v7  ;;  %v2401_v63 = vmax.f32 %v2369_v57, 0.0  ;;  %2561 = vst.msk [vmem:[%s4445_s5 + $0x60] sm:$0xf] %vm2536_vm2, %v2782_v27 }
 0x2ae   : > { %2564 = vst.msk [vmem:[%s4445_s5 + $0x6c] sm:$0xf] %vm2536_vm2, %v2785_v4  ;;  %v2783_v8 = vpack.c.bf16 %v2401_v63, %v2401_v63 }
 0x2b0   : > { %2562 = vst.msk [vmem:[%s4445_s5 + $0x64] sm:$0xf] %vm2536_vm2, %v2783_v8 }
 0x2cc   : > { %v2827_v17 = vpop.f32.mrf.mxu0 }
 0x2cd   : > { %v2319_v26 = vmul.f32 %v2827_v17, %v4425_v33 }
 0x2ce   : > { %v2219_v30 = vpop.f32.mrf.mxu0 }
 0x2cf   : > { %v2358_v23 = vadd.f32 %v4431_v20, %v2319_v26  ;;  %v2317_v46 = vmul.f32 %v4425_v33, %v2219_v30 }
 0x2d0   : > { %v2828_v32 = vpop.f32.mrf.mxu0  ;;  %v2843_v62 = vpop.f32.mrf.mxu1 }
 0x2d1   : > { %v2390_v9 = vmax.f32 %v2358_v23, 0.0  ;;  %v2356_v41 = vadd.f32 %v4431_v20, %v2317_v46  ;;  %v2320_v37 = vmul.f32 %v2828_v32, %v4425_v33  ;;  %v2335_v47 = vmul.f32 %v2843_v62, %v4425_v33 }
 0x2d2   : > { %v2222_v59 = vpop.f32.mrf.mxu0  ;;  %v2283_v55 = vpop.f32.mrf.mxu1 }
 0x2d3   : > { %v2772_v34 = vpack.c.bf16 %v2390_v9, %v2390_v9  ;;  %v2388_v39 = vmax.f32 %v2356_v41, 0.0  ;;  %v2359_v49 = vadd.f32 %v4431_v20, %v2320_v37  ;;  %v2374_v13 = vadd.f32 %v4431_v20, %v2335_v47 }
 0x2d4   : > { %v2318_v51 = vmul.f32 %v4425_v33, %v2222_v59  ;;  %v2333_v2 = vmul.f32 %v4425_v33, %v2283_v55  ;;  %v2844_v3 = vpop.f32.mrf.mxu1 }
 0x2d5   : > { %2551 = vst.msk [vmem:[%s4445_s5 + $0x38] sm:$0xf] %vm2536_vm2, %v2772_v34  ;;  %v2770_v36 = vpack.c.bf16 %v2388_v39, %v2388_v39  ;;  %v2391_v12 = vmax.f32 %v2359_v49, 0.0  ;;  %v2406_v60 = vmax.f32 %v2374_v13, 0.0  ;;  %v2336_v61 = vmul.f32 %v2844_v3, %v4425_v33 }
 0x2d6   : > { %v2357_v53 = vadd.f32 %v4431_v20, %v2318_v51  ;;  %v2372_v6 = vadd.f32 %v4431_v20, %v2333_v2  ;;  %v2286_v48 = vpop.f32.mrf.mxu1 }
 0x2d7   : > { %2549 = vst.msk [vmem:[%s4445_s5 + $0x30] sm:$0xf] %vm2536_vm2, %v2770_v36  ;;  %v2773_v38 = vpack.c.bf16 %v2391_v12, %v2391_v12  ;;  %v2788_v10 = vpack.c.bf16 %v2406_v60, %v2406_v60  ;;  %v2375_v0 = vadd.f32 %v4431_v20, %v2336_v61  ;;  %v2334_v56 = vmul.f32 %v4425_v33, %v2286_v48 }
 0x2d8   : > { %v2389_v24 = vmax.f32 %v2357_v53, 0.0  ;;  %v2404_v25 = vmax.f32 %v2372_v6, 0.0 }
 0x2d9   : > { %2552 = vst.msk [vmem:[%s4445_s5 + $0x3c] sm:$0xf] %vm2536_vm2, %v2773_v38  ;;  %2567 = vst.msk [vmem:[%s4445_s5 + $0x78] sm:$0xf] %vm2536_vm2, %v2788_v10  ;;  %v2407_v19 = vmax.f32 %v2375_v0, 0.0  ;;  %v2373_v16 = vadd.f32 %v4431_v20, %v2334_v56 }
 0x2da   : > { %v2771_v28 = vpack.c.bf16 %v2389_v24, %v2389_v24  ;;  %v2786_v54 = vpack.c.bf16 %v2404_v25, %v2404_v25 }
 0x2db   : > { %v2789_v35 = vpack.c.bf16 %v2407_v19, %v2407_v19  ;;  %v2405_v22 = vmax.f32 %v2373_v16, 0.0 }
 0x2dc   : > { %2550 = vst.msk [vmem:[%s4445_s5 + $0x34] sm:$0xf] %vm2536_vm2, %v2771_v28  ;;  %2565 = vst.msk [vmem:[%s4445_s5 + $0x70] sm:$0xf] %vm2536_vm2, %v2786_v54 }
 0x2dd   : > { %2568 = vst.msk [vmem:[%s4445_s5 + $0x7c] sm:$0xf] %vm2536_vm2, %v2789_v35  ;;  %v2787_v33 = vpack.c.bf16 %v2405_v22, %v2405_v22 }
 0x2df   : > { %2566 = vst.msk [vmem:[%s4445_s5 + $0x74] sm:$0xf] %vm2536_vm2, %v2787_v33 }
 0x2e0   : > { %2950 = shalt.err (!%p2947_p3)
}
 0x2e1   : > { %s2951_s20 = scalar_lea.hbm %s4566_s10, 2048  ;;  %s2955_s27 = scalar_lea.hbm %s4620_s4, 4096 }
 0x2e2   : > { %p2952_p4 = scmp.ne.s32.totalorder %s4566_s10, %s2951_s20  ;;  %p2956_p9 = scmp.lt.s32.totalorder %s4566_s10, %s4620_s4 }
 0x2e3   : > { %p2957_p10 = scmp.lt.s32.totalorder %s2955_s27, %s2951_s20 }
 0x2e4   : > { %p2953_p7 = pnand %p2952_p4, %p3073_p5 }
 0x2e5   : > { %p2958_p11 = por %p2957_p10, %p2956_p9 }
 0x2e6   : > { %p2954_p8 = pneg %p2953_p7 }
 0x2e8   : > { %p2959_p12 = pnand %p2958_p11, %p2954_p8 }
 0x2ea   : > { %2962 = shalt.err (!%p2959_p12)
}
 0x2eb   : > { %s3008_s30 = smov 64   ;;  %s3009_s5 = smov 4  }
 0x2ec   : > { %2849 = dma.vmem_to_hbm [thread:$0]  (%p3073_p5), %s4568_s7, 2048, %s4566_s10, %s4576_s19, %s3008_s30, %s3008_s30, %s3009_s5  }
 0x2ed PF: > { %p2855_p13 = scmp.ge.s32.totalorder %s2997_s18, 2  ;;  %s2598_s6 = sand.u32 1, %s2985_s15  }
 0x2ee   : > { %s2599_s8 = scalar_lea.sflag [#allocation4], %s2598_s6 }
 0x2ef   : > { %p2852_p0 = pnand %p2855_p13, %p3077_p6 }
 0x2f1   : > { %p2853_p1 = pneg %p2852_p0 }
 0x2f3   : > { %2980 = dma.done.wait (%p2853_p1), %s2599_s8, 2048  }
 0x2f4   : > { %2982 = vsyncadd (%p2853_p1), %s2599_s8, 4294965248  ;;  %p14_p2 = scmp.ge.s32.totalorder %s3060_s21, 4   ;;  %s4682_s15 = smov %s2989_s16 }
 0x2f5   : > { %s4683_s16 = smov %s2993_s17  ;;  %s4684_s17 = smov %s3071_s24 }
 0x2f6   : > { %s4685_s18 = smov %s3060_s21  ;;  %16 = sbr.rel (!%p14_p2) target bundleno = 3 (0x3), region = 73 }
 0x2fb   :  { %2604 = vsyncpa [#allocation4], 1 }
 0x2fc   :  { %2606 = vsyncpa [#allocation4 + $0x1], 1 }

</bundles_post_ra>
